<compile_context>
chip_gen: v7x
topology: tpu7x:2x2x1
jax: 0.10.0
libtpu: 0.0.40
codegen_flags: <defaults>
</compile_context>

<pallas_src>
import jax
import jax.numpy as jnp
from jax import lax
from jax.experimental import pallas as pl
from jax.experimental.pallas import tpu as pltpu

EPS = 1e-5


# -----------------------------------------------------------------------------
# Single fused kernel: 1x1 conv -> BN (batch stats) -> ReLU -> 3x3 conv (pad=1)
# -----------------------------------------------------------------------------
def fused_kernel(x_ref, w1_ref, gamma_ref, beta_ref, w2_ref, o_ref, pad_ref):
    # x_ref:     (Cin, P)       = (672, 49)  bf16 -- free reshape of NCHW input
    # w1_ref:    (Cmid, Cin)    = (128, 672) bf16 -- free reshape of OIHW 1x1 w
    # gamma_ref: (Cmid, 1) f32   beta_ref: (Cmid, 1) f32
    # w2_ref:    (9*Cmid, Cout) = (1152, 32) bf16 -- (ky,kx,cin)-major rows
    # o_ref:     (Cout, P)      = (32, 49)  f32  -- channel-major output
    # pad_ref:   VMEM scratch (H+2, W+2, Cmid) f32 -- zero-padded activation
    Hp, Wp, Cmid = pad_ref.shape
    H, W = Hp - 2, Wp - 2
    P = H * W
    Cout = o_ref.shape[0]

    # ---- stage 1: 1x1 conv, MXU-canonical orientation (contract LHS minor /
    #      RHS major):  y_t[c, p] = sum_k w1[c, k] * x[k, p].
    #      No operand transposes are needed, so x is never relaid out.
    y_t = lax.dot_general(
        w1_ref[...], x_ref[...],
        dimension_numbers=(((1,), (0,)), ((), ())),
        preferred_element_type=jnp.float32)                     # (Cmid, P) f32

    # ---- BatchNorm2d, training mode: biased batch statistics over N*H*W per
    #      channel, folded into a single per-channel FMA, then ReLU.
    #      All elementwise math stays in f32.
    mean = jnp.mean(y_t, axis=1, keepdims=True)                 # (Cmid, 1)
    var = jnp.mean(jnp.square(y_t - mean), axis=1, keepdims=True)
    scale = gamma_ref[...] * lax.rsqrt(var + EPS)               # (Cmid, 1)
    shift = beta_ref[...] - mean * scale
    act_t = jnp.maximum(y_t * scale + shift, 0.0)               # (Cmid, P) f32

    # ---- one small f32 transpose to channel-minor for the 3x3 conv.
    act = jnp.transpose(act_t)                                  # (P, Cmid)

    # ---- zero padding (padding=1) entirely in VMEM: memset + interior store.
    pad_ref[...] = jnp.zeros_like(pad_ref)
    pad_ref[pl.ds(1, H), pl.ds(1, W), :] = act.reshape(H, W, Cmid)

    # ---- stage 2: 3x3 conv as nine accumulating K=Cmid MXU matmuls taken
    #      directly off the padded activation (no im2col buffer / traffic).
    acc = jnp.zeros((P, Cout), jnp.float32)
    for ky in range(3):
        for kx in range(3):
            tap = ky * 3 + kx
            lhs = pad_ref[pl.ds(ky, H), pl.ds(kx, W), :].reshape(P, Cmid)
            acc = acc + jnp.dot(lhs.astype(jnp.bfloat16),
                                w2_ref[pl.ds(tap * Cmid, Cmid), :],
                                preferred_element_type=jnp.float32)

    # ---- emit channel-major so the wrapper's NCHW view is a free reshape.
    o_ref[...] = jnp.transpose(acc)                             # (Cout, P)


# -----------------------------------------------------------------------------
# Wrapper: NCHW in / NCHW out, matching the PyTorch module exactly.
# -----------------------------------------------------------------------------
@jax.jit
def forward(x_nchw, w1_oihw, gamma, beta, w2_oihw):
    N, Cin, H, W = x_nchw.shape
    assert N == 1, "fused kernel specialized to the module's batch size of 1"
    Cmid = w1_oihw.shape[0]
    Cout = w2_oihw.shape[0]
    P = H * W

    # Activation / 1x1 weight: free (layout-preserving) reshapes + bf16 cast.
    x_cp = x_nchw.reshape(Cin, P).astype(jnp.bfloat16)          # (672, 49)
    w1_mc = w1_oihw.reshape(Cmid, Cin).astype(jnp.bfloat16)     # (128, 672)
    g = gamma.reshape(Cmid, 1).astype(jnp.float32)
    b = beta.reshape(Cmid, 1).astype(jnp.float32)
    # One small one-time weight shuffle: OIHW -> (ky, kx, cin, cout) flattened.
    w2_flat = (jnp.transpose(w2_oihw, (2, 3, 1, 0))
               .reshape(9 * Cmid, Cout).astype(jnp.bfloat16))   # (1152, 32)

    flops = 2 * P * Cin * Cmid + 2 * P * (9 * Cmid) * Cout
    bytes_accessed = (x_cp.size * 2 + w1_mc.size * 2 + w2_flat.size * 2
                      + g.size * 4 + b.size * 4 + Cout * P * 4)

    vmem = pl.BlockSpec(memory_space=pltpu.MemorySpace.VMEM)
    out_cp = pl.pallas_call(
        fused_kernel,
        out_shape=jax.ShapeDtypeStruct((Cout, P), jnp.float32),
        in_specs=[vmem, vmem, vmem, vmem, vmem],
        out_specs=vmem,
        scratch_shapes=[
            pltpu.VMEM((H + 2, W + 2, Cmid), jnp.float32),   # padded activation
        ],
        cost_estimate=pl.CostEstimate(flops=flops, transcendentals=Cmid,
                                      bytes_accessed=bytes_accessed),
    )(x_cp, w1_mc, g, b, w2_flat)

    # (Cout, P) -> (1, Cout, H, W): free reshape, no trailing XLA transpose.
    return out_cp.reshape(N, Cout, H, W)


# -----------------------------------------------------------------------------
# Pure-JAX f32 reference (same semantics) for a sanity check.
# -----------------------------------------------------------------------------
def reference(x, w1, gamma, beta, w2):
    dn = ("NCHW", "OIHW", "NCHW")
    y = lax.conv_general_dilated(x, w1, (1, 1), "VALID", dimension_numbers=dn)
    mean = y.mean(axis=(0, 2, 3), keepdims=True)
    var = ((y - mean) ** 2).mean(axis=(0, 2, 3), keepdims=True)
    y = (y - mean) / jnp.sqrt(var + EPS)
    y = y * gamma.reshape(1, -1, 1, 1) + beta.reshape(1, -1, 1, 1)
    y = jnp.maximum(y, 0.0)
    return lax.conv_general_dilated(y, w2, (1, 1), ((1, 1), (1, 1)),
                                    dimension_numbers=dn)


if __name__ == "__main__":
    key = jax.random.PRNGKey(0)
    k_x, k_w1, k_w2, k_g, k_b = jax.random.split(key, 5)

    N, Cin, H, W = 1, 672, 7, 7
    Cmid, Cout = 128, 32

    x = jax.random.normal(k_x, (N, Cin, H, W), jnp.float32)
    w1 = jax.random.normal(k_w1, (Cmid, Cin, 1, 1), jnp.float32) * 0.05
    w2 = jax.random.normal(k_w2, (Cout, Cmid, 3, 3), jnp.float32) * 0.05
    gamma = 1.0 + 0.1 * jax.random.normal(k_g, (Cmid,), jnp.float32)
    beta = 0.1 * jax.random.normal(k_b, (Cmid,), jnp.float32)

    out = jax.block_until_ready(forward(x, w1, gamma, beta, w2))
    ref = jax.block_until_ready(reference(x, w1, gamma, beta, w2))

    assert out.shape == (N, Cout, H, W), out.shape
    err = float(jnp.max(jnp.abs(out - ref)))
    # bf16 matmul operands (f32 accumulation) => slightly looser tolerance
    # than the previous all-f32 kernel; f32 reference kept as ground truth.
    assert jnp.allclose(out, ref, rtol=5e-2, atol=5e-2), err

    print("KERNEL_OK")
</pallas_src>

<mosaic_0001>
module attributes {stable_mosaic.version = 11 : i64} {
  func.func @fused_kernel(%arg0: memref<672x49xbf16, #tpu.memory_space<vmem>>, %arg1: memref<128x672xbf16, #tpu.memory_space<vmem>>, %arg2: memref<128x1xf32, #tpu.memory_space<vmem>>, %arg3: memref<128x1xf32, #tpu.memory_space<vmem>>, %arg4: memref<1152x32xbf16, #tpu.memory_space<vmem>>, %arg5: memref<32x49xf32, #tpu.memory_space<vmem>>, %arg6: memref<9x9x128xf32, #tpu.memory_space<vmem>>) attributes {dimension_semantics = [], scalar_prefetch = 0 : i64, scratch_operands = 1 : i64, tpu.core_type = #tpu.core_type<tc>} {
    %c0 = arith.constant 0 : index
    %c0_0 = arith.constant 0 : index
    %0 = vector.load %arg1[%c0, %c0_0] : memref<128x672xbf16, #tpu.memory_space<vmem>>, vector<128x672xbf16>
    %c0_1 = arith.constant 0 : index
    %c0_2 = arith.constant 0 : index
    %1 = vector.load %arg0[%c0_1, %c0_2] : memref<672x49xbf16, #tpu.memory_space<vmem>>, vector<672x49xbf16>
    %cst = arith.constant dense<0.000000e+00> : vector<128x49xf32>
    %2 = tpu.matmul %0, %1, %cst {dimension_numbers = #tpu.dot_dimension_numbers<[1], [0], [0], [1], [0, 0, 1, 1], [], []>} : vector<128x672xbf16>, vector<672x49xbf16>, vector<128x49xf32> -> vector<128x49xf32>
    %cst_3 = arith.constant dense<0.000000e+00> : vector<128xf32>
    %3 = vector.multi_reduction <add>, %2, %cst_3 [1] : vector<128x49xf32> to vector<128xf32>
    %4 = vector.shape_cast %3 : vector<128xf32> to vector<128x1xf32>
    %cst_4 = arith.constant 4.900000e+01 : f32
    %5 = vector.broadcast %cst_4 : f32 to vector<128x1xf32>
    %6 = arith.divf %4, %5 : vector<128x1xf32>
    %7 = vector.broadcast %6 : vector<128x1xf32> to vector<128x49xf32>
    %8 = arith.subf %2, %7 : vector<128x49xf32>
    %9 = arith.mulf %8, %8 : vector<128x49xf32>
    %cst_5 = arith.constant dense<0.000000e+00> : vector<128xf32>
    %10 = vector.multi_reduction <add>, %9, %cst_5 [1] : vector<128x49xf32> to vector<128xf32>
    %11 = vector.shape_cast %10 : vector<128xf32> to vector<128x1xf32>
    %cst_6 = arith.constant 4.900000e+01 : f32
    %12 = vector.broadcast %cst_6 : f32 to vector<128x1xf32>
    %13 = arith.divf %11, %12 : vector<128x1xf32>
    %c0_7 = arith.constant 0 : index
    %c0_8 = arith.constant 0 : index
    %14 = vector.load %arg2[%c0_7, %c0_8] : memref<128x1xf32, #tpu.memory_space<vmem>>, vector<128x1xf32>
    %cst_9 = arith.constant 9.99999974E-6 : f32
    %15 = vector.broadcast %cst_9 : f32 to vector<128x1xf32>
    %16 = arith.addf %13, %15 : vector<128x1xf32>
    %17 = math.rsqrt %16 : vector<128x1xf32>
    %18 = arith.mulf %14, %17 : vector<128x1xf32>
    %c0_10 = arith.constant 0 : index
    %c0_11 = arith.constant 0 : index
    %19 = vector.load %arg3[%c0_10, %c0_11] : memref<128x1xf32, #tpu.memory_space<vmem>>, vector<128x1xf32>
    %20 = arith.mulf %6, %18 : vector<128x1xf32>
    %21 = arith.subf %19, %20 : vector<128x1xf32>
    %22 = vector.broadcast %18 : vector<128x1xf32> to vector<128x49xf32>
    %23 = arith.mulf %2, %22 : vector<128x49xf32>
    %24 = vector.broadcast %21 : vector<128x1xf32> to vector<128x49xf32>
    %25 = arith.addf %23, %24 : vector<128x49xf32>
    %cst_12 = arith.constant 0.000000e+00 : f32
    %26 = vector.broadcast %cst_12 : f32 to vector<128x49xf32>
    %27 = arith.maximumf %25, %26 : vector<128x49xf32>
    %28 = tpu.transpose %27, [1, 0] : vector<128x49xf32> -> vector<49x128xf32>
    %cst_13 = arith.constant 0.000000e+00 : f32
    %29 = vector.broadcast %cst_13 : f32 to vector<9x9x128xf32>
    %c0_14 = arith.constant 0 : index
    %c0_15 = arith.constant 0 : index
    %c0_16 = arith.constant 0 : index
    %30 = vector.load %arg6[%c0_14, %c0_15, %c0_16] : memref<9x9x128xf32, #tpu.memory_space<vmem>>, vector<9x9x128xf32>
    tpu.vector_store %arg6[%c0_14, %c0_15, %c0_16], %29 {strides = array<i32>} : memref<9x9x128xf32, #tpu.memory_space<vmem>>, vector<9x9x128xf32>,
    %31 = vector.shape_cast %28 : vector<49x128xf32> to vector<7x7x128xf32>
    %c1 = arith.constant 1 : index
    %c1_17 = arith.constant 1 : index
    %c0_18 = arith.constant 0 : index
    %32 = vector.load %arg6[%c1, %c1_17, %c0_18] : memref<9x9x128xf32, #tpu.memory_space<vmem>>, vector<7x7x128xf32>
    tpu.vector_store %arg6[%c1, %c1_17, %c0_18], %31 {strides = array<i32>} : memref<9x9x128xf32, #tpu.memory_space<vmem>>, vector<7x7x128xf32>,
    %cst_19 = arith.constant 0.000000e+00 : f32
    %33 = vector.broadcast %cst_19 : f32 to vector<49x32xf32>
    %c0_20 = arith.constant 0 : index
    %c0_21 = arith.constant 0 : index
    %c0_22 = arith.constant 0 : index
    %34 = vector.load %arg6[%c0_20, %c0_21, %c0_22] : memref<9x9x128xf32, #tpu.memory_space<vmem>>, vector<7x7x128xf32>
    %35 = vector.shape_cast %34 : vector<7x7x128xf32> to vector<49x128xf32>
    %36 = arith.truncf %35 : vector<49x128xf32> to vector<49x128xbf16>
    %c0_23 = arith.constant 0 : index
    %c0_24 = arith.constant 0 : index
    %37 = vector.load %arg4[%c0_23, %c0_24] : memref<1152x32xbf16, #tpu.memory_space<vmem>>, vector<128x32xbf16>
    %cst_25 = arith.constant dense<0.000000e+00> : vector<49x32xf32>
    %38 = tpu.matmul %36, %37, %cst_25 {dimension_numbers = #tpu.dot_dimension_numbers<[1], [0], [0], [1], [0, 0, 1, 1], [], []>} : vector<49x128xbf16>, vector<128x32xbf16>, vector<49x32xf32> -> vector<49x32xf32>
    %39 = arith.addf %33, %38 : vector<49x32xf32>
    %c0_26 = arith.constant 0 : index
    %c1_27 = arith.constant 1 : index
    %c0_28 = arith.constant 0 : index
    %40 = vector.load %arg6[%c0_26, %c1_27, %c0_28] : memref<9x9x128xf32, #tpu.memory_space<vmem>>, vector<7x7x128xf32>
    %41 = vector.shape_cast %40 : vector<7x7x128xf32> to vector<49x128xf32>
    %42 = arith.truncf %41 : vector<49x128xf32> to vector<49x128xbf16>
    %c128 = arith.constant 128 : index
    %c0_29 = arith.constant 0 : index
    %43 = vector.load %arg4[%c128, %c0_29] : memref<1152x32xbf16, #tpu.memory_space<vmem>>, vector<128x32xbf16>
    %cst_30 = arith.constant dense<0.000000e+00> : vector<49x32xf32>
    %44 = tpu.matmul %42, %43, %cst_30 {dimension_numbers = #tpu.dot_dimension_numbers<[1], [0], [0], [1], [0, 0, 1, 1], [], []>} : vector<49x128xbf16>, vector<128x32xbf16>, vector<49x32xf32> -> vector<49x32xf32>
    %45 = arith.addf %39, %44 : vector<49x32xf32>
    %c0_31 = arith.constant 0 : index
    %c2 = arith.constant 2 : index
    %c0_32 = arith.constant 0 : index
    %46 = vector.load %arg6[%c0_31, %c2, %c0_32] : memref<9x9x128xf32, #tpu.memory_space<vmem>>, vector<7x7x128xf32>
    %47 = vector.shape_cast %46 : vector<7x7x128xf32> to vector<49x128xf32>
    %48 = arith.truncf %47 : vector<49x128xf32> to vector<49x128xbf16>
    %c256 = arith.constant 256 : index
    %c0_33 = arith.constant 0 : index
    %49 = vector.load %arg4[%c256, %c0_33] : memref<1152x32xbf16, #tpu.memory_space<vmem>>, vector<128x32xbf16>
    %cst_34 = arith.constant dense<0.000000e+00> : vector<49x32xf32>
    %50 = tpu.matmul %48, %49, %cst_34 {dimension_numbers = #tpu.dot_dimension_numbers<[1], [0], [0], [1], [0, 0, 1, 1], [], []>} : vector<49x128xbf16>, vector<128x32xbf16>, vector<49x32xf32> -> vector<49x32xf32>
    %51 = arith.addf %45, %50 : vector<49x32xf32>
    %c1_35 = arith.constant 1 : index
    %c0_36 = arith.constant 0 : index
    %c0_37 = arith.constant 0 : index
    %52 = vector.load %arg6[%c1_35, %c0_36, %c0_37] : memref<9x9x128xf32, #tpu.memory_space<vmem>>, vector<7x7x128xf32>
    %53 = vector.shape_cast %52 : vector<7x7x128xf32> to vector<49x128xf32>
    %54 = arith.truncf %53 : vector<49x128xf32> to vector<49x128xbf16>
    %c384 = arith.constant 384 : index
    %c0_38 = arith.constant 0 : index
    %55 = vector.load %arg4[%c384, %c0_38] : memref<1152x32xbf16, #tpu.memory_space<vmem>>, vector<128x32xbf16>
    %cst_39 = arith.constant dense<0.000000e+00> : vector<49x32xf32>
    %56 = tpu.matmul %54, %55, %cst_39 {dimension_numbers = #tpu.dot_dimension_numbers<[1], [0], [0], [1], [0, 0, 1, 1], [], []>} : vector<49x128xbf16>, vector<128x32xbf16>, vector<49x32xf32> -> vector<49x32xf32>
    %57 = arith.addf %51, %56 : vector<49x32xf32>
    %c1_40 = arith.constant 1 : index
    %c1_41 = arith.constant 1 : index
    %c0_42 = arith.constant 0 : index
    %58 = vector.load %arg6[%c1_40, %c1_41, %c0_42] : memref<9x9x128xf32, #tpu.memory_space<vmem>>, vector<7x7x128xf32>
    %59 = vector.shape_cast %58 : vector<7x7x128xf32> to vector<49x128xf32>
    %60 = arith.truncf %59 : vector<49x128xf32> to vector<49x128xbf16>
    %c512 = arith.constant 512 : index
    %c0_43 = arith.constant 0 : index
    %61 = vector.load %arg4[%c512, %c0_43] : memref<1152x32xbf16, #tpu.memory_space<vmem>>, vector<128x32xbf16>
    %cst_44 = arith.constant dense<0.000000e+00> : vector<49x32xf32>
    %62 = tpu.matmul %60, %61, %cst_44 {dimension_numbers = #tpu.dot_dimension_numbers<[1], [0], [0], [1], [0, 0, 1, 1], [], []>} : vector<49x128xbf16>, vector<128x32xbf16>, vector<49x32xf32> -> vector<49x32xf32>
    %63 = arith.addf %57, %62 : vector<49x32xf32>
    %c1_45 = arith.constant 1 : index
    %c2_46 = arith.constant 2 : index
    %c0_47 = arith.constant 0 : index
    %64 = vector.load %arg6[%c1_45, %c2_46, %c0_47] : memref<9x9x128xf32, #tpu.memory_space<vmem>>, vector<7x7x128xf32>
    %65 = vector.shape_cast %64 : vector<7x7x128xf32> to vector<49x128xf32>
    %66 = arith.truncf %65 : vector<49x128xf32> to vector<49x128xbf16>
    %c640 = arith.constant 640 : index
    %c0_48 = arith.constant 0 : index
    %67 = vector.load %arg4[%c640, %c0_48] : memref<1152x32xbf16, #tpu.memory_space<vmem>>, vector<128x32xbf16>
    %cst_49 = arith.constant dense<0.000000e+00> : vector<49x32xf32>
    %68 = tpu.matmul %66, %67, %cst_49 {dimension_numbers = #tpu.dot_dimension_numbers<[1], [0], [0], [1], [0, 0, 1, 1], [], []>} : vector<49x128xbf16>, vector<128x32xbf16>, vector<49x32xf32> -> vector<49x32xf32>
    %69 = arith.addf %63, %68 : vector<49x32xf32>
    %c2_50 = arith.constant 2 : index
    %c0_51 = arith.constant 0 : index
    %c0_52 = arith.constant 0 : index
    %70 = vector.load %arg6[%c2_50, %c0_51, %c0_52] : memref<9x9x128xf32, #tpu.memory_space<vmem>>, vector<7x7x128xf32>
    %71 = vector.shape_cast %70 : vector<7x7x128xf32> to vector<49x128xf32>
    %72 = arith.truncf %71 : vector<49x128xf32> to vector<49x128xbf16>
    %c768 = arith.constant 768 : index
    %c0_53 = arith.constant 0 : index
    %73 = vector.load %arg4[%c768, %c0_53] : memref<1152x32xbf16, #tpu.memory_space<vmem>>, vector<128x32xbf16>
    %cst_54 = arith.constant dense<0.000000e+00> : vector<49x32xf32>
    %74 = tpu.matmul %72, %73, %cst_54 {dimension_numbers = #tpu.dot_dimension_numbers<[1], [0], [0], [1], [0, 0, 1, 1], [], []>} : vector<49x128xbf16>, vector<128x32xbf16>, vector<49x32xf32> -> vector<49x32xf32>
    %75 = arith.addf %69, %74 : vector<49x32xf32>
    %c2_55 = arith.constant 2 : index
    %c1_56 = arith.constant 1 : index
    %c0_57 = arith.constant 0 : index
    %76 = vector.load %arg6[%c2_55, %c1_56, %c0_57] : memref<9x9x128xf32, #tpu.memory_space<vmem>>, vector<7x7x128xf32>
    %77 = vector.shape_cast %76 : vector<7x7x128xf32> to vector<49x128xf32>
    %78 = arith.truncf %77 : vector<49x128xf32> to vector<49x128xbf16>
    %c896 = arith.constant 896 : index
    %c0_58 = arith.constant 0 : index
    %79 = vector.load %arg4[%c896, %c0_58] : memref<1152x32xbf16, #tpu.memory_space<vmem>>, vector<128x32xbf16>
    %cst_59 = arith.constant dense<0.000000e+00> : vector<49x32xf32>
    %80 = tpu.matmul %78, %79, %cst_59 {dimension_numbers = #tpu.dot_dimension_numbers<[1], [0], [0], [1], [0, 0, 1, 1], [], []>} : vector<49x128xbf16>, vector<128x32xbf16>, vector<49x32xf32> -> vector<49x32xf32>
    %81 = arith.addf %75, %80 : vector<49x32xf32>
    %c2_60 = arith.constant 2 : index
    %c2_61 = arith.constant 2 : index
    %c0_62 = arith.constant 0 : index
    %82 = vector.load %arg6[%c2_60, %c2_61, %c0_62] : memref<9x9x128xf32, #tpu.memory_space<vmem>>, vector<7x7x128xf32>
    %83 = vector.shape_cast %82 : vector<7x7x128xf32> to vector<49x128xf32>
    %84 = arith.truncf %83 : vector<49x128xf32> to vector<49x128xbf16>
    %c1024 = arith.constant 1024 : index
    %c0_63 = arith.constant 0 : index
    %85 = vector.load %arg4[%c1024, %c0_63] : memref<1152x32xbf16, #tpu.memory_space<vmem>>, vector<128x32xbf16>
    %cst_64 = arith.constant dense<0.000000e+00> : vector<49x32xf32>
    %86 = tpu.matmul %84, %85, %cst_64 {dimension_numbers = #tpu.dot_dimension_numbers<[1], [0], [0], [1], [0, 0, 1, 1], [], []>} : vector<49x128xbf16>, vector<128x32xbf16>, vector<49x32xf32> -> vector<49x32xf32>
    %87 = arith.addf %81, %86 : vector<49x32xf32>
    %88 = tpu.transpose %87, [1, 0] : vector<49x32xf32> -> vector<32x49xf32>
    %c0_65 = arith.constant 0 : index
    %c0_66 = arith.constant 0 : index
    %89 = vector.load %arg5[%c0_65, %c0_66] : memref<32x49xf32, #tpu.memory_space<vmem>>, vector<32x49xf32>
    tpu.vector_store %arg5[%c0_65, %c0_66], %88 {strides = array<i32>} : memref<32x49xf32, #tpu.memory_space<vmem>>, vector<32x49xf32>,
    return
  }
}

</mosaic_0001>

<bundles_post_ra>
// kernel: forward.1
= control target key start
LH: loop header
LB: loop body
LE: loop exit
PB: predicated region body
PF: predicated region fallthrough
CT: control target
= control target key end

     0   :  { %v10454_v1 = vmov 0   ;;  %vm637_vm0 = vcmask 261120   ;;  %vm953_vm1 = vcmask 400384   ;;  %s12368_s0 = inlined_call_operand.vmem [shape: bf16[672,49], index: 0, kind: input, shape index: {}]   ;;  %s12369_s1 = inlined_call_operand.vmem [shape: bf16[128,672], index: 1, kind: input, shape index: {}]   ;;  %s12370_s2 = inlined_call_operand.vmem [shape: f32[128,1], index: 2, kind: input, shape index: {}]   ;;  %s12371_s3 = inlined_call_operand.vmem [shape: f32[128,1], index: 3, kind: input, shape index: {}]   ;;  %s12372_s4 = inlined_call_operand.vmem [shape: bf16[1152,32], index: 4, kind: input, shape index: {}]   ;;  %s12373_s5 = inlined_call_operand.vmem [shape: f32[32,49], index: 5, kind: output, shape index: {}]  }
   0x1   :  { %v10162_v0 = vld [vmem:[%s12368_s0 + $0x40] sm:$0xff]   ;;  %10160 = vset.pattern.permute.xlu0 %v10454_v1  ;;  %10161 = vset.pattern.permute.xlu1 %v10454_v1  ;;  %v10164_v3 = vld [vmem:[%s12368_s0 + $0x48] sm:$0xff]   ;;  %v10166_v5 = vld [vmem:[%s12368_s0 + $0x50] sm:$0xff]  }
   0x2   :  { %v10163_v2 = vld [vmem:[%s12368_s0] sm:$0xff]   ;;  %9626 = vmatprep.subr.bf16.mxu0 %v10162_v0  ;;  %v10165_v4 = vld [vmem:[%s12368_s0 + $0x8] sm:$0xff]   ;;  %v10167_v6 = vld [vmem:[%s12368_s0 + $0x10] sm:$0xff]  }
   0x3   :  { %9627 = vmatpush3.bf16.msra.mxu0 %v10163_v2  ;;  %v10168_v7 = vld [vmem:[%s12368_s0 + $0x58] sm:$0xff]   ;;  %v10170_v9 = vld [vmem:[%s12368_s0 + $0x60] sm:$0xff]   ;;  %v10172_v11 = vld [vmem:[%s12368_s0 + $0x68] sm:$0xff]  }
   0x4   :  { %9628 = vmatprep.subr.bf16.mxu0 %v10164_v3  ;;  %v10169_v8 = vld [vmem:[%s12368_s0 + $0x18] sm:$0xff]   ;;  %v10171_v10 = vld [vmem:[%s12368_s0 + $0x20] sm:$0xff]   ;;  %v10173_v13 = vld [vmem:[%s12368_s0 + $0x28] sm:$0xff]  }
   0x5   :  { %v10180_v12 = vld [vmem:[%s12369_s1 + $0x4] ss:$24 sps:$4 sm:$0xff]   ;;  %v10174_v14 = vld [vmem:[%s12368_s0 + $0x70] sm:$0xff]   ;;  %v10178_v19 = vld [vmem:[%s12369_s1] ss:$24 sps:$4 sm:$0xff]  }
   0x6   :  { %694 = vmatprep.mubr.bf16.mxu0 %v10180_v12  ;;  %v10175_v15 = vld [vmem:[%s12368_s0 + $0x30] sm:$0xff]   ;;  %v10176_v16 = vld [vmem:[%s12368_s0 + $0x78] sm:$0xff]   ;;  %v10181_v18 = vld [vmem:[%s12368_s0 + $0xc0] sm:$0xff]  }
   0x7   :  { %9629 = vmatpush3.bf16.msra.mxu0 %v10165_v4  ;;  %v10177_v17 = vld [vmem:[%s12368_s0 + $0x38] sm:$0xff]   ;;  %v10182_v20 = vld [vmem:[%s12368_s0 + $0x80] sm:$0xff]   ;;  %v10183_v21 = vld [vmem:[%s12369_s1 + $0x34] ss:$24 sps:$4 sm:$0xff]  }
   0x8   :  { %9630 = vmatprep.subr.bf16.mxu0 %v10166_v5  ;;  %v10186_v22 = vld [vmem:[%s12368_s0 + $0xc8] sm:$0xff]   ;;  %v10191_v24 = vld [vmem:[%s12368_s0 + $0xd0] sm:$0xff]   ;;  %v10188_v26 = vld [vmem:[%s12369_s1 + $0x64] ss:$24 sps:$4 sm:$0xff]  }
   0x9   :  { %v10187_v23 = vld [vmem:[%s12368_s0 + $0x88] sm:$0xff]   ;;  %v10192_v27 = vld [vmem:[%s12368_s0 + $0x90] sm:$0xff]   ;;  %v10196_v28 = vld [vmem:[%s12368_s0 + $0xd8] sm:$0xff]  }
   0xa   :  { %v10185_v25 = vld [vmem:[%s12369_s1 + $0x30] ss:$24 sps:$4 sm:$0xff]   ;;  %v10197_v29 = vld [vmem:[%s12368_s0 + $0x98] sm:$0xff]   ;;  %v10201_v30 = vld [vmem:[%s12368_s0 + $0xe0] sm:$0xff]  }
   0xb   :  { %9631 = vmatpush3.bf16.msra.mxu0 %v10167_v6  ;;  %v10190_v31 = vld [vmem:[%s12369_s1 + $0x60] ss:$24 sps:$4 sm:$0xff]   ;;  %v10193_v32 = vld [vmem:[%s12369_s1 + $0x94] ss:$24 sps:$4 sm:$0xff]   ;;  %v10195_v37 = vld [vmem:[%s12369_s1 + $0x90] ss:$24 sps:$4 sm:$0xff]  }
   0xc   :  { %9632 = vmatprep.subr.bf16.mxu0 %v10168_v7  ;;  %v10202_v33 = vld [vmem:[%s12368_s0 + $0xa0] sm:$0xff]   ;;  %v10206_v34 = vld [vmem:[%s12368_s0 + $0xe8] sm:$0xff]   ;;  %v10211_v36 = vld [vmem:[%s12368_s0 + $0xf0] sm:$0xff]  }
   0xd   :  { %v10207_v35 = vld [vmem:[%s12368_s0 + $0xa8] sm:$0xff]   ;;  %v10198_v38 = vld [vmem:[%s12369_s1 + $0xc4] ss:$24 sps:$4 sm:$0xff]   ;;  %v10212_v39 = vld [vmem:[%s12368_s0 + $0xb0] sm:$0xff]  }
   0xe   :  { %v10216_v40 = vld [vmem:[%s12368_s0 + $0xf8] sm:$0xff]   ;;  %v10203_v43 = vld [vmem:[%s12369_s1 + $0xf4] ss:$24 sps:$4 sm:$0xff]   ;;  %v10205_v44 = vld [vmem:[%s12369_s1 + $0xf0] ss:$24 sps:$4 sm:$0xff]  }
   0xf   :  { %9633 = vmatpush3.bf16.msra.mxu0 %v10169_v8  ;;  %v10217_v41 = vld [vmem:[%s12368_s0 + $0xb8] sm:$0xff]   ;;  %v10213_v47 = vld [vmem:[%s12369_s1 + $0x154] ss:$24 sps:$4 sm:$0xff]   ;;  %v10215_v48 = vld [vmem:[%s12369_s1 + $0x150] ss:$24 sps:$4 sm:$0xff]  }
  0x10   :  { %9634 = vmatprep.subr.bf16.mxu0 %v10170_v9  ;;  %v10200_v42 = vld [vmem:[%s12369_s1 + $0xc0] ss:$24 sps:$4 sm:$0xff]   ;;  %v10208_v45 = vld [vmem:[%s12369_s1 + $0x124] ss:$24 sps:$4 sm:$0xff]   ;;  %v10225_v53 = vld [vmem:[%s12368_s0 + $0x108] sm:$0xff]  }
  0x11   :  { %v10210_v46 = vld [vmem:[%s12369_s1 + $0x120] ss:$24 sps:$4 sm:$0xff]   ;;  %v10220_v49 = vld [vmem:[%s12369_s1 + $0xc] ss:$24 sps:$4 sm:$0xff]   ;;  %v10222_v52 = vld [vmem:[%s12369_s1 + $0x3c] ss:$24 sps:$4 sm:$0xff]  }
  0x12   :  { %v10218_v50 = vld [vmem:[%s12369_s1 + $0x8] ss:$24 sps:$4 sm:$0xff]   ;;  %v10224_v54 = vld [vmem:[%s12369_s1 + $0x38] ss:$24 sps:$4 sm:$0xff]   ;;  %v10227_v56 = vld [vmem:[%s12369_s1 + $0x6c] ss:$24 sps:$4 sm:$0xff]  }
  0x13   :  { %9635 = vmatpush3.bf16.msra.mxu0 %v10171_v10  ;;  %v10221_v51 = vld [vmem:[%s12368_s0 + $0x100] sm:$0xff]   ;;  %v10226_v55 = vld [vmem:[%s12368_s0 + $0x110] sm:$0xff]   ;;  %v10230_v57 = vld [vmem:[%s12368_s0 + $0x118] sm:$0xff]  }
  0x14   :  { %9636 = vmatprep.subr.bf16.mxu0 %v10172_v11  ;;  %v10229_v58 = vld [vmem:[%s12369_s1 + $0x68] ss:$24 sps:$4 sm:$0xff]   ;;  %v10231_v59 = vld [vmem:[%s12369_s1 + $0x9c] ss:$24 sps:$4 sm:$0xff]   ;;  %v10233_v62 = vld [vmem:[%s12369_s1 + $0x98] ss:$24 sps:$4 sm:$0xff]  }
  0x15   :  { %v10234_v60 = vld [vmem:[%s12368_s0 + $0x120] sm:$0xff]   ;;  %v10238_v61 = vld [vmem:[%s12368_s0 + $0x128] sm:$0xff]   ;;  %v10242_v0 = vld [vmem:[%s12368_s0 + $0x130] sm:$0xff]  }
  0x16   :  { %v10235_v63 = vld [vmem:[%s12369_s1 + $0xcc] ss:$24 sps:$4 sm:$0xff]   ;;  %v10243_v2 = vld [vmem:[%s12368_s0 + $0x138] sm:$0xff]   ;;  %v10237_v3 = vld [vmem:[%s12369_s1 + $0xc8] ss:$24 sps:$4 sm:$0xff]  }
  0x17   :  { %9637 = vmatpush3.bf16.msra.mxu0 %v10173_v13  ;;  %v10239_v4 = vld [vmem:[%s12369_s1 + $0xfc] ss:$24 sps:$4 sm:$0xff]   ;;  %v10247_v5 = vld [vmem:[%s12368_s0 + $0x140] sm:$0xff]   ;;  %v10251_v6 = vld [vmem:[%s12368_s0 + $0x148] sm:$0xff]  }
  0x18   :  { %9638 = vmatprep.subr.bf16.mxu0 %v10174_v14  ;;  %v10241_v7 = vld [vmem:[%s12369_s1 + $0xf8] ss:$24 sps:$4 sm:$0xff]   ;;  %v10244_v8 = vld [vmem:[%s12369_s1 + $0x12c] ss:$24 sps:$4 sm:$0xff]   ;;  %v10246_v9 = vld [vmem:[%s12369_s1 + $0x128] ss:$24 sps:$4 sm:$0xff]  }
  0x19   :  { %v10248_v10 = vld [vmem:[%s12369_s1 + $0x15c] ss:$24 sps:$4 sm:$0xff]   ;;  %v10252_v12 = vld [vmem:[%s12369_s1 + $0x10] ss:$24 sps:$4 sm:$0xff]   ;;  %v10257_v14 = vld [vmem:[%s12369_s1 + $0x40] ss:$24 sps:$4 sm:$0xff]  }
  0x1a   :  { %v10254_v11 = vld [vmem:[%s12369_s1 + $0x14] ss:$24 sps:$4 sm:$0xff]   ;;  %v10255_v13 = vld [vmem:[%s12369_s1 + $0x44] ss:$24 sps:$4 sm:$0xff]  }
  0x1b   :  { %9639 = vmatpush3.bf16.msra.mxu0 %v10175_v15  ;;  %v10258_v15 = vld [vmem:[%s12369_s1 + $0x74] ss:$24 sps:$4 sm:$0xff]  }
  0x1c   :  { %9640 = vmatprep.subr.bf16.mxu0 %v10176_v16  ;;  %v10260_v16 = vld [vmem:[%s12369_s1 + $0x70] ss:$24 sps:$4 sm:$0xff]  }
  0x1f   :  { %9641 = vmatpush3.bf16.msra.mxu0 %v10177_v17  ;;  %v10261_v17 = vld [vmem:[%s12369_s1 + $0xa4] ss:$24 sps:$4 sm:$0xff]  }
  0x20   :  { %9690 = vmatprep.subr.bf16.mxu0 %v10181_v18  ;;  %v10263_v18 = vld [vmem:[%s12369_s1 + $0xa0] ss:$24 sps:$4 sm:$0xff]  }
  0x22   :  { %695 = vmatmul.mubr.bf16.vlgmr.msra.gmra.mrb[0].mxu0 %v10178_v19  ;;  %v10264_v19 = vld [vmem:[%s12369_s1 + $0xd4] ss:$24 sps:$4 sm:$0xff]  }
  0x23   :  { %9691 = vmatpush3.bf16.msra.mxu0 %v10182_v20  ;;  %702 = vmatprep.mubr.bf16.mxu0 %v10183_v21  ;;  %v10266_v20 = vld [vmem:[%s12369_s1 + $0xd0] ss:$24 sps:$4 sm:$0xff]   ;;  %v10267_v21 = vld [vmem:[%s12369_s1 + $0x104] ss:$24 sps:$4 sm:$0xff]  }
  0x24   :  { %9692 = vmatprep.subr.bf16.mxu0 %v10186_v22  ;;  %v10269_v22 = vld [vmem:[%s12369_s1 + $0x100] ss:$24 sps:$4 sm:$0xff]  }
  0x27   :  { %9693 = vmatpush3.bf16.msra.mxu0 %v10187_v23  ;;  %v10270_v23 = vld [vmem:[%s12369_s1 + $0x134] ss:$24 sps:$4 sm:$0xff]  }
  0x28   :  { %9694 = vmatprep.subr.bf16.mxu0 %v10191_v24  ;;  %v10272_v24 = vld [vmem:[%s12369_s1 + $0x130] ss:$24 sps:$4 sm:$0xff]  }
  0x2a   :  { %703 = vmatmul.mubr.bf16.gmra.mrb[4].mxu0 %v10185_v25  ;;  %v10273_v25 = vld [vmem:[%s12369_s1 + $0x164] ss:$24 sps:$4 sm:$0xff]  }
  0x2b   :  { %710 = vmatprep.mubr.bf16.mxu0 %v10188_v26  ;;  %9695 = vmatpush3.bf16.msra.mxu0 %v10192_v27  ;;  %v10275_v26 = vld [vmem:[%s12369_s1 + $0x160] ss:$24 sps:$4 sm:$0xff]  }
  0x2c   :  { %9696 = vmatprep.subr.bf16.mxu0 %v10196_v28 }
  0x2f   :  { %9697 = vmatpush3.bf16.msra.mxu0 %v10197_v29 }
  0x30   :  { %9698 = vmatprep.subr.bf16.mxu0 %v10201_v30 }
  0x32   :  { %711 = vmatmul.mubr.bf16.gmra.mrb[8].mxu0 %v10190_v31 }
  0x33   :  { %718 = vmatprep.mubr.bf16.mxu0 %v10193_v32  ;;  %9699 = vmatpush3.bf16.msra.mxu0 %v10202_v33 }
  0x34   :  { %9700 = vmatprep.subr.bf16.mxu0 %v10206_v34 }
  0x37   :  { %9701 = vmatpush3.bf16.msra.mxu0 %v10207_v35 }
  0x38   :  { %9702 = vmatprep.subr.bf16.mxu0 %v10211_v36 }
  0x3a   :  { %719 = vmatmul.mubr.bf16.gmra.mrb[12].mxu0 %v10195_v37 }
  0x3b   :  { %726 = vmatprep.mubr.bf16.mxu0 %v10198_v38  ;;  %9703 = vmatpush3.bf16.msra.mxu0 %v10212_v39 }
  0x3c   :  { %9704 = vmatprep.subr.bf16.mxu0 %v10216_v40 }
  0x3f   :  { %9705 = vmatpush3.bf16.msra.mxu0 %v10217_v41 }
  0x40   :  { %856 = vmatprep.subr.bf16.mxu0 %v10454_v1 }
  0x42   :  { %727 = vmatmul.mubr.bf16.gmra.mrb[16].mxu0 %v10200_v42 }
  0x43   :  { %734 = vmatprep.mubr.bf16.mxu0 %v10203_v43 }
  0x4a   :  { %735 = vmatmul.mubr.bf16.gmra.mrb[20].mxu0 %v10205_v44 }
  0x4b   :  { %742 = vmatprep.mubr.bf16.mxu0 %v10208_v45 }
  0x52   :  { %743 = vmatmul.mubr.bf16.gmra.mrb[24].mxu0 %v10210_v46 }
  0x53   :  { %750 = vmatprep.mubr.bf16.mxu0 %v10213_v47 }
  0x5a   :  { %751 = vmatmul.mubr.bf16.gmra.mrb[28].mxu0 %v10215_v48 }
  0x5b   :  { %791 = vmatprep.mubr.bf16.mxu0 %v10220_v49 }
  0x62   :  { %792 = vmatmul.mubr.bf16.vlgmr.msra.gmra.mrb[32].mxu0 %v10218_v50 }
  0x63   :  { %857 = vmatpush1.bf16.msra.mxu0 %v10221_v51  ;;  %799 = vmatprep.mubr.bf16.mxu0 %v10222_v52 }
  0x64   :  { %858 = vmatprep.subr.bf16.mxu0 %v10454_v1 }
  0x67   :  { %859 = vmatpush1.bf16.msra.mxu0 %v10225_v53 }
  0x68   :  { %860 = vmatprep.subr.bf16.mxu0 %v10454_v1 }
  0x6a   :  { %800 = vmatmul.mubr.bf16.gmra.mrb[36].mxu0 %v10224_v54 }
  0x6b   :  { %861 = vmatpush1.bf16.msra.mxu0 %v10226_v55  ;;  %807 = vmatprep.mubr.bf16.mxu0 %v10227_v56 }
  0x6c   :  { %862 = vmatprep.subr.bf16.mxu0 %v10454_v1 }
  0x6f   :  { %863 = vmatpush1.bf16.msra.mxu0 %v10230_v57 }
  0x70   :  { %864 = vmatprep.subr.bf16.mxu0 %v10454_v1 }
  0x72   :  { %808 = vmatmul.mubr.bf16.gmra.mrb[40].mxu0 %v10229_v58 }
  0x73   :  { %815 = vmatprep.mubr.bf16.mxu0 %v10231_v59  ;;  %865 = vmatpush1.bf16.msra.mxu0 %v10234_v60 }
  0x74   :  { %866 = vmatprep.subr.bf16.mxu0 %v10454_v1 }
  0x77   :  { %867 = vmatpush1.bf16.msra.mxu0 %v10238_v61 }
  0x78   :  { %868 = vmatprep.subr.bf16.mxu0 %v10454_v1 }
  0x7a   :  { %816 = vmatmul.mubr.bf16.gmra.mrb[44].mxu0 %v10233_v62 }
  0x7b   :  { %823 = vmatprep.mubr.bf16.mxu0 %v10235_v63  ;;  %869 = vmatpush1.bf16.msra.mxu0 %v10242_v0 }
  0x7c   :  { %870 = vmatprep.subr.bf16.mxu0 %v10454_v1 }
  0x7f   :  { %871 = vmatpush1.bf16.msra.mxu0 %v10243_v2 }
  0x80   :  { %872 = vmatprep.subr.bf16.mxu0 %v10454_v1 }
  0x82   :  { %824 = vmatmul.mubr.bf16.gmra.mrb[48].mxu0 %v10237_v3 }
  0x83   :  { %831 = vmatprep.mubr.bf16.mxu0 %v10239_v4  ;;  %873 = vmatpush1.bf16.msra.mxu0 %v10247_v5 }
  0x84   :  { %874 = vmatprep.subr.bf16.mxu0 %v10454_v1  ;;  %v10250_v1 = vld [vmem:[%s12369_s1 + $0x158] ss:$24 sps:$4 sm:$0xff]  }
  0x87   :  { %875 = vmatpush1.bf16.msra.mxu0 %v10251_v6 }
  0x8a   :  { %832 = vmatmul.mubr.bf16.gmra.mrb[52].mxu0 %v10241_v7 }
  0x8b   :  { %839 = vmatprep.mubr.bf16.mxu0 %v10244_v8 }
  0x92   :  { %840 = vmatmul.mubr.bf16.gmra.mrb[56].mxu0 %v10246_v9 }
  0x93   :  { %847 = vmatprep.mubr.bf16.mxu0 %v10248_v10 }
  0x9a   :  { %848 = vmatmul.mubr.bf16.gmra.mrb[60].mxu0 %v10250_v1 }
  0x9b   :  { %9504 = vmatprep.mubr.msk.bf16.mxu0 %vm637_vm0, %v10254_v11 }
  0xa2   :  { %889 = vmatmul.mubr.bf16.vlgmr.msra.gmra.mrb[64].mxu0 %v10252_v12 }
  0xa3   :  { %9505 = vmatprep.mubr.msk.bf16.mxu0 %vm637_vm0, %v10255_v13 }
  0xaa   :  { %897 = vmatmul.mubr.bf16.gmra.mrb[68].mxu0 %v10257_v14 }
  0xab   :  { %9506 = vmatprep.mubr.msk.bf16.mxu0 %vm637_vm0, %v10258_v15 }
  0xb2   :  { %905 = vmatmul.mubr.bf16.gmra.mrb[72].mxu0 %v10260_v16 }
  0xb3   :  { %9507 = vmatprep.mubr.msk.bf16.mxu0 %vm637_vm0, %v10261_v17 }
  0xba   :  { %913 = vmatmul.mubr.bf16.gmra.mrb[76].mxu0 %v10263_v18 }
  0xbb   :  { %9508 = vmatprep.mubr.msk.bf16.mxu0 %vm637_vm0, %v10264_v19 }
  0xc2   :  { %921 = vmatmul.mubr.bf16.gmra.mrb[80].mxu0 %v10266_v20 }
  0xc3   :  { %9509 = vmatprep.mubr.msk.bf16.mxu0 %vm637_vm0, %v10267_v21 }
  0xca   :  { %929 = vmatmul.mubr.bf16.gmra.mrb[84].mxu0 %v10269_v22 }
  0xcb   :  { %9510 = vmatprep.mubr.msk.bf16.mxu0 %vm637_vm0, %v10270_v23 }
  0xd2   :  { %937 = vmatmul.mubr.bf16.gmra.mrb[88].mxu0 %v10272_v24 }
  0xd3   :  { %9511 = vmatprep.mubr.msk.bf16.mxu0 %vm637_vm0, %v10273_v25 }
  0xda   :  { %945 = vmatmul.mubr.bf16.gmra.mrb[92].mxu0 %v10275_v26 }
  0xf5   :  { %v9642_v27 = vpop.f32.mrb[0].mxu0 }
  0xf6   :  { %v9643_v28 = vpop.f32.mrb[1].mxu0 }
  0xf7   :  { %v9644_v29 = vadd.f32 %v9643_v28, %v9642_v27  ;;  %v9645_v30 = vpop.f32.mrb[2].mxu0 }
  0xf8   :  { %v9646_v31 = vpop.f32.mrb[3].mxu0 }
  0xf9   :  { %v9647_v32 = vadd.f32 %v9646_v31, %v9645_v30 }
  0xfd   :  { %v9648_v33 = vpop.f32.mrb[4].mxu0 }
  0xfe   :  { %v9649_v34 = vpop.f32.mrb[5].mxu0 }
  0xff   :  { %v9650_v35 = vadd.f32 %v9649_v34, %v9648_v33  ;;  %v9651_v36 = vpop.f32.mrb[6].mxu0 }
 0x100   :  { %v9652_v37 = vpop.f32.mrb[7].mxu0 }
 0x101   :  { %v9653_v38 = vadd.f32 %v9652_v37, %v9651_v36 }
 0x105   :  { %v9654_v39 = vpop.f32.mrb[8].mxu0 }
 0x106   :  { %v9655_v40 = vpop.f32.mrb[9].mxu0 }
 0x107   :  { %v9656_v41 = vadd.f32 %v9655_v40, %v9654_v39  ;;  %v9657_v42 = vpop.f32.mrb[10].mxu0 }
 0x108   :  { %v9658_v43 = vpop.f32.mrb[11].mxu0 }
 0x109   :  { %v9659_v44 = vadd.f32 %v9658_v43, %v9657_v42 }
 0x10d   :  { %v9660_v45 = vpop.f32.mrb[12].mxu0 }
 0x10e   :  { %v9661_v46 = vpop.f32.mrb[13].mxu0 }
 0x10f   :  { %v9662_v47 = vadd.f32 %v9661_v46, %v9660_v45  ;;  %v9663_v48 = vpop.f32.mrb[14].mxu0 }
 0x110   :  { %v9664_v49 = vpop.f32.mrb[15].mxu0 }
 0x111   :  { %v9665_v50 = vadd.f32 %v9664_v49, %v9663_v48 }
 0x115   :  { %v9666_v51 = vpop.f32.mrb[16].mxu0 }
 0x116   :  { %v9667_v52 = vpop.f32.mrb[17].mxu0 }
 0x117   :  { %v9668_v53 = vadd.f32 %v9667_v52, %v9666_v51  ;;  %v9669_v54 = vpop.f32.mrb[18].mxu0 }
 0x118   :  { %v9670_v55 = vpop.f32.mrb[19].mxu0 }
 0x119   :  { %v9671_v56 = vadd.f32 %v9670_v55, %v9669_v54 }
 0x11d   :  { %v9672_v57 = vpop.f32.mrb[20].mxu0 }
 0x11e   :  { %v9673_v58 = vpop.f32.mrb[21].mxu0 }
 0x11f   :  { %v9674_v59 = vadd.f32 %v9673_v58, %v9672_v57  ;;  %v9675_v60 = vpop.f32.mrb[22].mxu0 }
 0x120   :  { %v9676_v61 = vpop.f32.mrb[23].mxu0 }
 0x121   :  { %v9677_v62 = vadd.f32 %v9676_v61, %v9675_v60 }
 0x125   :  { %v9678_v63 = vpop.f32.mrb[24].mxu0 }
 0x126   :  { %v9679_v0 = vpop.f32.mrb[25].mxu0 }
 0x127   :  { %v10777_v2 = vadd.f32 %v9679_v0, %v9678_v63  ;;  %v9681_v3 = vpop.f32.mrb[26].mxu0 }
 0x128   :  { %v9682_v4 = vpop.f32.mrb[27].mxu0 }
 0x129   :  { %v9683_v5 = vadd.f32 %v9682_v4, %v9681_v3 }
 0x12d   :  { %v9684_v6 = vpop.f32.mrb[28].mxu0 }
 0x12e   :  { %v9685_v7 = vpop.f32.mrb[29].mxu0 }
 0x12f   :  { %v10779_v8 = vadd.f32 %v9685_v7, %v9684_v6  ;;  %v9687_v9 = vpop.f32.mrb[30].mxu0 }
 0x130   :  { %v9688_v10 = vpop.f32.mrb[31].mxu0 }
 0x131   :  { %v10781_v1 = vadd.f32 %v9688_v10, %v9687_v9 }
 0x135   :  { %v9706_v11 = vpop.f32.mrb[32].mxu0 }
 0x136   :  { %v9707_v12 = vpop.f32.mrb[33].mxu0 }
 0x137   :  { %v9708_v13 = vadd.f32 %v9707_v12, %v9706_v11  ;;  %v9709_v14 = vpop.f32.mrb[34].mxu0 }
 0x138   :  { %v9710_v15 = vpop.f32.mrb[35].mxu0 }
 0x139   :  { %v9711_v16 = vadd.f32 %v9710_v15, %v9709_v14  ;;  %v794_v17 = vadd.f32 %v9708_v13, %v9644_v29 }
 0x13b   :  { %v797_v18 = vadd.f32 %v9711_v16, %v9647_v32 }
 0x13d   :  { %v9712_v19 = vpop.f32.mrb[36].mxu0 }
 0x13e   :  { %v9713_v20 = vpop.f32.mrb[37].mxu0 }
 0x13f   :  { %v9714_v21 = vadd.f32 %v9713_v20, %v9712_v19  ;;  %v9715_v22 = vpop.f32.mrb[38].mxu0 }
 0x140   :  { %v9716_v23 = vpop.f32.mrb[39].mxu0 }
 0x141   :  { %v9717_v24 = vadd.f32 %v9716_v23, %v9715_v22  ;;  %v802_v25 = vadd.f32 %v9714_v21, %v9650_v35 }
 0x143   :  { %v10783_v26 = vadd.f32 %v9717_v24, %v9653_v38 }
 0x145   :  { %v9718_v27 = vpop.f32.mrb[40].mxu0 }
 0x146   :  { %v9719_v28 = vpop.f32.mrb[41].mxu0 }
 0x147   :  { %v9720_v30 = vadd.f32 %v9719_v28, %v9718_v27  ;;  %v9721_v31 = vpop.f32.mrb[42].mxu0 }
 0x148   :  { %v9722_v33 = vpop.f32.mrb[43].mxu0 }
 0x149   :  { %v9723_v34 = vadd.f32 %v9722_v33, %v9721_v31  ;;  %v10785_v36 = vadd.f32 %v9720_v30, %v9656_v41 }
 0x14b   :  { %v10787_v37 = vadd.f32 %v9723_v34, %v9659_v44 }
 0x14d   :  { %v9724_v29 = vpop.f32.mrb[44].mxu0 }
 0x14e   :  { %v9725_v32 = vpop.f32.mrb[45].mxu0 }
 0x14f   :  { %v9726_v39 = vadd.f32 %v9725_v32, %v9724_v29  ;;  %v9727_v40 = vpop.f32.mrb[46].mxu0 }
 0x150   :  { %v9728_v42 = vpop.f32.mrb[47].mxu0 }
 0x151   :  { %v9729_v43 = vadd.f32 %v9728_v42, %v9727_v40  ;;  %v10789_v45 = vadd.f32 %v9726_v39, %v9662_v47 }
 0x153   :  { %v10791_v35 = vadd.f32 %v9729_v43, %v9665_v50 }
 0x155   :  { %v9730_v38 = vpop.f32.mrb[48].mxu0 }
 0x156   :  { %v9731_v46 = vpop.f32.mrb[49].mxu0 }
 0x157   :  { %v9732_v48 = vadd.f32 %v9731_v46, %v9730_v38  ;;  %v9733_v49 = vpop.f32.mrb[50].mxu0 }
 0x158   :  { %v9734_v51 = vpop.f32.mrb[51].mxu0 }
 0x159   :  { %v9735_v52 = vadd.f32 %v9734_v51, %v9733_v49  ;;  %v10793_v41 = vadd.f32 %v9732_v48, %v9668_v53 }
 0x15b   :  { %v10795_v44 = vadd.f32 %v9735_v52, %v9671_v56 }
 0x15d   :  { %v9736_v54 = vpop.f32.mrb[52].mxu0 }
 0x15e   :  { %v9737_v55 = vpop.f32.mrb[53].mxu0 }
 0x15f   :  { %v9738_v57 = vadd.f32 %v9737_v55, %v9736_v54  ;;  %v9739_v58 = vpop.f32.mrb[54].mxu0 }
 0x160   :  { %v9740_v60 = vpop.f32.mrb[55].mxu0 }
 0x161   :  { %v9741_v61 = vadd.f32 %v9740_v60, %v9739_v58  ;;  %v10797_v47 = vadd.f32 %v9738_v57, %v9674_v59 }
 0x163   :  { %v10799_v50 = vadd.f32 %v9741_v61, %v9677_v62 }
 0x165   :  { %v9742_v63 = vpop.f32.mrb[56].mxu0 }
 0x166   :  { %v9743_v0 = vpop.f32.mrb[57].mxu0 }
 0x167   :  { %v9744_v3 = vadd.f32 %v9743_v0, %v9742_v63  ;;  %v9745_v4 = vpop.f32.mrb[58].mxu0 }
 0x168   :  { %v9746_v6 = vpop.f32.mrb[59].mxu0 }
 0x169   :  { %v9747_v7 = vadd.f32 %v9746_v6, %v9745_v4  ;;  %v10802_v53 = vadd.f32 %v9744_v3, %v10777_v2 }
 0x16b   :  { %v10804_v56 = vadd.f32 %v9747_v7, %v9683_v5 }
 0x16d   :  { %v9748_v9 = vpop.f32.mrb[60].mxu0 }
 0x16e   :  { %v9749_v10 = vpop.f32.mrb[61].mxu0 }
 0x16f   :  { %v9750_v11 = vadd.f32 %v9749_v10, %v9748_v9  ;;  %v9751_v12 = vpop.f32.mrb[62].mxu0 }
 0x170   :  { %v9752_v13 = vpop.f32.mrb[63].mxu0 }
 0x171   :  { %v9753_v59 = vadd.f32 %v9752_v13, %v9751_v12  ;;  %v10807_v62 = vadd.f32 %v9750_v11, %v10779_v8 }
 0x173   :  { %v10810_v14 = vadd.f32 %v9753_v59, %v10781_v1 }
 0x175   :  { %v890_v15 = vpop.f32.mrb[64].mxu0 }
 0x176   :  { %v10812_v16 = vadd.f32 %v890_v15, %v794_v17  ;;  %v892_v2 = vpop.f32.mrb[65].mxu0 }
 0x177   :  { %v893_v19 = vpop.f32.mrb[66].mxu0 }
 0x178   :  { %v10814_v5 = vadd.f32 %v893_v19, %v797_v18  ;;  %v895_v20 = vpop.f32.mrb[67].mxu0  ;;  %v954_v21 = vsel %vm953_vm1, %v10812_v16, 0.0 }
 0x179   :  { %955 = vadd.xlane.f32.xlu0 %v954_v21 }
 0x17a   :  { %v957_v8 = vsel %vm953_vm1, %v10814_v5, 0.0 }
 0x17d   :  { %v898_v22 = vpop.f32.mrb[68].mxu0  ;;  %958 = vadd.xlane.f32.xlu0 %v957_v8 }
 0x17e   :  { %v10820_v1 = vadd.f32 %v898_v22, %v802_v25  ;;  %v900_v23 = vpop.f32.mrb[69].mxu0 }
 0x17f   :  { %v901_v24 = vpop.f32.mrb[70].mxu0 }
 0x180   :  { %v10823_v17 = vadd.f32 %v901_v24, %v10783_v26  ;;  %v960_v18 = vsel %vm953_vm1, %v10820_v1, 0.0  ;;  %v903_v27 = vpop.f32.mrb[71].mxu0 }
 0x181   :  { %961 = vadd.xlane.f32.xlu1 %v960_v18 }
 0x182   :  { %v963_v28 = vsel %vm953_vm1, %v10823_v17, 0.0 }
 0x185   :  { %v906_v30 = vpop.f32.mrb[72].mxu0  ;;  %964 = vadd.xlane.f32.xlu1 %v963_v28 }
 0x186   :  { %v10830_v31 = vadd.f32 %v906_v30, %v10785_v36  ;;  %v908_v25 = vpop.f32.mrb[73].mxu0 }
 0x187   :  { %v909_v33 = vpop.f32.mrb[74].mxu0 }
 0x188   :  { %v10833_v34 = vadd.f32 %v909_v33, %v10787_v37  ;;  %v966_v26 = vsel %vm953_vm1, %v10830_v31, 0.0  ;;  %v911_v29 = vpop.f32.mrb[75].mxu0 }
 0x189   :  { %967 = vadd.xlane.f32.xlu0 %v966_v26 }
 0x18a   :  { %v969_v32 = vsel %vm953_vm1, %v10833_v34, 0.0 }
 0x18b   :  { %970 = vadd.xlane.f32.xlu1 %v969_v32 }
 0x18d   :  { %v914_v39 = vpop.f32.mrb[76].mxu0 }
 0x18e   :  { %v10840_v40 = vadd.f32 %v914_v39, %v10789_v45  ;;  %v916_v36 = vpop.f32.mrb[77].mxu0 }
 0x18f   :  { %v917_v42 = vpop.f32.mrb[78].mxu0 }
 0x190   :  { %v10843_v43 = vadd.f32 %v917_v42, %v10791_v35  ;;  %v972_v37 = vsel %vm953_vm1, %v10840_v40, 0.0  ;;  %v919_v38 = vpop.f32.mrb[79].mxu0 }
 0x191   :  { %973 = vadd.xlane.f32.xlu0 %v972_v37 }
 0x192   :  { %v975_v46 = vsel %vm953_vm1, %v10843_v43, 0.0 }
 0x193   :  { %976 = vadd.xlane.f32.xlu1 %v975_v46 }
 0x195   :  { %v922_v48 = vpop.f32.mrb[80].mxu0 }
 0x196   :  { %v10850_v49 = vadd.f32 %v922_v48, %v10793_v41  ;;  %v924_v45 = vpop.f32.mrb[81].mxu0 }
 0x197   :  { %v925_v51 = vpop.f32.mrb[82].mxu0 }
 0x198   :  { %v10853_v52 = vadd.f32 %v925_v51, %v10795_v44  ;;  %v978_v35 = vsel %vm953_vm1, %v10850_v49, 0.0  ;;  %v927_v54 = vpop.f32.mrb[83].mxu0 }
 0x199   :  { %979 = vadd.xlane.f32.xlu0 %v978_v35 }
 0x19a   :  { %v981_v55 = vsel %vm953_vm1, %v10853_v52, 0.0 }
 0x19b   :  { %982 = vadd.xlane.f32.xlu1 %v981_v55 }
 0x19d   :  { %v930_v57 = vpop.f32.mrb[84].mxu0 }
 0x19e   :  { %v10860_v58 = vadd.f32 %v930_v57, %v10797_v47  ;;  %v932_v41 = vpop.f32.mrb[85].mxu0 }
 0x19f   :  { %v933_v60 = vpop.f32.mrb[86].mxu0 }
 0x1a0   :  { %v10863_v61 = vadd.f32 %v933_v60, %v10799_v50  ;;  %v984_v44 = vsel %vm953_vm1, %v10860_v58, 0.0  ;;  %v935_v63 = vpop.f32.mrb[87].mxu0 }
 0x1a1   :  { %985 = vadd.xlane.f32.xlu0 %v984_v44 }
 0x1a2   :  { %v987_v0 = vsel %vm953_vm1, %v10863_v61, 0.0 }
 0x1a3   :  { %988 = vadd.xlane.f32.xlu1 %v987_v0 }
 0x1a5   :  { %v938_v3 = vpop.f32.mrb[88].mxu0 }
 0x1a6   :  { %v10870_v4 = vadd.f32 %v938_v3, %v10802_v53  ;;  %v940_v47 = vpop.f32.mrb[89].mxu0 }
 0x1a7   :  { %v941_v6 = vpop.f32.mrb[90].mxu0 }
 0x1a8   :  { %v10873_v7 = vadd.f32 %v941_v6, %v10804_v56  ;;  %v990_v50 = vsel %vm953_vm1, %v10870_v4, 0.0  ;;  %v943_v9 = vpop.f32.mrb[91].mxu0 }
 0x1a9   :  { %991 = vadd.xlane.f32.xlu0 %v990_v50 }
 0x1aa   :  { %v993_v10 = vsel %vm953_vm1, %v10873_v7, 0.0 }
 0x1ab   :  { %994 = vadd.xlane.f32.xlu1 %v993_v10 }
 0x1ad   :  { %v946_v11 = vpop.f32.mrb[92].mxu0 }
 0x1ae   :  { %v10880_v12 = vadd.f32 %v946_v11, %v10807_v62  ;;  %v948_v53 = vpop.f32.mrb[93].mxu0 }
 0x1af   :  { %v949_v13 = vpop.f32.mrb[94].mxu0 }
 0x1b0   :  { %v10883_v59 = vadd.f32 %v949_v13, %v10810_v14  ;;  %v996_v56 = vsel %vm953_vm1, %v10880_v12, 0.0  ;;  %v951_v15 = vpop.f32.mrb[95].mxu0 }
 0x1b1   :  { %997 = vadd.xlane.f32.xlu0 %v996_v56 }
 0x1b2   :  { %v999_v2 = vsel %vm953_vm1, %v10883_v59, 0.0 }
 0x1b3   :  { %1000 = vadd.xlane.f32.xlu1 %v999_v2 }
 0x206   :  { %v956_v19 = vpop.xlane.xlu0 %955 }
 0x207   :  { %v10889_v20 = vmul.f32 0.020408163, %v956_v19 }
 0x209   :  { %v1019_v62 = vsub.f32 %v10812_v16, %v10889_v20 }
 0x20a   :  { %v959_v21 = vpop.xlane.xlu0 %958 }
 0x20b   :  { %v10893_v8 = vmul.f32 0.020408163, %v959_v21  ;;  %v1035_v14 = vmul.f32 %v1019_v62, %v1019_v62 }
 0x20d   :  { %v1020_v22 = vsub.f32 %v10814_v5, %v10893_v8  ;;  %v1051_v23 = vsel %vm953_vm1, %v1035_v14, 0.0 }
 0x20e   :  { %v962_v24 = vpop.xlane.xlu1 %961  ;;  %1052 = vadd.xlane.f32.xlu0 %v1051_v23 }
 0x20f   :  { %v10898_v18 = vmul.f32 0.020408163, %v962_v24  ;;  %v1036_v27 = vmul.f32 %v1020_v22, %v1020_v22 }
 0x211   :  { %v1021_v28 = vsub.f32 %v10820_v1, %v10898_v18  ;;  %v1054_v30 = vsel %vm953_vm1, %v1036_v27, 0.0 }
 0x212   :  { %v965_v25 = vpop.xlane.xlu1 %964  ;;  %1055 = vadd.xlane.f32.xlu1 %v1054_v30 }
 0x213   :  { %v10903_v33 = vmul.f32 0.020408163, %v965_v25  ;;  %v1037_v26 = vmul.f32 %v1021_v28, %v1021_v28 }
 0x215   :  { %v1022_v29 = vsub.f32 %v10823_v17, %v10903_v33  ;;  %v1057_v32 = vsel %vm953_vm1, %v1037_v26, 0.0 }
 0x216   :  { %1058 = vadd.xlane.f32.xlu0 %v1057_v32  ;;  %v968_v39 = vpop.xlane.xlu0 %967 }
 0x217   :  { %v10908_v36 = vmul.f32 0.020408163, %v968_v39  ;;  %v1038_v42 = vmul.f32 %v1022_v29, %v1022_v29 }
 0x218   :  { %v971_v37 = vpop.xlane.xlu1 %970 }
 0x219   :  { %v1023_v38 = vsub.f32 %v10830_v31, %v10908_v36  ;;  %v10912_v46 = vmul.f32 0.020408163, %v971_v37  ;;  %v1060_v48 = vsel %vm953_vm1, %v1038_v42, 0.0 }
 0x21a   :  { %1061 = vadd.xlane.f32.xlu1 %v1060_v48 }
 0x21b   :  { %v1024_v45 = vsub.f32 %v10833_v34, %v10912_v46  ;;  %v1039_v51 = vmul.f32 %v1023_v38, %v1023_v38 }
 0x21d   :  { %v1063_v35 = vsel %vm953_vm1, %v1039_v51, 0.0  ;;  %v1040_v54 = vmul.f32 %v1024_v45, %v1024_v45 }
 0x21e   :  { %1064 = vadd.xlane.f32.xlu0 %v1063_v35  ;;  %v974_v55 = vpop.xlane.xlu0 %973 }
 0x21f   :  { %v10918_v57 = vmul.f32 0.020408163, %v974_v55  ;;  %v1066_v41 = vsel %vm953_vm1, %v1040_v54, 0.0 }
 0x220   :  { %v977_v60 = vpop.xlane.xlu1 %976  ;;  %1067 = vadd.xlane.f32.xlu1 %v1066_v41 }
 0x221   :  { %v1025_v44 = vsub.f32 %v10840_v40, %v10918_v57  ;;  %v10923_v63 = vmul.f32 0.020408163, %v977_v60 }
 0x223   :  { %v1026_v0 = vsub.f32 %v10843_v43, %v10923_v63  ;;  %v1041_v3 = vmul.f32 %v1025_v44, %v1025_v44 }
 0x225   :  { %v1069_v47 = vsel %vm953_vm1, %v1041_v3, 0.0  ;;  %v1042_v6 = vmul.f32 %v1026_v0, %v1026_v0 }
 0x226   :  { %1070 = vadd.xlane.f32.xlu0 %v1069_v47  ;;  %v980_v50 = vpop.xlane.xlu0 %979 }
 0x227   :  { %v10928_v9 = vmul.f32 0.020408163, %v980_v50  ;;  %v1072_v10 = vsel %vm953_vm1, %v1042_v6, 0.0 }
 0x228   :  { %v983_v11 = vpop.xlane.xlu1 %982  ;;  %1073 = vadd.xlane.f32.xlu1 %v1072_v10 }
 0x229   :  { %v1027_v53 = vsub.f32 %v10850_v49, %v10928_v9  ;;  %v10933_v13 = vmul.f32 0.020408163, %v983_v11 }
 0x22b   :  { %v1028_v56 = vsub.f32 %v10853_v52, %v10933_v13  ;;  %v1043_v15 = vmul.f32 %v1027_v53, %v1027_v53 }
 0x22d   :  { %v1075_v2 = vsel %vm953_vm1, %v1043_v15, 0.0  ;;  %v1044_v19 = vmul.f32 %v1028_v56, %v1028_v56 }
 0x22e   :  { %1076 = vadd.xlane.f32.xlu0 %v1075_v2  ;;  %v986_v62 = vpop.xlane.xlu0 %985 }
 0x22f   :  { %v10938_v21 = vmul.f32 0.020408163, %v986_v62  ;;  %v1078_v14 = vsel %vm953_vm1, %v1044_v19, 0.0 }
 0x230   :  { %v989_v22 = vpop.xlane.xlu1 %988  ;;  %1079 = vadd.xlane.f32.xlu1 %v1078_v14 }
 0x231   :  { %v1029_v23 = vsub.f32 %v10860_v58, %v10938_v21  ;;  %v10943_v24 = vmul.f32 0.020408163, %v989_v22  ;;  %v1115_v22 = vld [vmem:[%s12370_s2] sm:$0xff] }
 0x233   :  { %v1030_v27 = vsub.f32 %v10863_v61, %v10943_v24  ;;  %v1045_v28 = vmul.f32 %v1029_v23, %v1029_v23 }
 0x235   :  { %v1081_v30 = vsel %vm953_vm1, %v1045_v28, 0.0  ;;  %v1046_v25 = vmul.f32 %v1030_v27, %v1030_v27 }
 0x236   :  { %1082 = vadd.xlane.f32.xlu0 %v1081_v30  ;;  %v992_v26 = vpop.xlane.xlu0 %991 }
 0x237   :  { %v10948_v29 = vmul.f32 0.020408163, %v992_v26  ;;  %v1084_v32 = vsel %vm953_vm1, %v1046_v25, 0.0  ;;  %v1116_v25 = vld [vmem:[%s12370_s2 + $0x8] sm:$0xff] }
 0x238   :  { %v995_v39 = vpop.xlane.xlu1 %994  ;;  %1085 = vadd.xlane.f32.xlu1 %v1084_v32 }
 0x239   :  { %v1031_v42 = vsub.f32 %v10870_v4, %v10948_v29  ;;  %v10953_v37 = vmul.f32 0.020408163, %v995_v39 }
 0x23b   :  { %v1032_v38 = vsub.f32 %v10873_v7, %v10953_v37  ;;  %v1047_v48 = vmul.f32 %v1031_v42, %v1031_v42 }
 0x23d   :  { %v1087_v45 = vsel %vm953_vm1, %v1047_v48, 0.0  ;;  %v1048_v51 = vmul.f32 %v1032_v38, %v1032_v38 }
 0x23e   :  { %1088 = vadd.xlane.f32.xlu0 %v1087_v45  ;;  %v998_v35 = vpop.xlane.xlu0 %997 }
 0x23f   :  { %v10958_v54 = vmul.f32 0.020408163, %v998_v35  ;;  %v1090_v55 = vsel %vm953_vm1, %v1048_v51, 0.0  ;;  %v1179_v35 = vld [vmem:[%s12371_s3] sm:$0xff] }
 0x240   :  { %v1001_v41 = vpop.xlane.xlu1 %1000  ;;  %1091 = vadd.xlane.f32.xlu1 %v1090_v55 }
 0x241   :  { %v1033_v60 = vsub.f32 %v10880_v12, %v10958_v54  ;;  %v10963_v44 = vmul.f32 0.020408163, %v1001_v41 }
 0x243   :  { %v1034_v0 = vsub.f32 %v10883_v59, %v10963_v44  ;;  %v1049_v3 = vmul.f32 %v1033_v60, %v1033_v60 }
 0x245   :  { %v1093_v47 = vsel %vm953_vm1, %v1049_v3, 0.0  ;;  %v1050_v6 = vmul.f32 %v1034_v0, %v1034_v0 }
 0x246   :  { %1094 = vadd.xlane.f32.xlu0 %v1093_v47  ;;  %v1180_v47 = vld [vmem:[%s12371_s3 + $0x8] sm:$0xff] }
 0x247   :  { %v1096_v50 = vsel %vm953_vm1, %v1050_v6, 0.0 }
 0x248   :  { %1097 = vadd.xlane.f32.xlu1 %v1096_v50 }
 0x29b   :  { %v1053_v10 = vpop.xlane.xlu0 %1052 }
 0x29c   :  { %v1099_v11 = vmul.f32 0.020408163, %v1053_v10 }
 0x29e   :  { %v1131_v53 = vadd.f32 1e-05, %v1099_v11 }
 0x29f   :  { %v1056_v56 = vpop.xlane.xlu1 %1055 }
 0x2a0   :  { %10411 = vrsqrt.f32 %v1131_v53  ;;  %v1100_v15 = vmul.f32 0.020408163, %v1056_v56 }
 0x2a2   :  { %v1132_v2 = vadd.f32 1e-05, %v1100_v15  ;;  %v1117_v15 = vld [vmem:[%s12370_s2 + $0x10] sm:$0xff] }
 0x2a3   :  { %v1059_v19 = vpop.xlane.xlu0 %1058 }
 0x2a4   :  { %10413 = vrsqrt.f32 %v1132_v2  ;;  %v1101_v62 = vmul.f32 0.020408163, %v1059_v19 }
 0x2a6   :  { %v1133_v28 = vadd.f32 1e-05, %v1101_v62 }
 0x2a7   :  { %v1062_v14 = vpop.xlane.xlu1 %1061 }
 0x2a8   :  { %v1102_v23 = vmul.f32 0.020408163, %v1062_v14  ;;  %10415 = vrsqrt.f32 %v1133_v28 }
 0x2aa   :  { %v10412_v27 = vpop.eup %10411  ;;  %v1134_v26 = vadd.f32 1e-05, %v1102_v23  ;;  %v1118_v23 = vld [vmem:[%s12370_s2 + $0x18] sm:$0xff] }
 0x2ab   :  { %v1163_v30 = vmul.f32 %v10412_v27, %v1115_v22  ;;  %v1065_v42 = vpop.xlane.xlu0 %1064 }
 0x2ac   :  { %10417 = vrsqrt.f32 %v1134_v26  ;;  %v1103_v55 = vmul.f32 0.020408163, %v1065_v42  ;;  %v1181_v42 = vld [vmem:[%s12371_s3 + $0x10] sm:$0xff] }
 0x2ad   :  { %v1068_v32 = vpop.xlane.xlu1 %1067  ;;  %1229 = vperm.xlu0 %10160, %v1163_v30   ;;  %v1195_v45 = vmul.f32 %v1163_v30, %v10889_v20 }
 0x2ae   :  { %v10414_v39 = vpop.eup %10413  ;;  %v1104_v38 = vmul.f32 0.020408163, %v1068_v32  ;;  %v1135_v6 = vadd.f32 1e-05, %v1103_v55 }
 0x2af   :  { %v1164_v48 = vmul.f32 %v10414_v39, %v1116_v25  ;;  %v1211_v60 = vsub.f32 %v1179_v35, %v1195_v45 }
 0x2b0   :  { %v1136_v51 = vadd.f32 1e-05, %v1104_v38  ;;  %v1121_v38 = vld [vmem:[%s12370_s2 + $0x30] sm:$0xff] }
 0x2b1   :  { %1234 = vperm.xlu1 %10161, %v1164_v48   ;;  %v1196_v0 = vmul.f32 %v1164_v48, %v10893_v8  ;;  %v1120_v8 = vld [vmem:[%s12370_s2 + $0x28] sm:$0xff] }
 0x2b2   :  { %10419 = vrsqrt.f32 %v1136_v51  ;;  %v10416_v53 = vpop.eup %10415 }
 0x2b3   :  { %v1071_v41 = vpop.xlane.xlu0 %1070  ;;  %v1212_v11 = vsub.f32 %v1180_v47, %v1196_v0  ;;  %v1165_v62 = vmul.f32 %v10416_v53, %v1117_v15  ;;  %v1182_v0 = vld [vmem:[%s12371_s3 + $0x18] sm:$0xff]  ;;  %v1119_v47 = vld [vmem:[%s12370_s2 + $0x20] sm:$0xff] }
 0x2b4   :  { %v1105_v3 = vmul.f32 0.020408163, %v1071_v41 }
 0x2b5   :  { %v1074_v20 = vpop.xlane.xlu1 %1073  ;;  %1325 = vperm.xlu1 %10161, %v1211_v60   ;;  %v1197_v32 = vmul.f32 %v1165_v62, %v10898_v18 }
 0x2b6   :  { %v1137_v50 = vadd.f32 1e-05, %v1105_v3  ;;  %v1106_v10 = vmul.f32 0.020408163, %v1074_v20  ;;  %v10418_v2 = vpop.eup %10417  ;;  %v1122_v3 = vld [vmem:[%s12370_s2 + $0x38] sm:$0xff] }
 0x2b7   :  { %v1166_v26 = vmul.f32 %v10418_v2, %v1118_v23  ;;  %v1213_v35 = vsub.f32 %v1181_v42, %v1197_v32  ;;  %v1124_v23 = vld [vmem:[%s12370_s2 + $0x48] sm:$0xff] }
 0x2b8   :  { %10421 = vrsqrt.f32 %v1137_v50  ;;  %v1138_v56 = vadd.f32 1e-05, %v1106_v10  ;;  %v1184_v42 = vld [vmem:[%s12371_s3 + $0x28] sm:$0xff] }
 0x2b9   :  { %10423 = vrsqrt.f32 %v1135_v6  ;;  %1330 = vperm.xlu1 %10161, %v1212_v11   ;;  %v1198_v41 = vmul.f32 %v1166_v26, %v10903_v33 }
 0x2ba   :  { %10425 = vrsqrt.f32 %v1138_v56  ;;  %v1123_v56 = vld [vmem:[%s12370_s2 + $0x40] sm:$0xff] }
 0x2bb   :  { %v1077_v19 = vpop.xlane.xlu0 %1076  ;;  %v1214_v33 = vsub.f32 %v1182_v0, %v1198_v41 }
 0x2bc   :  { %v10420_v14 = vpop.eup %10419  ;;  %v1107_v22 = vmul.f32 0.020408163, %v1077_v19 }
 0x2bd   :  { %v1080_v27 = vpop.xlane.xlu1 %1079  ;;  %1239 = vperm.xlu1 %10161, %v1165_v62   ;;  %v1168_v28 = vmul.f32 %v10420_v14, %v1120_v8 }
 0x2be   :  { %v1139_v30 = vadd.f32 1e-05, %v1107_v22  ;;  %v1108_v25 = vmul.f32 0.020408163, %v1080_v27  ;;  %v1183_v22 = vld [vmem:[%s12371_s3 + $0x20] sm:$0xff] }
 0x2bf   :  { %1254 = vperm.xlu0 %10160, %v1168_v28  }
 0x2c0   :  { %10427 = vrsqrt.f32 %v1139_v30  ;;  %v1140_v39 = vadd.f32 1e-05, %v1108_v25 }
 0x2c1   :  { %1244 = vperm.xlu1 %10161, %v1166_v26  }
 0x2c2   :  { %v10422_v48 = vpop.eup %10421  ;;  %10429 = vrsqrt.f32 %v1140_v39  ;;  %v1200_v39 = vmul.f32 %v1168_v28, %v10912_v46 }
 0x2c3   :  { %v10424_v45 = vpop.eup %10423  ;;  %v1083_v51 = vpop.xlane.xlu0 %1082  ;;  %v1169_v55 = vmul.f32 %v10422_v48, %v1121_v38  ;;  %v1125_v38 = vld [vmem:[%s12370_s2 + $0x50] sm:$0xff] }
 0x2c4   :  { %v10426_v18 = vpop.eup %10425  ;;  %v1109_v60 = vmul.f32 0.020408163, %v1083_v51  ;;  %v1167_v11 = vmul.f32 %v10424_v45, %v1119_v47  ;;  %v1216_v51 = vsub.f32 %v1184_v42, %v1200_v39 }
 0x2c5   :  { %v1086_v6 = vpop.xlane.xlu1 %1085  ;;  %1335 = vperm.xlu1 %10161, %v1213_v35   ;;  %1259 = vperm.xlu0 %10160, %v1169_v55   ;;  %v1170_v10 = vmul.f32 %v10426_v18, %v1122_v3  ;;  %v1201_v41 = vmul.f32 %v1169_v55, %v10918_v57  ;;  %v1185_v18 = vld [vmem:[%s12371_s3 + $0x30] sm:$0xff]  ;;  %v1186_v55 = vld [vmem:[%s12371_s3 + $0x38] sm:$0xff] }
 0x2c6   :  { %v1141_v20 = vadd.f32 1e-05, %v1109_v60  ;;  %v1110_v50 = vmul.f32 0.020408163, %v1086_v6  ;;  %v1199_v19 = vmul.f32 %v1167_v11, %v10908_v36  ;;  %v1126_v60 = vld [vmem:[%s12370_s2 + $0x58] sm:$0xff] }
 0x2c7   :  { %v1217_v6 = vsub.f32 %v1185_v18, %v1201_v41  ;;  %v1192_v41 = vld [vmem:[%s12371_s3 + $0x68] sm:$0xff] }
 0x2c8   :  { %10431 = vrsqrt.f32 %v1141_v20  ;;  %v1142_v53 = vadd.f32 1e-05, %v1110_v50  ;;  %v1215_v26 = vsub.f32 %v1183_v22, %v1199_v19  ;;  %v1202_v50 = vmul.f32 %v1170_v10, %v10923_v63  ;;  %v1187_v63 = vld [vmem:[%s12371_s3 + $0x40] sm:$0xff]  ;;  %v1188_v22 = vld [vmem:[%s12371_s3 + $0x48] sm:$0xff] }
 0x2c9   :  { %1340 = vperm.xlu1 %10161, %v1214_v33   ;;  %1264 = vperm.xlu0 %10160, %v1170_v10   ;;  %v1127_v33 = vld [vmem:[%s12370_s2 + $0x60] sm:$0xff]  ;;  %v1128_v10 = vld [vmem:[%s12370_s2 + $0x68] sm:$0xff] }
 0x2ca   :  { %v10428_v15 = vpop.eup %10427  ;;  %10433 = vrsqrt.f32 %v1142_v53  ;;  %v1218_v53 = vsub.f32 %v1186_v55, %v1202_v50 }
 0x2cb   :  { %v1089_v8 = vpop.xlane.xlu0 %1088  ;;  %v1171_v2 = vmul.f32 %v10428_v15, %v1123_v56 }
 0x2cc   :  { %v10430_v62 = vpop.eup %10429  ;;  %v1111_v14 = vmul.f32 0.020408163, %v1089_v8 }
 0x2cd   :  { %v1092_v27 = vpop.xlane.xlu1 %1091  ;;  %1249 = vperm.xlu1 %10161, %v1167_v11   ;;  %1269 = vperm.xlu0 %10160, %v1171_v2   ;;  %v1172_v32 = vmul.f32 %v10430_v62, %v1124_v23  ;;  %v1203_v15 = vmul.f32 %v1171_v2, %v10928_v9  ;;  %v1129_v9 = vld [vmem:[%s12370_s2 + $0x70] sm:$0xff]  ;;  %v1130_v23 = vld [vmem:[%s12370_s2 + $0x78] sm:$0xff] }
 0x2ce   :  { %v1143_v30 = vadd.f32 1e-05, %v1111_v14  ;;  %v1112_v25 = vmul.f32 0.020408163, %v1092_v27 }
 0x2cf   :  { %v1219_v19 = vsub.f32 %v1187_v63, %v1203_v15  ;;  %v1204_v14 = vmul.f32 %v1172_v32, %v10933_v13 }
 0x2d0   :  { %10435 = vrsqrt.f32 %v1143_v30  ;;  %v1144_v36 = vadd.f32 1e-05, %v1112_v25 }
 0x2d1   :  { %1345 = vperm.xlu1 %10161, %v1215_v26   ;;  %1274 = vperm.xlu0 %10160, %v1172_v32   ;;  %v1220_v27 = vsub.f32 %v1188_v22, %v1204_v14  ;;  %v1189_v26 = vld [vmem:[%s12371_s3 + $0x50] sm:$0xff] }
 0x2d2   :  { %v10432_v48 = vpop.eup %10431  ;;  %10437 = vrsqrt.f32 %v1144_v36 }
 0x2d3   :  { %v1095_v45 = vpop.xlane.xlu0 %1094  ;;  %v1173_v35 = vmul.f32 %v10432_v48, %v1125_v38  ;;  %v1190_v38 = vld [vmem:[%s12371_s3 + $0x58] sm:$0xff] }
 0x2d4   :  { %v10434_v46 = vpop.eup %10433  ;;  %v1113_v28 = vmul.f32 0.020408163, %v1095_v45 }
 0x2d5   :  { %v1098_v0 = vpop.xlane.xlu1 %1097  ;;  %1350 = vperm.xlu1 %10161, %v1216_v51   ;;  %1279 = vperm.xlu0 %10160, %v1173_v35   ;;  %v1174_v20 = vmul.f32 %v10434_v46, %v1126_v60  ;;  %v1205_v25 = vmul.f32 %v1173_v35, %v10938_v21  ;;  %v1194_v21 = vld [vmem:[%s12371_s3 + $0x78] sm:$0xff]  ;;  %v10455_v60 = vmov 0.0  }
 0x2d6   :  { %v1145_v3 = vadd.f32 1e-05, %v1113_v28  ;;  %v1114_v47 = vmul.f32 0.020408163, %v1098_v0  ;;  %1469 = vst [vmem:[#allocation2 + $0x10] sm:$0xff] %v10455_v60  ;;  %1467 = vst [vmem:[#allocation2] sm:$0xff] %v10455_v60 }
 0x2d7   :  { %v1221_v39 = vsub.f32 %v1189_v26, %v1205_v25  ;;  %v1206_v36 = vmul.f32 %v1174_v20, %v10943_v24  ;;  %v1191_v24 = vld [vmem:[%s12371_s3 + $0x60] sm:$0xff]  ;;  %1468 = vst [vmem:[#allocation2 + $0x8] sm:$0x1] %v10455_v60  ;;  %1470 = vst [vmem:[#allocation2 + $0x18] sm:$0x1] %v10455_v60 }
 0x2d8   :  { %10439 = vrsqrt.f32 %v1145_v3  ;;  %v1146_v57 = vadd.f32 1e-05, %v1114_v47  ;;  %1471 = vst [vmem:[#allocation2 + $0x20] sm:$0xff] %v10455_v60  ;;  %1472 = vst [vmem:[#allocation2 + $0x28] sm:$0x1] %v10455_v60 }
 0x2d9   :  { %1355 = vperm.xlu1 %10161, %v1217_v6   ;;  %1284 = vperm.xlu0 %10160, %v1174_v20   ;;  %v1222_v48 = vsub.f32 %v1190_v38, %v1206_v36  ;;  %1473 = vst [vmem:[#allocation2 + $0x30] sm:$0xff] %v10455_v60  ;;  %1474 = vst [vmem:[#allocation2 + $0x38] sm:$0x1] %v10455_v60 }
 0x2da   :  { %v10436_v11 = vpop.eup %10435  ;;  %10441 = vrsqrt.f32 %v1146_v57  ;;  %1475 = vst [vmem:[#allocation2 + $0x40] sm:$0xff] %v10455_v60  ;;  %1476 = vst [vmem:[#allocation2 + $0x48] sm:$0x1] %v10455_v60 }
 0x2db   :  { %v1175_v56 = vmul.f32 %v10436_v11, %v1127_v33  ;;  %1477 = vst [vmem:[#allocation2 + $0x50] sm:$0xff] %v10455_v60  ;;  %1478 = vst [vmem:[#allocation2 + $0x58] sm:$0x1] %v10455_v60 }
 0x2dc   :  { %v10438_v8 = vpop.eup %10437  ;;  %1479 = vst [vmem:[#allocation2 + $0x60] sm:$0xff] %v10455_v60  ;;  %1480 = vst [vmem:[#allocation2 + $0x68] sm:$0x1] %v10455_v60 }
 0x2dd   :  { %1360 = vperm.xlu1 %10161, %v1218_v53   ;;  %1289 = vperm.xlu0 %10160, %v1175_v56   ;;  %v1176_v62 = vmul.f32 %v10438_v8, %v1128_v10  ;;  %v1207_v51 = vmul.f32 %v1175_v56, %v10948_v29  ;;  %v1193_v29 = vld [vmem:[%s12371_s3 + $0x70] sm:$0xff]  ;;  %1481 = vst [vmem:[#allocation2 + $0x70] sm:$0xff] %v10455_v60  ;;  %1482 = vst [vmem:[#allocation2 + $0x78] sm:$0x1] %v10455_v60 }
 0x2de   :  { %1483 = vst [vmem:[#allocation2 + $0x80] sm:$0xff] %v10455_v60  ;;  %1484 = vst [vmem:[#allocation2 + $0x88] sm:$0x1] %v10455_v60 }
 0x2df   :  { %v1208_v35 = vmul.f32 %v1176_v62, %v10953_v37 }
 0x2e1   :  { %1365 = vperm.xlu1 %10161, %v1219_v19   ;;  %1294 = vperm.xlu0 %10160, %v1176_v62   ;;  %v1224_v46 = vsub.f32 %v1192_v41, %v1208_v35 }
 0x2e2   :  { %v10440_v2 = vpop.eup %10439 }
 0x2e3   :  { %v1177_v30 = vmul.f32 %v10440_v2, %v1129_v9 }
 0x2e4   :  { %v10442_v13 = vpop.eup %10441 }
 0x2e5   :  { %1370 = vperm.xlu1 %10161, %v1220_v27   ;;  %1299 = vperm.xlu0 %10160, %v1177_v30   ;;  %v1178_v32 = vmul.f32 %v10442_v13, %v1130_v23  ;;  %v1209_v28 = vmul.f32 %v1177_v30, %v10958_v54 }
 0x2e7   :  { %v1210_v42 = vmul.f32 %v1178_v32, %v10963_v44  ;;  %v1223_v44 = vsub.f32 %v1191_v24, %v1207_v51  ;;  %v1225_v18 = vsub.f32 %v1193_v29, %v1209_v28 }
 0x2e9   :  { %1375 = vperm.xlu1 %10161, %v1221_v39   ;;  %1304 = vperm.xlu0 %10160, %v1178_v32   ;;  %v1226_v45 = vsub.f32 %v1194_v21, %v1210_v42 }
 0x2ed   :  { %1380 = vperm.xlu1 %10161, %v1222_v48   ;;  %1400 = vperm.xlu0 %10160, %v1226_v45  }
 0x2f1   :  { %1385 = vperm.xlu1 %10161, %v1223_v44  }
 0x2f5   :  { %1390 = vperm.xlu1 %10161, %v1224_v46  }
 0x2f9   :  { %1395 = vperm.xlu1 %10161, %v1225_v18   ;;  %v10277_v18 = vld [vmem:[%s12372_s4] sm:$0xff]  }
 0x2fa   :  { %9886 = vmatprep.subr.bf16.mxu1 %v10277_v18 }
 0x2fb   :  { %9887 = vmatpush3.bf16.msra.mxu1 %v10277_v18 }
 0x32c   :  { %v1230_v37 = vpop.permute.xlu0 %1229 }
 0x32d   :  { %v1307_v0 = vmul.f32 %v1230_v37, %v10812_v16  ;;  %v10278_v37 = vld [vmem:[%s12372_s4 + $0x48] sm:$0xff]  }
 0x330   :  { %v1235_v54 = vpop.permute.xlu1 %1234 }
 0x331   :  { %v1308_v6 = vmul.f32 %v1235_v54, %v10814_v5  ;;  %v10279_v54 = vld [vmem:[%s12372_s4 + $0x8] sm:$0xff]  }
 0x332   :  { %9888 = vmatprep.subr.bf16.mxu1 %v10279_v54 }
 0x333   :  { %9889 = vmatpush3.bf16.msra.mxu1 %v10279_v54 }
 0x334   :  { %v1326_v3 = vpop.permute.xlu1 %1325 }
 0x335   :  { %v1403_v47 = vadd.f32 %v1326_v3, %v1307_v0 }
 0x337   :  { %v1419_v20 = vmax.f32 %v1403_v47, 0.0 }
 0x338   :  { %v1331_v50 = vpop.permute.xlu1 %1330 }
 0x339   :  { %v1404_v57 = vadd.f32 %v1331_v50, %v1308_v6  ;;  %1435 = vxpose.xlu1.b32.start [1/16] (narrow) %v1419_v20, 56  ;;  %v10280_v20 = vld [vmem:[%s12372_s4 + $0x50] sm:$0xff]  }
 0x33a   :  { %v10281_v50 = vld [vmem:[%s12372_s4 + $0x10] sm:$0xff]  }
 0x33b   :  { %v1420_v55 = vmax.f32 %v1404_v57, 0.0  ;;  %9890 = vmatprep.subr.bf16.mxu1 %v10281_v50 }
 0x33c   :  { %v1240_v33 = vpop.permute.xlu1 %1239  ;;  %9891 = vmatpush3.bf16.msra.mxu1 %v10281_v50 }
 0x33d   :  { %1436 = vxpose.xlu1.b32.cont [2/16] (narrow) %v1420_v55, 56  ;;  %v1309_v56 = vmul.f32 %v1240_v33, %v10820_v1 }
 0x33e   :  { %v1255_v11 = vpop.permute.xlu0 %1254 }
 0x33f   :  { %v1312_v1 = vmul.f32 %v1255_v11, %v10833_v34 }
 0x340   :  { %v1245_v53 = vpop.permute.xlu1 %1244 }
 0x341   :  { %v1310_v16 = vmul.f32 %v1245_v53, %v10823_v17  ;;  %v10282_v53 = vld [vmem:[%s12372_s4 + $0x58] sm:$0xff]  }
 0x344   :  { %v1336_v15 = vpop.permute.xlu1 %1335  ;;  %v1260_v8 = vpop.permute.xlu0 %1259 }
 0x345   :  { %v1405_v63 = vadd.f32 %v1336_v15, %v1309_v56  ;;  %v1313_v32 = vmul.f32 %v1260_v8, %v10840_v40  ;;  %v10283_v56 = vld [vmem:[%s12372_s4 + $0x18] sm:$0xff]  }
 0x346   :  { %9892 = vmatprep.subr.bf16.mxu1 %v10283_v56 }
 0x347   :  { %v1421_v10 = vmax.f32 %v1405_v63, 0.0  ;;  %9893 = vmatpush3.bf16.msra.mxu1 %v10283_v56 }
 0x348   :  { %v1341_v19 = vpop.permute.xlu1 %1340  ;;  %v1265_v62 = vpop.permute.xlu0 %1264 }
 0x349   :  { %v1406_v5 = vadd.f32 %v1341_v19, %v1310_v16  ;;  %1437 = vxpose.xlu1.b32.cont [3/16] (narrow) %v1421_v10, 56  ;;  %v1314_v21 = vmul.f32 %v1265_v62, %v10843_v43  ;;  %v10276_v43 = vld [vmem:[%s12372_s4 + $0x40] sm:$0xff]  }
 0x34a   :  { %9862 = vmatprep.subr.bf16.mxu0 %v10276_v43  ;;  %v10284_v16 = vld [vmem:[%s12372_s4 + $0x60] sm:$0xff]  }
 0x34b   :  { %v1422_v14 = vmax.f32 %v1406_v5, 0.0  ;;  %9863 = vmatpush3.bf16.msra.mxu0 %v10276_v43  ;;  %v10285_v10 = vld [vmem:[%s12372_s4 + $0x20] sm:$0xff]  }
 0x34c   :  { %v1250_v22 = vpop.permute.xlu1 %1249  ;;  %v1270_v9 = vpop.permute.xlu0 %1269  ;;  %9864 = vmatprep.subr.bf16.mxu0 %v10278_v37  ;;  %9894 = vmatprep.subr.bf16.mxu1 %v10285_v10 }
 0x34d   :  { %1438 = vxpose.xlu1.b32.cont [4/16] (narrow) %v1422_v14, 56  ;;  %v1311_v2 = vmul.f32 %v1250_v22, %v10830_v31  ;;  %v1315_v34 = vmul.f32 %v1270_v9, %v10850_v49  ;;  %v10286_v22 = vld [vmem:[%s12372_s4 + $0x68] sm:$0xff]   ;;  %9895 = vmatpush3.bf16.msra.mxu1 %v10285_v10 }
 0x34e   :  { %v10287_v9 = vld [vmem:[%s12372_s4 + $0x28] sm:$0xff]  }
 0x34f   :  { %9865 = vmatpush3.bf16.msra.mxu0 %v10278_v37  ;;  %9896 = vmatprep.subr.bf16.mxu1 %v10287_v9 }
 0x350   :  { %v1346_v23 = vpop.permute.xlu1 %1345  ;;  %v1275_v27 = vpop.permute.xlu0 %1274  ;;  %9866 = vmatprep.subr.bf16.mxu0 %v10280_v20 }
 0x351   :  { %v1407_v30 = vadd.f32 %v1346_v23, %v1311_v2  ;;  %v1316_v40 = vmul.f32 %v1275_v27, %v10853_v52  ;;  %v10288_v23 = vld [vmem:[%s12372_s4 + $0x70] sm:$0xff]   ;;  %9897 = vmatpush3.bf16.msra.mxu1 %v10287_v9 }
 0x353   :  { %v1423_v25 = vmax.f32 %v1407_v30, 0.0  ;;  %9867 = vmatpush3.bf16.msra.mxu0 %v10280_v20 }
 0x354   :  { %v1351_v13 = vpop.permute.xlu1 %1350  ;;  %v1280_v26 = vpop.permute.xlu0 %1279  ;;  %9868 = vmatprep.subr.bf16.mxu0 %v10282_v53 }
 0x355   :  { %v1408_v17 = vadd.f32 %v1351_v13, %v1312_v1  ;;  %1439 = vxpose.xlu1.b32.cont [5/16] (narrow) %v1423_v25, 56  ;;  %v1317_v49 = vmul.f32 %v1280_v26, %v10860_v58  ;;  %v10296_v25 = vld [vmem:[%s12372_s4 + $0x78] sm:$0xff]   ;;  %v10298_v26 = vld [vmem:[%s12372_s4 + $0x80] sm:$0xff]  }
 0x356   :  { %v10297_v13 = vld [vmem:[%s12372_s4 + $0x38] sm:$0xff]  }
 0x357   :  { %v1424_v39 = vmax.f32 %v1408_v17, 0.0  ;;  %9869 = vmatpush3.bf16.msra.mxu0 %v10282_v53  ;;  %v11151_v17 = vld [vmem:[%s12372_s4 + $0x200] sm:$0xff]  }
 0x358   :  { %v1356_v36 = vpop.permute.xlu1 %1355  ;;  %v1285_v42 = vpop.permute.xlu0 %1284  ;;  %9870 = vmatprep.subr.bf16.mxu0 %v10284_v16 }
 0x359   :  { %v1409_v38 = vadd.f32 %v1356_v36, %v1313_v32  ;;  %1440 = vxpose.xlu1.b32.cont [6/16] (narrow) %v1424_v39, 56  ;;  %v1318_v58 = vmul.f32 %v1285_v42, %v10863_v61  ;;  %v10456_v32 = vmov 1966171168   ;;  %v1496_v36 = vlaneseq }
 0x35a   :  { %v1494_v39 = vunpack.c.l.s4 %v10456_v32 }
 0x35b   :  { %v1425_v31 = vmax.f32 %v1409_v38, 0.0  ;;  %9871 = vmatpush3.bf16.msra.mxu0 %v10284_v16  ;;  %v1497_v38 = vshrl.u32 %v1496_v36, 7 }
 0x35c   :  { %v1361_v48 = vpop.permute.xlu1 %1360  ;;  %v1290_v51 = vpop.permute.xlu0 %1289  ;;  %9872 = vmatprep.subr.bf16.mxu0 %v10286_v22  ;;  %v1495_v42 = vunpack.c.0.s8 %v1494_v39 }
 0x35d   :  { %v1410_v45 = vadd.f32 %v1361_v48, %v1314_v21  ;;  %1441 = vxpose.xlu1.b32.cont [7/16] (narrow) %v1425_v31, 56  ;;  %v1319_v55 = vmul.f32 %v1290_v51, %v10870_v4  ;;  %v2836_v31 = vld [vmem:[#allocation2 + $0x1] sm:$0x7f] }
 0x35e   :  { %v11154_v21 = vsub.s32 %v1495_v42, %v1497_v38 }
 0x35f   :  { %v1426_v24 = vmax.f32 %v1410_v45, 0.0  ;;  %9873 = vmatpush3.bf16.msra.mxu0 %v10286_v22  ;;  %v2151_v45 = vld [vmem:[#allocation2] sm:$0x7f] }
 0x360   :  { %v1366_v44 = vpop.permute.xlu1 %1365  ;;  %v1295_v46 = vpop.permute.xlu0 %1294  ;;  %9874 = vmatprep.subr.bf16.mxu0 %v10288_v23  ;;  %v2857_v48 = vrot.slane %v2836_v31, %v11154_v21  ;;  %v2172_v51 = vrot.slane %v2151_v45, %v11154_v21 }
 0x361   :  { %v1411_v35 = vadd.f32 %v1366_v44, %v1315_v34  ;;  %1442 = vxpose.xlu1.b32.cont [8/16] (narrow) %v1426_v24, 56  ;;  %v1320_v8 = vmul.f32 %v1295_v46, %v10873_v7  ;;  %v2850_v34 = vcombine.high %v2836_v31, %v2836_v31  ;;  %v2165_v24 = vcombine.high %v2151_v45, %v2151_v45  ;;  %v3745_v44 = vld [vmem:[#allocation2 + $0x2] sm:$0x7f] }
 0x362   :  { %v3759_v46 = vcombine.high %v3745_v44, %v3745_v44 }
 0x363   :  { %v1427_v41 = vmax.f32 %v1411_v35, 0.0  ;;  %9875 = vmatpush3.bf16.msra.mxu0 %v10288_v23  ;;  %v2865_v35 = vcombine.high %v2857_v48, %v2857_v48  ;;  %v2179_v43 = vrot.slane %v2165_v24, %v11154_v21 }
 0x364   :  { %v1371_v28 = vpop.permute.xlu1 %1370  ;;  %v1300_v3 = vpop.permute.xlu0 %1299  ;;  %9876 = vmatprep.subr.bf16.mxu0 %v10296_v25  ;;  %v3773_v37 = vrot.slane %v3759_v46, %v11154_v21 }
 0x365   :  { %v1412_v29 = vadd.f32 %v1371_v28, %v1316_v40  ;;  %1443 = vxpose.xlu1.b32.cont [9/16] (narrow) %v1427_v41, 56  ;;  %v1321_v5 = vmul.f32 %v1300_v3, %v10880_v12  ;;  %v3766_v40 = vrot.slane %v3745_v44, %v11154_v21  ;;  %v2180_v41 = vcombine.high %v2172_v51, %v2172_v51 }
 0x366   :  { %v2864_v28 = vrot.slane %v2850_v34, %v11154_v21  ;;  %v2887_v18 = vrot.slane %v2865_v35, %v11154_v21 }
 0x367   :  { %v1428_v60 = vmax.f32 %v1412_v29, 0.0  ;;  %9877 = vmatpush3.bf16.msra.mxu0 %v10296_v25  ;;  %v2873_v29 = vrot.slane %v2857_v48, %v11154_v21 }
 0x368   :  { %v1376_v52 = vpop.permute.xlu1 %1375  ;;  %v1305_v61 = vpop.permute.xlu0 %1304  ;;  %10054 = vmatprep.subr.bf16.mxu0 %v11151_v17  ;;  %v2866_v54 = vcombine.high %v2864_v28, %v2864_v28 }
 0x369   :  { %v1413_v0 = vadd.f32 %v1376_v52, %v1317_v49  ;;  %1444 = vxpose.xlu1.b32.cont [10/16] (narrow) %v1428_v60, 56  ;;  %v1322_v7 = vmul.f32 %v1305_v61, %v10883_v59  ;;  %v10289_v59 = vld [vmem:[%s12372_s4 + $0x30] sm:$0xff]   ;;  %v3774_v49 = vcombine.high %v3766_v40, %v3766_v40  ;;  %v2188_v60 = vrot.slane %v2172_v51, %v11154_v21 }
 0x36a   :  { %9898 = vmatprep.subr.bf16.mxu1 %v10289_v59  ;;  %v2202_v52 = vrot.slane %v2180_v41, %v11154_v21  ;;  %v3186_v3 = vcombine.low %v2873_v29, %v2887_v18 }
 0x36b   :  { %v1429_v47 = vmax.f32 %v1413_v0, 0.0  ;;  %9899 = vmatpush3.bf16.msra.mxu1 %v10289_v59  ;;  %v2181_v0 = vcombine.high %v2179_v43, %v2179_v43 }
 0x36c   :  { %v1381_v6 = vpop.permute.xlu1 %1380  ;;  %v1401_v62 = vpop.permute.xlu0 %1400  ;;  %9900 = vmatprep.subr.bf16.mxu1 %v10297_v13  ;;  %v2501_v20 = vcombine.low %v2188_v60, %v2202_v52  ;;  %v9518_v50 = vcombine.high %v2188_v60, %v2202_v52  ;;  %v3196_v61 = vrot.slane %v3186_v3, %v11154_v21 }
 0x36d   :  { %v1414_v57 = vadd.f32 %v1381_v6, %v1318_v58  ;;  %1445 = vxpose.xlu1.b32.cont [11/16] (narrow) %v1429_v47, 56  ;;  %v1418_v27 = vadd.f32 %v1401_v62, %v1322_v7  ;;  %v9522_v58 = vcombine.high %v2873_v29, %v2887_v18  ;;  %v3782_v47 = vrot.slane %v3766_v40, %v11154_v21 }
 0x36e   :  { %v3796_v6 = vrot.slane %v3774_v49, %v11154_v21  ;;  %v11184_v7 = vrot.slane %v3773_v37, %v11154_v21 }
 0x36f   :  { %v1430_v33 = vmax.f32 %v1414_v57, 0.0  ;;  %v1434_v1 = vmax.f32 %v1418_v27, 0.0  ;;  %9901 = vmatpush3.bf16.msra.mxu1 %v10297_v13  ;;  %v3775_v57 = vcombine.high %v3773_v37, %v3773_v37 }
 0x370   :  { %v1386_v11 = vpop.permute.xlu1 %1385  ;;  %9910 = vmatprep.subr.bf16.mxu1 %v10298_v26  ;;  %v4095_v53 = vcombine.low %v3782_v47, %v3796_v6  ;;  %v9542_v56 = vcombine.high %v3782_v47, %v3796_v6  ;;  %v3805_v34 = vcombine.high %v11184_v7, %v11184_v7 }
 0x371   :  { %v1415_v15 = vadd.f32 %v1386_v11, %v1319_v55  ;;  %1446 = vxpose.xlu1.b32.cont [12/16] (narrow) %v1430_v33, 56  ;;  %v2894_v55 = vrot.slane %v2866_v54, %v11154_v21  ;;  %v2209_v33 = vrot.slane %v2181_v0, %v11154_v21  ;;  %v3203_v11 = vrot.slane %v9522_v58, %v11154_v21 }
 0x372   :  { %v3803_v16 = vrot.slane %v3775_v57, %v11154_v21  ;;  %v4112_v22 = vrot.slane %v9542_v56, %v11154_v21 }
 0x373   :  { %v1431_v4 = vmax.f32 %v1415_v15, 0.0  ;;  %v11173_v15 = vrot.slane %v2864_v28, %v11154_v21 }
 0x374   :  { %v1391_v63 = vpop.permute.xlu1 %1390 }
 0x375   :  { %v1416_v19 = vadd.f32 %v1391_v63, %v1320_v8  ;;  %1447 = vxpose.xlu1.b32.cont [13/16] (narrow) %v1431_v4, 56  ;;  %v11176_v8 = vrot.slane %v2179_v43, %v11154_v21  ;;  %v2511_v4 = vrot.slane %v2501_v20, %v11154_v21  ;;  %v2518_v63 = vrot.slane %v9518_v50, %v11154_v21 }
 0x376   :  { %v3188_v10 = vcombine.low %v11173_v15, %v2894_v55  ;;  %v2896_v23 = vcombine.high %v11173_v15, %v11173_v15 }
 0x377   :  { %v1432_v14 = vmax.f32 %v1416_v19, 0.0  ;;  %v2503_v19 = vcombine.low %v11176_v8, %v2209_v33  ;;  %v2533_v27 = vcombine.low %v2511_v4, %v2518_v63  ;;  %v2211_v25 = vcombine.high %v11176_v8, %v11176_v8 }
 0x378   :  { %v1396_v2 = vpop.permute.xlu1 %1395 }
 0x379   :  { %v1417_v12 = vadd.f32 %v1396_v2, %v1321_v5  ;;  %1448 = vxpose.xlu1.b32.cont [14/16] (narrow) %v1432_v14, 56  ;;  %v3218_v5 = vcombine.low %v3196_v61, %v3203_v11  ;;  %v4105_v14 = vrot.slane %v4095_v53, %v11154_v21  ;;  %v11203_v39 = vrot.slane %v2503_v19, %v11154_v21 }
 0x37a   :  { %v11209_v51 = vrot.slane %v2533_v27, %v11154_v21 }
 0x37b   :  { %v1433_v30 = vmax.f32 %v1417_v12, 0.0  ;;  %v4097_v12 = vcombine.low %v11184_v7, %v3803_v16  ;;  %v11200_v32 = vrot.slane %v3218_v5, %v11154_v21  ;;  %v4127_v36 = vcombine.low %v4105_v14, %v4112_v22 }
 0x37d   :  { %1449 = vxpose.xlu1.b32.cont [15/16] (narrow) %v1433_v30, 56  ;;  %v11214_v24 = vrot.slane %v4097_v12, %v11154_v21  ;;  %v11220_v18 = vrot.slane %v4127_v36, %v11154_v21 }
 0x381   :  { %1450 = vxpose.xlu1.b32.end [16/16] (narrow) %v1434_v1, 56  ;;  %v11194_v1 = vrot.slane %v3188_v10, %v11154_v21 }
 0x3c5   :  { %v1451_v62 = vpop.trf.xlu1 }
 0x3c6   :  { %v1492_v9 = vcombine.high %v1451_v62, %v1451_v62  ;;  %v1499_v2 = vrot.slane %v1451_v62, %v11154_v21 }
 0x3c8   :  { %v1506_v59 = vrot.slane %v1492_v9, %v11154_v21  ;;  %v1507_v30 = vcombine.high %v1499_v2, %v1499_v2  ;;  %v1515_v13 = vrot.slane %v1499_v2, %v11154_v21 }
 0x3c9   :  { %v1452_v26 = vpop.trf.xlu1 }
 0x3ca   :  { %v1508_v42 = vcombine.high %v1506_v59, %v1506_v59  ;;  %v1522_v38 = vrot.slane %v1506_v59, %v11154_v21  ;;  %v1529_v31 = vrot.slane %v1507_v30, %v11154_v21  ;;  %v1541_v48 = vcombine.high %v1452_v26, %v1452_v26 }
 0x3cb   :  { %v1548_v45 = vrot.slane %v1452_v26, %v11154_v21 }
 0x3cc   :  { %v1536_v44 = vrot.slane %v1508_v42, %v11154_v21  ;;  %v1538_v35 = vcombine.high %v1522_v38, %v1522_v38  ;;  %v1800_v40 = vcombine.low %v1515_v13, %v1529_v31  ;;  %v9512_v41 = vcombine.high %v1515_v13, %v1529_v31 }
 0x3cd   :  { %v1555_v46 = vrot.slane %v1541_v48, %v11154_v21  ;;  %v1556_v28 = vcombine.high %v1548_v45, %v1548_v45  ;;  %v1564_v43 = vrot.slane %v1548_v45, %v11154_v21  ;;  %v1453_v29 = vpop.trf.xlu1 }
 0x3ce   :  { %v1802_v49 = vcombine.low %v1522_v38, %v1536_v44  ;;  %v1809_v60 = vrot.slane %v1800_v40, %v11154_v21  ;;  %v1816_v52 = vrot.slane %v9512_v41, %v11154_v21  ;;  %v1830_v37 = vrot.slane %v1538_v35, %v11154_v21 }
 0x3cf   :  { %v1540_v54 = vcombine.high %v1536_v44, %v1536_v44  ;;  %v1557_v0 = vcombine.high %v1555_v46, %v1555_v46  ;;  %v1571_v3 = vrot.slane %v1555_v46, %v11154_v21  ;;  %v1578_v58 = vrot.slane %v1556_v28, %v11154_v21 }
 0x3d0   :  { %v1823_v47 = vrot.slane %v1802_v49, %v11154_v21  ;;  %v1831_v6 = vcombine.low %v1809_v60, %v1816_v52  ;;  %v1586_v20 = vcombine.high %v1564_v43, %v1564_v43  ;;  %v1590_v50 = vcombine.high %v1453_v29, %v1453_v29 }
 0x3d1   :  { %v1585_v57 = vrot.slane %v1557_v0, %v11154_v21  ;;  %v1588_v55 = vcombine.high %v1578_v58, %v1578_v58  ;;  %v1848_v33 = vcombine.low %v1540_v54, %v1564_v43  ;;  %v1597_v61 = vrot.slane %v1453_v29, %v11154_v21  ;;  %v1454_v11 = vpop.trf.xlu1 }
 0x3d2   :  { %v1832_v53 = vcombine.low %v1823_v47, %v1830_v37  ;;  %v1839_v56 = vrot.slane %v1831_v6, %v11154_v21  ;;  %v1849_v4 = vcombine.low %v1578_v58, %v1586_v20  ;;  %v1604_v63 = vrot.slane %v1590_v50, %v11154_v21 }
 0x3d3   :  { %v1850_v16 = vcombine.low %v1588_v55, %v1571_v3  ;;  %v1857_v10 = vrot.slane %v1848_v33, %v11154_v21  ;;  %v1878_v19 = vrot.slane %v1585_v57, %v11154_v21  ;;  %v9513_v62 = vcombine.high %v1571_v3, %v1585_v57 }
 0x3d4   :  { %v1846_v5 = vrot.slane %v1832_v53, %v11154_v21  ;;  %v1864_v14 = vrot.slane %v1849_v4, %v11154_v21  ;;  %v1605_v22 = vcombine.high %v1597_v61, %v1597_v61  ;;  %v1606_v9 = vcombine.high %v1604_v63, %v1604_v63 }
 0x3d5   :  { %v1871_v2 = vrot.slane %v1850_v16, %v11154_v21  ;;  %v1905_v27 = vrot.slane %v9513_v62, %v11154_v21  ;;  %v1613_v12 = vrot.slane %v1597_v61, %v11154_v21  ;;  %v1620_v59 = vrot.slane %v1604_v63, %v11154_v21  ;;  %v1455_v45 = vpop.trf.xlu1 }
 0x3d6   :  { %v1847_v30 = vcombine.low %v1839_v56, %v1846_v5  ;;  %v1879_v13 = vcombine.low %v1857_v10, %v1864_v14  ;;  %v1627_v26 = vrot.slane %v1605_v22, %v11154_v21  ;;  %v1634_v36 = vrot.slane %v1606_v9, %v11154_v21 }
 0x3d7   :  { %v1880_v42 = vcombine.low %v1871_v2, %v1878_v19  ;;  %v1636_v38 = vcombine.high %v1620_v59, %v1620_v59  ;;  %v1926_v31 = vrot.slane %v1620_v59, %v11154_v21  ;;  %v1639_v48 = vcombine.high %v1454_v11, %v1454_v11 }
 0x3d8   :  { %2144 = vst [vmem:[#allocation2 + $0x11] sm:$0x7f] %v1847_v30  ;;  %v1887_v44 = vrot.slane %v1879_v13, %v11154_v21  ;;  %v1897_v35 = vcombine.low %v1613_v12, %v1627_v26  ;;  %v9514_v40 = vcombine.high %v1613_v12, %v1627_v26  ;;  %v1638_v41 = vcombine.high %v1634_v36, %v1634_v36 }
 0x3d9   :  { %v1894_v46 = vrot.slane %v1880_v42, %v11154_v21  ;;  %v1944_v28 = vcombine.low %v1634_v36, %v1636_v38  ;;  %v1646_v43 = vrot.slane %v1454_v11, %v11154_v21  ;;  %v1653_v29 = vrot.slane %v1639_v48, %v11154_v21  ;;  %v1456_v9 = vpop.trf.xlu1 }
 0x3da   :  { %v1912_v49 = vrot.slane %v1897_v35, %v11154_v21  ;;  %v1919_v60 = vrot.slane %v9514_v40, %v11154_v21  ;;  %v1688_v52 = vcombine.high %v1455_v45, %v1455_v45  ;;  %v1695_v37 = vrot.slane %v1455_v45, %v11154_v21 }
 0x3db   :  { %v1895_v54 = vcombine.low %v1887_v44, %v1894_v46  ;;  %v1953_v0 = vrot.slane %v1944_v28, %v11154_v21  ;;  %v1654_v3 = vcombine.high %v1646_v43, %v1646_v43  ;;  %v1655_v58 = vcombine.high %v1653_v29, %v1653_v29 }
 0x3dc   :  { %v1927_v47 = vcombine.low %v1905_v27, %v1912_v49  ;;  %v1928_v6 = vcombine.low %v1919_v60, %v1926_v31  ;;  %v1662_v20 = vrot.slane %v1646_v43, %v11154_v21  ;;  %v1669_v50 = vrot.slane %v1653_v29, %v11154_v21 }
 0x3dd   :  { %2145 = vst [vmem:[#allocation2 + $0x21] sm:$0x7f] %v1895_v54  ;;  %v1676_v57 = vrot.slane %v1654_v3, %v11154_v21  ;;  %v1683_v55 = vrot.slane %v1655_v58, %v11154_v21  ;;  %v1702_v33 = vrot.slane %v1688_v52, %v11154_v21  ;;  %v1703_v61 = vcombine.high %v1695_v37, %v1695_v37 }
 0x3de   :  { %v1935_v11 = vrot.slane %v1927_v47, %v11154_v21  ;;  %v1942_v53 = vrot.slane %v1928_v6, %v11154_v21  ;;  %v1684_v56 = vcombine.high %v1662_v20, %v1662_v20  ;;  %v1945_v4 = vcombine.low %v1638_v41, %v1662_v20  ;;  %v1457_v41 = vpop.trf.xlu1 }
 0x3df   :  { %v1686_v63 = vcombine.high %v1676_v57, %v1676_v57  ;;  %v1992_v16 = vcombine.low %v1669_v50, %v1683_v55  ;;  %v9515_v10 = vcombine.high %v1669_v50, %v1683_v55  ;;  %v1704_v19 = vcombine.high %v1702_v33, %v1702_v33  ;;  %v2837_v46 = vld [vmem:[#allocation2 + $0x11] sm:$0x7f] }
 0x3e0   :  { %v1943_v62 = vcombine.low %v1935_v11, %v1942_v53  ;;  %v1946_v5 = vcombine.low %v1676_v57, %v1684_v56  ;;  %v1960_v14 = vrot.slane %v1945_v4, %v11154_v21  ;;  %v1711_v22 = vrot.slane %v1695_v37, %v11154_v21 }
 0x3e1   :  { %v1974_v2 = vrot.slane %v1686_v63, %v11154_v21  ;;  %v2001_v27 = vrot.slane %v1992_v16, %v11154_v21  ;;  %v2008_v12 = vrot.slane %v9515_v10, %v11154_v21  ;;  %v1718_v59 = vrot.slane %v1702_v33, %v11154_v21 }
 0x3e2   :  { %2146 = vst [vmem:[#allocation2 + $0x31] sm:$0x7f] %v1943_v62  ;;  %v1967_v30 = vrot.slane %v1946_v5, %v11154_v21  ;;  %v1975_v13 = vcombine.low %v1953_v0, %v1960_v14  ;;  %v1725_v26 = vrot.slane %v1703_v61, %v11154_v21  ;;  %v1732_v36 = vrot.slane %v1704_v19, %v11154_v21 }
 0x3e3   :  { %v2023_v42 = vcombine.low %v2001_v27, %v2008_v12  ;;  %v1733_v38 = vcombine.high %v1711_v22, %v1711_v22  ;;  %v1734_v31 = vcombine.high %v1718_v59, %v1718_v59  ;;  %v1737_v48 = vcombine.high %v1456_v9, %v1456_v9 }
 0x3e4   :  { %v1976_v45 = vcombine.low %v1967_v30, %v1974_v2  ;;  %v1983_v44 = vrot.slane %v1975_v13, %v11154_v21  ;;  %v1735_v35 = vcombine.high %v1725_v26, %v1725_v26  ;;  %v1994_v40 = vcombine.low %v1711_v22, %v1725_v26 }
 0x3e5   :  { %v2031_v28 = vrot.slane %v2023_v42, %v11154_v21  ;;  %v2022_v43 = vrot.slane %v1733_v38, %v11154_v21  ;;  %v2041_v29 = vcombine.low %v1732_v36, %v1734_v31  ;;  %v1736_v49 = vcombine.high %v1732_v36, %v1732_v36 }
 0x3e6   :  { %v1990_v60 = vrot.slane %v1976_v45, %v11154_v21  ;;  %v2015_v52 = vrot.slane %v1994_v40, %v11154_v21  ;;  %v2040_v37 = vcombine.low %v1735_v35, %v1718_v59  ;;  %v1744_v54 = vrot.slane %v1456_v9, %v11154_v21  ;;  %v2838_v59 = vld [vmem:[#allocation2 + $0x21] sm:$0x7f] }
 0x3e7   :  { %v2056_v0 = vrot.slane %v2041_v29, %v11154_v21  ;;  %v1751_v3 = vrot.slane %v1737_v48, %v11154_v21  ;;  %v1792_v58 = vrot.slane %v1457_v41, %v11154_v21  ;;  %v2898_v47 = vcombine.high %v2837_v46, %v2837_v46 }
 0x3e8   :  { %v1991_v6 = vcombine.low %v1983_v44, %v1990_v60  ;;  %v2024_v20 = vcombine.low %v2015_v52, %v2022_v43  ;;  %v2049_v50 = vrot.slane %v2040_v37, %v11154_v21  ;;  %v1752_v57 = vcombine.high %v1744_v54, %v1744_v54 }
 0x3e9   :  { %v1753_v55 = vcombine.high %v1751_v3, %v1751_v3  ;;  %v1760_v33 = vrot.slane %v1744_v54, %v11154_v21  ;;  %v1767_v61 = vrot.slane %v1751_v3, %v11154_v21  ;;  %v1799_v11 = vrot.slane %v1792_v58, %v11154_v21 }
 0x3ea   :  { %2147 = vst [vmem:[#allocation2 + $0x41] sm:$0x7f] %v1991_v6  ;;  %v2038_v53 = vrot.slane %v2024_v20, %v11154_v21  ;;  %v2071_v56 = vcombine.low %v2049_v50, %v2056_v0  ;;  %v1774_v4 = vrot.slane %v1752_v57, %v11154_v21  ;;  %v2905_v63 = vrot.slane %v2837_v46, %v11154_v21 }
 0x3eb   :  { %v1781_v16 = vrot.slane %v1753_v55, %v11154_v21  ;;  %v2042_v10 = vcombine.low %v1736_v49, %v1760_v33  ;;  %v2118_v19 = vrot.slane %v1799_v11, %v11154_v21  ;;  %v2912_v62 = vrot.slane %v2898_v47, %v11154_v21  ;;  %v2152_v47 = vld [vmem:[#allocation2 + $0x10] sm:$0x7f]  ;;  %v11308_v55 = vld [vmem:[#allocation2 + $0x20] sm:$0x7f] }
 0x3ec   :  { %v2039_v5 = vcombine.low %v2031_v28, %v2038_v53  ;;  %v2079_v14 = vrot.slane %v2071_v56, %v11154_v21  ;;  %v2070_v22 = vrot.slane %v1774_v4, %v11154_v21  ;;  %v9516_v9 = vcombine.high %v1760_v33, %v1774_v4 }
 0x3ed   :  { %v2063_v2 = vrot.slane %v2042_v10, %v11154_v21  ;;  %v2089_v27 = vcombine.low %v1767_v61, %v1781_v16  ;;  %v9517_v12 = vcombine.high %v1767_v61, %v1781_v16  ;;  %v2913_v30 = vcombine.high %v2905_v63, %v2905_v63 }
 0x3ee   :  { %2148 = vst [vmem:[#allocation2 + $0x51] sm:$0x7f] %v2039_v5  ;;  %v2097_v13 = vrot.slane %v9516_v9, %v11154_v21  ;;  %v2914_v26 = vcombine.high %v2912_v62, %v2912_v62  ;;  %v2921_v36 = vrot.slane %v2905_v63, %v11154_v21  ;;  %v2928_v42 = vrot.slane %v2912_v62, %v11154_v21 }
 0x3ef   :  { %v2072_v38 = vcombine.low %v2063_v2, %v2070_v22  ;;  %v2104_v31 = vrot.slane %v2089_v27, %v11154_v21  ;;  %v2111_v48 = vrot.slane %v9517_v12, %v11154_v21  ;;  %v2935_v45 = vrot.slane %v2913_v30, %v11154_v21 }
 0x3f0   :  { %v2942_v44 = vrot.slane %v2914_v26, %v11154_v21  ;;  %v2943_v35 = vcombine.high %v2921_v36, %v2921_v36  ;;  %v2944_v40 = vcombine.high %v2928_v42, %v2928_v42  ;;  %v2946_v41 = vcombine.high %v2838_v59, %v2838_v59 }
 0x3f1   :  { %v2086_v46 = vrot.slane %v2072_v38, %v11154_v21  ;;  %v2119_v28 = vcombine.low %v2097_v13, %v2104_v31  ;;  %v2120_v43 = vcombine.low %v2111_v48, %v2118_v19  ;;  %v2945_v29 = vcombine.high %v2935_v45, %v2935_v45 }
 0x3f2   :  { %v2953_v49 = vrot.slane %v2838_v59, %v11154_v21  ;;  %v2960_v60 = vrot.slane %v2946_v41, %v11154_v21  ;;  %v3189_v52 = vcombine.low %v2896_v23, %v2921_v36  ;;  %v3235_v37 = vcombine.low %v2935_v45, %v2943_v35  ;;  %v2839_v41 = vld [vmem:[#allocation2 + $0x31] sm:$0x7f] }
 0x3f3   :  { %v2087_v54 = vcombine.low %v2079_v14, %v2086_v46  ;;  %v2127_v0 = vrot.slane %v2119_v28, %v11154_v21  ;;  %v2134_v3 = vrot.slane %v2120_v43, %v11154_v21  ;;  %v3236_v58 = vcombine.low %v2945_v29, %v2928_v42 }
 0x3f4   :  { %v2961_v6 = vcombine.high %v2953_v49, %v2953_v49  ;;  %v2962_v20 = vcombine.high %v2960_v60, %v2960_v60  ;;  %v11305_v50 = vrot.slane %v2953_v49, %v11154_v21  ;;  %v3217_v57 = vrot.slane %v3189_v52, %v11154_v21  ;;  %v11349_v49 = vld [vmem:[#allocation2 + $0x41] sm:$0x7f] }
 0x3f5   :  { %2149 = vst [vmem:[#allocation2 + $0x61] sm:$0x7f] %v2087_v54  ;;  %v2135_v15 = vcombine.low %v2127_v0, %v2134_v3  ;;  %v3237_v23 = vcombine.low %v2942_v44, %v2944_v40  ;;  %v3245_v33 = vrot.slane %v3235_v37, %v11154_v21  ;;  %v3252_v61 = vrot.slane %v3236_v58, %v11154_v21 }
 0x3f6   :  { %v11313_v11 = vrot.slane %v2961_v6, %v11154_v21  ;;  %v3219_v53 = vcombine.low %v11194_v1, %v3217_v57  ;;  %v2213_v56 = vcombine.high %v2152_v47, %v2152_v47  ;;  %v2220_v4 = vrot.slane %v2152_v47, %v11154_v21 }
 0x3f7   :  { %2150 = vst [vmem:[#allocation2 + $0x71] sm:$0x7f] %v2135_v15  ;;  %v3259_v63 = vrot.slane %v3237_v23, %v11154_v21  ;;  %v3267_v16 = vcombine.low %v3245_v33, %v3252_v61  ;;  %v2261_v10 = vcombine.high %v11308_v55, %v11308_v55  ;;  %v2268_v19 = vrot.slane %v11308_v55, %v11154_v21  ;;  %v11390_v55 = vld [vmem:[#allocation2 + $0x40] sm:$0x7f] }
 0x3f8   :  { %v3233_v62 = vrot.slane %v3219_v53, %v11154_v21  ;;  %v3238_v5 = vcombine.low %v11305_v50, %v11313_v11  ;;  %v9523_v1 = vcombine.high %v11305_v50, %v11313_v11  ;;  %v2227_v14 = vrot.slane %v2213_v56, %v11154_v21 }
 0x3f9   :  { %v3275_v22 = vrot.slane %v3267_v16, %v11154_v21  ;;  %v2228_v9 = vcombine.high %v2220_v4, %v2220_v4  ;;  %v2236_v2 = vrot.slane %v2220_v4, %v11154_v21  ;;  %v2276_v27 = vcombine.high %v2268_v19, %v2268_v19 }
 0x3fa   :  { %v3234_v12 = vcombine.low %v11200_v32, %v3233_v62  ;;  %v3266_v59 = vrot.slane %v3238_v5, %v11154_v21  ;;  %v2229_v30 = vcombine.high %v2227_v14, %v2227_v14  ;;  %v2243_v13 = vrot.slane %v2227_v14, %v11154_v21 }
 0x3fb   :  { %v2250_v26 = vrot.slane %v2228_v9, %v11154_v21  ;;  %v2258_v36 = vcombine.high %v2236_v2, %v2236_v2  ;;  %v11335_v42 = vrot.slane %v2268_v19, %v11154_v21  ;;  %v11338_v38 = vrot.slane %v2276_v27, %v11154_v21 }
 0x3fc   :  { %v3268_v31 = vcombine.low %v3259_v63, %v3266_v59  ;;  %v2257_v48 = vrot.slane %v2229_v30, %v11154_v21  ;;  %v2259_v45 = vcombine.high %v2243_v13, %v2243_v13  ;;  %v2504_v32 = vcombine.low %v2211_v25, %v2236_v2 }
 0x3fd   :  { %v2260_v44 = vcombine.high %v2250_v26, %v2250_v26  ;;  %v2550_v35 = vcombine.low %v2250_v26, %v2258_v36  ;;  %v2553_v40 = vcombine.low %v11335_v42, %v11338_v38  ;;  %v2976_v46 = vrot.slane %v2960_v60, %v11154_v21 }
 0x3fe   :  { %v3282_v28 = vrot.slane %v3268_v31, %v11154_v21  ;;  %v2532_v43 = vrot.slane %v2504_v32, %v11154_v21  ;;  %v2552_v29 = vcombine.low %v2257_v48, %v2259_v45  ;;  %v2990_v52 = vrot.slane %v2962_v20, %v11154_v21  ;;  %v2154_v32 = vld [vmem:[#allocation2 + $0x30] sm:$0x7f] }
 0x3ff   :  { %v2551_v37 = vcombine.low %v2260_v44, %v2243_v13  ;;  %v2560_v8 = vrot.slane %v2550_v35, %v11154_v21  ;;  %v2581_v25 = vrot.slane %v2553_v40, %v11154_v21  ;;  %v2992_v54 = vcombine.high %v2976_v46, %v2976_v46 }
 0x400   :  { %v3283_v0 = vcombine.low %v3275_v22, %v3282_v28  ;;  %v2534_v3 = vcombine.low %v11203_v39, %v2532_v43  ;;  %v2574_v60 = vrot.slane %v2552_v29, %v11154_v21  ;;  %v2994_v58 = vcombine.high %v2839_v41, %v2839_v41 }
 0x401   :  { %v2567_v47 = vrot.slane %v2551_v37, %v11154_v21  ;;  %v3001_v6 = vrot.slane %v2839_v41, %v11154_v21  ;;  %v3049_v57 = vrot.slane %v11349_v49, %v11154_v21  ;;  %v3285_v20 = vcombine.low %v2976_v46, %v2990_v52 }
 0x402   :  { %v3501_v15 = vpack.c.bf16 %v3283_v0, %v3234_v12  ;;  %v2548_v23 = vrot.slane %v2534_v3, %v11154_v21  ;;  %v2583_v33 = vcombine.low %v2574_v60, %v2581_v25  ;;  %v3008_v61 = vrot.slane %v2994_v58, %v11154_v21 }
 0x403   :  { %v2582_v53 = vcombine.low %v2560_v8, %v2567_v47  ;;  %v3009_v56 = vcombine.high %v3001_v6, %v3001_v6  ;;  %v3017_v39 = vrot.slane %v3001_v6, %v11154_v21  ;;  %v3057_v4 = vcombine.high %v3049_v57, %v3049_v57 }
 0x404   :  { %9878 = vmatprep.mubr.bf16.mxu0 %v3501_v15  ;;  %v2549_v63 = vcombine.low %v11209_v51, %v2548_v23  ;;  %v2597_v16 = vrot.slane %v2583_v33, %v11154_v21  ;;  %v3010_v19 = vcombine.high %v3008_v61, %v3008_v61  ;;  %v3024_v62 = vrot.slane %v3008_v61, %v11154_v21 }
 0x405   :  { %v2590_v5 = vrot.slane %v2582_v53, %v11154_v21  ;;  %v3031_v14 = vrot.slane %v3009_v56, %v11154_v21  ;;  %v3039_v22 = vcombine.high %v3017_v39, %v3017_v39  ;;  %v3065_v9 = vrot.slane %v3049_v57, %v11154_v21 }
 0x406   :  { %v3038_v2 = vrot.slane %v3010_v19, %v11154_v21  ;;  %v3040_v27 = vcombine.high %v3024_v62, %v3024_v62  ;;  %v3079_v12 = vrot.slane %v3057_v4, %v11154_v21  ;;  %v3286_v59 = vcombine.low %v2992_v54, %v3017_v39 }
 0x407   :  { %v2598_v30 = vcombine.low %v2590_v5, %v2597_v16  ;;  %v3041_v51 = vcombine.high %v3031_v14, %v3031_v14  ;;  %v3287_v13 = vcombine.low %v3031_v14, %v3039_v22  ;;  %v3294_v26 = vrot.slane %v9523_v1, %v11154_v21 }
 0x408   :  { %v3301_v36 = vrot.slane %v3285_v20, %v11154_v21  ;;  %v3308_v31 = vrot.slane %v3286_v59, %v11154_v21  ;;  %v3334_v48 = vcombine.low %v3038_v2, %v3040_v27  ;;  %v3335_v45 = vcombine.low %v3065_v9, %v3079_v12 }
 0x409   :  { %v2816_v44 = vpack.c.bf16 %v2598_v30, %v2549_v63  ;;  %v3315_v35 = vrot.slane %v3287_v13, %v11154_v21  ;;  %v3333_v40 = vcombine.low %v3041_v51, %v3024_v62  ;;  %v9524_v41 = vcombine.high %v3065_v9, %v3079_v12  ;;  %v2841_v9 = vld [vmem:[#allocation2 + $0x51] sm:$0x7f]  ;;  %v10303_v30 = vld [vmem:[%s12372_s4 + $0x208] sm:$0xff]  }
 0x40a   :  { %v3316_v46 = vcombine.low %v3294_v26, %v3301_v36  ;;  %v3350_v28 = vrot.slane %v3334_v48, %v11154_v21  ;;  %v3357_v43 = vrot.slane %v3335_v45, %v11154_v21  ;;  %v2275_v50 = vrot.slane %v2261_v10, %v11154_v21 }
 0x40b   :  { %9902 = vmatprep.mubr.bf16.mxu1 %v2816_v44  ;;  %v3317_v11 = vcombine.low %v3308_v31, %v3315_v35  ;;  %v3343_v1 = vrot.slane %v3333_v40, %v11154_v21  ;;  %v3364_v29 = vrot.slane %v9524_v41, %v11154_v21  ;;  %v2309_v52 = vcombine.high %v2154_v32, %v2154_v32 }
 0x40c   :  { %v3324_v37 = vrot.slane %v3316_v46, %v11154_v21  ;;  %v2277_v8 = vcombine.high %v2275_v50, %v2275_v50  ;;  %v2291_v25 = vrot.slane %v2275_v50, %v11154_v21  ;;  %v2316_v54 = vrot.slane %v2154_v32, %v11154_v21  ;;  %v10305_v46 = vld [vmem:[%s12372_s4 + $0x210] sm:$0xff]  }
 0x40d   :  { %v3331_v0 = vrot.slane %v3317_v11, %v11154_v21  ;;  %v3365_v3 = vcombine.low %v3343_v1, %v3350_v28  ;;  %v3366_v60 = vcombine.low %v3357_v43, %v3364_v29  ;;  %v2323_v10 = vrot.slane %v2309_v52, %v11154_v21 }
 0x40e   :  { %v2305_v58 = vrot.slane %v2277_v8, %v11154_v21  ;;  %v2307_v47 = vcombine.high %v2291_v25, %v2291_v25  ;;  %v2324_v6 = vcombine.high %v2316_v54, %v2316_v54  ;;  %v2332_v57 = vrot.slane %v2316_v54, %v11154_v21 }
 0x40f   :  { %v3332_v20 = vcombine.low %v3324_v37, %v3331_v0  ;;  %v3373_v15 = vrot.slane %v3365_v3, %v11154_v21  ;;  %v3380_v23 = vrot.slane %v3366_v60, %v11154_v21  ;;  %v2325_v33 = vcombine.high %v2323_v10, %v2323_v10 }
 0x410   :  { %v2339_v61 = vrot.slane %v2323_v10, %v11154_v21  ;;  %v2346_v53 = vrot.slane %v2324_v6, %v11154_v21  ;;  %v2354_v56 = vcombine.high %v2332_v57, %v2332_v57  ;;  %v2364_v39 = vrot.slane %v11390_v55, %v11154_v21  ;;  %v10313_v6 = vld [vmem:[%s12372_s4 + $0x218] sm:$0xff]  }
 0x411   :  { %v3381_v4 = vcombine.low %v3373_v15, %v3380_v23  ;;  %v2353_v63 = vrot.slane %v2325_v33, %v11154_v21  ;;  %v9519_v16 = vcombine.high %v11335_v42, %v11338_v38  ;;  %v2600_v19 = vcombine.low %v2291_v25, %v2305_v58  ;;  %v2842_v25 = vld [vmem:[#allocation2 + $0x61] sm:$0x7f] }
 0x412   :  { %v2355_v62 = vcombine.high %v2339_v61, %v2339_v61  ;;  %v2356_v5 = vcombine.high %v2346_v53, %v2346_v53  ;;  %v2372_v14 = vcombine.high %v2364_v39, %v2364_v39  ;;  %v2380_v22 = vrot.slane %v2364_v39, %v11154_v21 }
 0x413   :  { %v3502_v2 = vpack.c.bf16 %v3381_v4, %v3332_v20  ;;  %v2601_v27 = vcombine.low %v2307_v47, %v2332_v57  ;;  %v2602_v12 = vcombine.low %v2346_v53, %v2354_v56  ;;  %v2609_v59 = vrot.slane %v9519_v16, %v11154_v21 }
 0x414   :  { %v2394_v51 = vrot.slane %v2372_v14, %v11154_v21  ;;  %v2616_v42 = vrot.slane %v2600_v19, %v11154_v21  ;;  %v2648_v38 = vcombine.low %v2356_v5, %v2339_v61  ;;  %v2649_v13 = vcombine.low %v2353_v63, %v2355_v62 }
 0x415   :  { %9879 = vmatmul.mubr.bf16.vlgmr.msra.gmra.mrb[96].mxu0 %v3502_v2  ;;  %v2623_v26 = vrot.slane %v2601_v27, %v11154_v21  ;;  %v2630_v36 = vrot.slane %v2602_v12, %v11154_v21  ;;  %v3042_v31 = vcombine.high %v11349_v49, %v11349_v49  ;;  %v3090_v48 = vcombine.high %v2841_v9, %v2841_v9 }
 0x416   :  { %v2631_v45 = vcombine.low %v2609_v59, %v2616_v42  ;;  %v2650_v32 = vcombine.low %v2380_v22, %v2394_v51  ;;  %v9520_v44 = vcombine.high %v2380_v22, %v2394_v51  ;;  %v2658_v35 = vrot.slane %v2648_v38, %v11154_v21  ;;  %10055 = vmatpush3.bf16.msra.mxu0 %v11151_v17  ;;  %v2156_v59 = vld [vmem:[#allocation2 + $0x50] sm:$0x7f] }
 0x417   :  { %v2632_v40 = vcombine.low %v2623_v26, %v2630_v36  ;;  %v2665_v41 = vrot.slane %v2649_v13, %v11154_v21  ;;  %10056 = vmatprep.subr.bf16.mxu0 %v10303_v30  ;;  %v3056_v28 = vrot.slane %v3042_v31, %v11154_v21  ;;  %v3097_v49 = vrot.slane %v2841_v9, %v11154_v21  ;;  %v10302_v9 = vld [vmem:[%s12372_s4 + $0x88] sm:$0xff]  }
 0x418   :  { %v2639_v43 = vrot.slane %v2631_v45, %v11154_v21  ;;  %v2672_v50 = vrot.slane %v2650_v32, %v11154_v21  ;;  %v2679_v11 = vrot.slane %v9520_v44, %v11154_v21  ;;  %v3104_v17 = vrot.slane %v3090_v48, %v11154_v21  ;;  %v10321_v48 = vld [vmem:[%s12372_s4 + $0x220] sm:$0xff]  }
 0x419   :  { %v2646_v1 = vrot.slane %v2632_v40, %v11154_v21  ;;  %v2680_v29 = vcombine.low %v2658_v35, %v2665_v41  ;;  %v3058_v52 = vcombine.high %v3056_v28, %v3056_v28  ;;  %v3072_v37 = vrot.slane %v3056_v28, %v11154_v21  ;;  %v10443_v45 = vld [vmem:[%s12372_s4 + $0x80] sm:$0xff]   ;;  %v10304_v41 = vld [vmem:[%s12372_s4 + $0x90] sm:$0xff]  }
 0x41a   :  { %v2681_v8 = vcombine.low %v2672_v50, %v2679_v11  ;;  %10057 = vmatpush3.bf16.msra.mxu0 %v10303_v30  ;;  %v3105_v54 = vcombine.high %v3097_v49, %v3097_v49  ;;  %v3106_v0 = vcombine.high %v3104_v17, %v3104_v17  ;;  %v3113_v3 = vrot.slane %v3097_v49, %v11154_v21 }
 0x41b   :  { %v2647_v60 = vcombine.low %v2639_v43, %v2646_v1  ;;  %v2688_v10 = vrot.slane %v2680_v29, %v11154_v21  ;;  %10058 = vmatprep.subr.bf16.mxu0 %v10305_v46  ;;  %v3086_v58 = vrot.slane %v3058_v52, %v11154_v21  ;;  %v3088_v47 = vcombine.high %v3072_v37, %v3072_v37 }
 0x41c   :  { %v2695_v57 = vrot.slane %v2681_v8, %v11154_v21  ;;  %v3120_v20 = vrot.slane %v3104_v17, %v11154_v21  ;;  %v3127_v15 = vrot.slane %v3105_v54, %v11154_v21  ;;  %v3134_v23 = vrot.slane %v3106_v0, %v11154_v21  ;;  %v10323_v8 = vld [vmem:[%s12372_s4 + $0x228] sm:$0xff]   ;;  %v2157_v0 = vld [vmem:[#allocation2 + $0x60] sm:$0x7f] }
 0x41d   :  { %v3135_v33 = vcombine.high %v3113_v3, %v3113_v3  ;;  %v3138_v61 = vcombine.high %v2842_v25, %v2842_v25  ;;  %v3145_v53 = vrot.slane %v2842_v25, %v11154_v21  ;;  %v3382_v56 = vcombine.low %v3072_v37, %v3086_v58 }
 0x41e   :  { %v2696_v39 = vcombine.low %v2688_v10, %v2695_v57  ;;  %10059 = vmatpush3.bf16.msra.mxu0 %v10305_v46  ;;  %v3136_v4 = vcombine.high %v3120_v20, %v3120_v20  ;;  %v3137_v63 = vcombine.high %v3127_v15, %v3127_v15  ;;  %v3383_v16 = vcombine.low %v3088_v47, %v3113_v3  ;;  %v10312_v57 = vld [vmem:[%s12372_s4 + $0x98] sm:$0xff]  }
 0x41f   :  { %v3152_v19 = vrot.slane %v3138_v61, %v11154_v21  ;;  %v3153_v62 = vcombine.high %v3145_v53, %v3145_v53  ;;  %v3161_v5 = vrot.slane %v3145_v53, %v11154_v21  ;;  %v3384_v14 = vcombine.low %v3127_v15, %v3135_v33  ;;  %10060 = vmatprep.subr.bf16.mxu0 %v10313_v6 }
 0x420   :  { %v2817_v22 = vpack.c.bf16 %v2696_v39, %v2647_v60  ;;  %v3385_v2 = vcombine.low %v3137_v63, %v3120_v20  ;;  %v3392_v27 = vrot.slane %v3382_v56, %v11154_v21  ;;  %v3399_v12 = vrot.slane %v3383_v16, %v11154_v21 }
 0x421   :  { %v3154_v30 = vcombine.high %v3152_v19, %v3152_v19  ;;  %v11448_v51 = vrot.slane %v3152_v19, %v11154_v21  ;;  %v3175_v42 = vrot.slane %v3153_v62, %v11154_v21  ;;  %v3406_v38 = vrot.slane %v3384_v14, %v11154_v21 }
 0x422   :  { %9903 = vmatmul.mubr.bf16.vlgmr.msra.gmra.mrb[0].mxu1 %v2817_v22  ;;  %v3413_v13 = vrot.slane %v3385_v2, %v11154_v21  ;;  %v3414_v26 = vcombine.low %v3392_v27, %v3399_v12  ;;  %v3431_v36 = vcombine.low %v3134_v23, %v3136_v4  ;;  %v2357_v31 = vcombine.high %v11390_v55, %v11390_v55  ;;  %v10325_v4 = vld [vmem:[%s12372_s4 + $0x230] sm:$0xff]   ;;  %v10320_v2 = vld [vmem:[%s12372_s4 + $0xa0] sm:$0xff]  }
 0x423   :  { %9911 = vmatpush3.bf16.msra.mxu1 %v10443_v45  ;;  %v3182_v32 = vrot.slane %v3154_v30, %v11154_v21  ;;  %v3432_v44 = vcombine.low %v3161_v5, %v3175_v42  ;;  %v9525_v35 = vcombine.high %v3161_v5, %v3175_v42  ;;  %v2405_v40 = vcombine.high %v2156_v59, %v2156_v59 }
 0x424   :  { %9912 = vmatprep.subr.bf16.mxu1 %v10302_v9  ;;  %v3415_v55 = vcombine.low %v3406_v38, %v3413_v13  ;;  %v3422_v46 = vrot.slane %v3414_v26, %v11154_v21  ;;  %v3441_v28 = vrot.slane %v3431_v36, %v11154_v21  ;;  %v2371_v49 = vrot.slane %v2357_v31, %v11154_v21 }
 0x425   :  { %v3434_v43 = vcombine.low %v11448_v51, %v3182_v32  ;;  %v3448_v50 = vrot.slane %v3432_v44, %v11154_v21  ;;  %v3455_v11 = vrot.slane %v9525_v35, %v11154_v21  ;;  %v2412_v17 = vrot.slane %v2156_v59, %v11154_v21  ;;  %10061 = vmatpush3.bf16.msra.mxu0 %v10313_v6 }
 0x426   :  { %v3429_v1 = vrot.slane %v3415_v55, %v11154_v21  ;;  %v2373_v29 = vcombine.high %v2371_v49, %v2371_v49  ;;  %v2387_v52 = vrot.slane %v2371_v49, %v11154_v21  ;;  %v2419_v37 = vrot.slane %v2405_v40, %v11154_v21  ;;  %10062 = vmatprep.subr.bf16.mxu0 %v10321_v48  ;;  %v10322_v55 = vld [vmem:[%s12372_s4 + $0xa8] sm:$0xff]  }
 0x427   :  { %9913 = vmatpush3.bf16.msra.mxu1 %v10302_v9  ;;  %v3462_v25 = vrot.slane %v3434_v43, %v11154_v21  ;;  %v3463_v54 = vcombine.low %v3441_v28, %v3448_v50  ;;  %v2420_v3 = vcombine.high %v2412_v17, %v2412_v17  ;;  %v2428_v60 = vrot.slane %v2412_v17, %v11154_v21  ;;  %v3747_v50 = vld [vmem:[#allocation2 + $0x22] sm:$0x7f] }
 0x428   :  { %9914 = vmatprep.subr.bf16.mxu1 %v10304_v41  ;;  %v3430_v10 = vcombine.low %v3422_v46, %v3429_v1  ;;  %v2401_v58 = vrot.slane %v2373_v29, %v11154_v21  ;;  %v2403_v47 = vcombine.high %v2387_v52, %v2387_v52  ;;  %v2421_v6 = vcombine.high %v2419_v37, %v2419_v37 }
 0x429   :  { %v3464_v20 = vcombine.low %v3455_v11, %v3462_v25  ;;  %v3471_v15 = vrot.slane %v3463_v54, %v11154_v21  ;;  %v2435_v23 = vrot.slane %v2419_v37, %v11154_v21  ;;  %v2442_v33 = vrot.slane %v2420_v3, %v11154_v21  ;;  %10063 = vmatpush3.bf16.msra.mxu0 %v10321_v48  ;;  %v10327_v11 = vld [vmem:[%s12372_s4 + $0x238] sm:$0xff]  }
 0x42a   :  { %v2449_v61 = vrot.slane %v2421_v6, %v11154_v21  ;;  %v2450_v53 = vcombine.high %v2428_v60, %v2428_v60  ;;  %v2453_v56 = vcombine.high %v2157_v0, %v2157_v0  ;;  %v2460_v39 = vrot.slane %v2157_v0, %v11154_v21  ;;  %10064 = vmatprep.subr.bf16.mxu0 %v10323_v8 }
 0x42b   :  { %9915 = vmatpush3.bf16.msra.mxu1 %v10304_v41  ;;  %v3478_v63 = vrot.slane %v3464_v20, %v11154_v21  ;;  %v2451_v16 = vcombine.high %v2435_v23, %v2435_v23  ;;  %v2452_v19 = vcombine.high %v2442_v33, %v2442_v33  ;;  %v2697_v62 = vcombine.low %v2387_v52, %v2401_v58  ;;  %v3746_v41 = vld [vmem:[#allocation2 + $0x12] sm:$0x7f] }
 0x42c   :  { %v2467_v5 = vrot.slane %v2453_v56, %v11154_v21  ;;  %v2468_v14 = vcombine.high %v2460_v39, %v2460_v39  ;;  %v2476_v22 = vrot.slane %v2460_v39, %v11154_v21  ;;  %v2698_v9 = vcombine.low %v2403_v47, %v2428_v60  ;;  %9916 = vmatprep.subr.bf16.mxu1 %v10312_v57 }
 0x42d   :  { %v3479_v27 = vcombine.low %v3471_v15, %v3478_v63  ;;  %v2699_v12 = vcombine.low %v2442_v33, %v2450_v53  ;;  %v2700_v59 = vcombine.low %v2452_v19, %v2435_v23  ;;  %v2707_v30 = vrot.slane %v2697_v62, %v11154_v21  ;;  %10065 = vmatpush3.bf16.msra.mxu0 %v10323_v8  ;;  %v10326_v62 = vld [vmem:[%s12372_s4 + $0xb8] sm:$0xff]  }
 0x42e   :  { %v2469_v42 = vcombine.high %v2467_v5, %v2467_v5  ;;  %v2483_v38 = vrot.slane %v2467_v5, %v11154_v21  ;;  %v2490_v13 = vrot.slane %v2468_v14, %v11154_v21  ;;  %v2714_v26 = vrot.slane %v2698_v9, %v11154_v21  ;;  %10066 = vmatprep.subr.bf16.mxu0 %v10325_v4 }
 0x42f   :  { %v3503_v36 = vpack.c.bf16 %v3479_v27, %v3430_v10  ;;  %v2721_v31 = vrot.slane %v2699_v12, %v11154_v21  ;;  %v2728_v48 = vrot.slane %v2700_v59, %v11154_v21  ;;  %v2746_v45 = vcombine.low %v2449_v61, %v2451_v16  ;;  %9917 = vmatpush3.bf16.msra.mxu1 %v10312_v57  ;;  %v10324_v10 = vld [vmem:[%s12372_s4 + $0xb0] sm:$0xff]  }
 0x430   :  { %v2497_v32 = vrot.slane %v2469_v42, %v11154_v21  ;;  %v2729_v44 = vcombine.low %v2707_v30, %v2714_v26  ;;  %v2747_v35 = vcombine.low %v2476_v22, %v2490_v13  ;;  %v9521_v40 = vcombine.high %v2476_v22, %v2490_v13  ;;  %9918 = vmatprep.subr.bf16.mxu1 %v10320_v2 }
 0x431   :  { %9882 = vmatprep.mubr.bf16.mxu0 %v3503_v36  ;;  %v2730_v46 = vcombine.low %v2721_v31, %v2728_v48  ;;  %v2756_v28 = vrot.slane %v2746_v45, %v11154_v21  ;;  %v3184_v49 = vcombine.high %v11448_v51, %v11448_v51  ;;  %v2499_v43 = vcombine.high %v2483_v38, %v2483_v38 }
 0x432   :  { %v2737_v17 = vrot.slane %v2729_v44, %v11154_v21  ;;  %v2749_v1 = vcombine.low %v2483_v38, %v2497_v32  ;;  %v2763_v29 = vrot.slane %v2747_v35, %v11154_v21  ;;  %v2770_v52 = vrot.slane %v9521_v40, %v11154_v21  ;;  %10067 = vmatpush3.bf16.msra.mxu0 %v10325_v4  ;;  %v11560_v40 = vld [vmem:[%s12372_s4 + $0xc0] sm:$0xff]  }
 0x433   :  { %v2744_v37 = vrot.slane %v2730_v46, %v11154_v21  ;;  %v3486_v8 = vrot.slane %v3184_v49, %v11154_v21  ;;  %v2801_v51 = vrot.slane %v2499_v43, %v11154_v21  ;;  %v3807_v25 = vcombine.high %v3746_v41, %v3746_v41  ;;  %9919 = vmatpush3.bf16.msra.mxu1 %v10320_v2  ;;  %v8570_v2 = vld [vmem:[#allocation2 + $0x22] sm:$0x7f] }
 0x434   :  { %v2777_v54 = vrot.slane %v2749_v1, %v11154_v21  ;;  %v2778_v0 = vcombine.low %v2756_v28, %v2763_v29  ;;  %v3814_v3 = vrot.slane %v3746_v41, %v11154_v21  ;;  %v3855_v60 = vcombine.high %v3747_v50, %v3747_v50  ;;  %9920 = vmatprep.subr.bf16.mxu1 %v10322_v55 }
 0x435   :  { %v2745_v58 = vcombine.low %v2737_v17, %v2744_v37  ;;  %v3493_v47 = vrot.slane %v3486_v8, %v11154_v21  ;;  %v2808_v6 = vrot.slane %v2801_v51, %v11154_v21  ;;  %v3821_v57 = vrot.slane %v3807_v25, %v11154_v21  ;;  %10068 = vmatprep.subr.bf16.mxu0 %v10327_v11  ;;  %v8572_v37 = vld [vmem:[#allocation2 + $0x42] sm:$0x7f] }
 0x436   :  { %v2779_v20 = vcombine.low %v2770_v52, %v2777_v54  ;;  %v2786_v15 = vrot.slane %v2778_v0, %v11154_v21  ;;  %v3822_v23 = vcombine.high %v3814_v3, %v3814_v3  ;;  %v3830_v33 = vrot.slane %v3814_v3, %v11154_v21  ;;  %10069 = vmatpush3.bf16.msra.mxu0 %v10327_v11 }
 0x437   :  { %v3504_v61 = vpack.c.bf16 %v3493_v47, %v3493_v47  ;;  %v2819_v53 = vpack.c.bf16 %v2808_v6, %v2808_v6  ;;  %v3823_v56 = vcombine.high %v3821_v57, %v3821_v57  ;;  %v3837_v39 = vrot.slane %v3821_v57, %v11154_v21  ;;  %9921 = vmatpush3.bf16.msra.mxu1 %v10322_v55 }
 0x438   :  { %v2793_v4 = vrot.slane %v2779_v20, %v11154_v21  ;;  %v3844_v63 = vrot.slane %v3822_v23, %v11154_v21  ;;  %v3852_v16 = vcombine.high %v3830_v33, %v3830_v33  ;;  %v3862_v19 = vrot.slane %v3747_v50, %v11154_v21  ;;  %9922 = vmatprep.subr.bf16.mxu1 %v10324_v10 }
 0x439   :  { %9883 = vmatmul.mubr.bf16.gmra.mrb[100].mxu0 %v3504_v61  ;;  %v3851_v5 = vrot.slane %v3823_v56, %v11154_v21  ;;  %v3853_v14 = vcombine.high %v3837_v39, %v3837_v39  ;;  %v11539_v22 = vrot.slane %v3855_v60, %v11154_v21  ;;  %v4098_v9 = vcombine.low %v3805_v34, %v3830_v33  ;;  %v8571_v34 = vld [vmem:[#allocation2 + $0x32] sm:$0x7f] }
 0x43a   :  { %v2794_v27 = vcombine.low %v2786_v15, %v2793_v4  ;;  %v3854_v12 = vcombine.high %v3844_v63, %v3844_v63  ;;  %v3870_v59 = vcombine.high %v3862_v19, %v3862_v19  ;;  %v11545_v30 = vrot.slane %v3862_v19, %v11154_v21 }
 0x43b   :  { %v3871_v42 = vcombine.high %v11539_v22, %v11539_v22  ;;  %v4126_v38 = vrot.slane %v4098_v9, %v11154_v21  ;;  %v4144_v13 = vcombine.low %v3844_v63, %v3852_v16  ;;  %v4146_v26 = vcombine.low %v3851_v5, %v3853_v14  ;;  %9923 = vmatpush3.bf16.msra.mxu1 %v10324_v10 }
 0x43c   :  { %v2818_v36 = vpack.c.bf16 %v2794_v27, %v2745_v58  ;;  %v11551_v31 = vrot.slane %v3870_v59, %v11154_v21  ;;  %v4145_v7 = vcombine.low %v3854_v12, %v3837_v39  ;;  %v8584_v48 = vcombine.high %v8570_v2, %v8570_v2  ;;  %9924 = vmatprep.subr.bf16.mxu1 %v10326_v62 }
 0x43d   :  { %v4128_v45 = vcombine.low %v11214_v24, %v4126_v38  ;;  %v4154_v32 = vrot.slane %v4144_v13, %v11154_v21  ;;  %v4168_v44 = vrot.slane %v4146_v26, %v11154_v21  ;;  %v8591_v35 = vrot.slane %v8570_v2, %v11154_v21 }
 0x43e   :  { %9906 = vmatprep.mubr.bf16.mxu1 %v2818_v36  ;;  %v4147_v41 = vcombine.low %v11545_v30, %v11551_v31  ;;  %v4161_v55 = vrot.slane %v4145_v7, %v11154_v21  ;;  %v9543_v24 = vcombine.high %v11545_v30, %v11551_v31  ;;  %v8598_v46 = vrot.slane %v8584_v48, %v11154_v21  ;;  %v3748_v48 = vld [vmem:[#allocation2 + $0x32] sm:$0x7f] }
 0x43f   :  { %9907 = vmatmul.mubr.bf16.gmra.mrb[4].mxu1 %v2819_v53  ;;  %v4142_v28 = vrot.slane %v4128_v45, %v11154_v21  ;;  %v8599_v49 = vcombine.high %v8591_v35, %v8591_v35  ;;  %v8607_v43 = vrot.slane %v8591_v35, %v11154_v21  ;;  %v8632_v50 = vcombine.high %v8571_v34, %v8571_v34  ;;  %v11605_v35 = vld [vmem:[#allocation2 + $0x42] sm:$0x7f] }
 0x440   :  { %v4175_v11 = vrot.slane %v4147_v41, %v11154_v21  ;;  %v4176_v17 = vcombine.low %v4154_v32, %v4161_v55  ;;  %v8600_v1 = vcombine.high %v8598_v46, %v8598_v46  ;;  %v8614_v29 = vrot.slane %v8598_v46, %v11154_v21  ;;  %9925 = vmatpush3.bf16.msra.mxu1 %v10326_v62 }
 0x441   :  { %v4143_v52 = vcombine.low %v11220_v18, %v4142_v28  ;;  %v8621_v8 = vrot.slane %v8599_v49, %v11154_v21  ;;  %v8639_v51 = vrot.slane %v8571_v34, %v11154_v21  ;;  %v8646_v25 = vrot.slane %v8632_v50, %v11154_v21  ;;  %9934 = vmatprep.subr.bf16.mxu1 %v11560_v40 }
 0x442   :  { %v4177_v54 = vcombine.low %v4168_v44, %v4175_v11  ;;  %v4184_v0 = vrot.slane %v4176_v17, %v11154_v21  ;;  %v8628_v3 = vrot.slane %v8600_v1, %v11154_v21  ;;  %v8630_v60 = vcombine.high %v8614_v29, %v8614_v29 }
 0x443   :  { %v8647_v10 = vcombine.high %v8639_v51, %v8639_v51  ;;  %v8648_v58 = vcombine.high %v8646_v25, %v8646_v25  ;;  %v8655_v47 = vrot.slane %v8639_v51, %v11154_v21  ;;  %v8662_v18 = vrot.slane %v8646_v25, %v11154_v21 }
 0x444   :  { %v4191_v6 = vrot.slane %v4177_v54, %v11154_v21  ;;  %v8680_v57 = vcombine.high %v8572_v37, %v8572_v37  ;;  %v8687_v20 = vrot.slane %v8572_v37, %v11154_v21  ;;  %v8920_v15 = vcombine.low %v8607_v43, %v8621_v8 }
 0x445   :  { %v8669_v23 = vrot.slane %v8647_v10, %v11154_v21  ;;  %v8676_v33 = vrot.slane %v8648_v58, %v11154_v21  ;;  %v8677_v61 = vcombine.high %v8655_v47, %v8655_v47  ;;  %v8678_v53 = vcombine.high %v8662_v18, %v8662_v18 }
 0x446   :  { %v4192_v56 = vcombine.low %v4184_v0, %v4191_v6  ;;  %v11586_v39 = vrot.slane %v8680_v57, %v11154_v21  ;;  %v8695_v4 = vcombine.high %v8687_v20, %v8687_v20  ;;  %v11589_v63 = vrot.slane %v8687_v20, %v11154_v21 }
 0x447   :  { %v8679_v16 = vcombine.high %v8669_v23, %v8669_v23  ;;  %v9614_v19 = vcombine.high %v8607_v43, %v8621_v8  ;;  %v8922_v62 = vcombine.low %v8614_v29, %v8628_v3  ;;  %v8923_v5 = vcombine.low %v8630_v60, %v8655_v47 }
 0x448   :  { %v4410_v14 = vpack.c.bf16 %v4192_v56, %v4143_v52  ;;  %v8696_v9 = vcombine.high %v11586_v39, %v11586_v39  ;;  %v11594_v2 = vrot.slane %v8695_v4, %v11154_v21  ;;  %v8930_v27 = vrot.slane %v8920_v15, %v11154_v21 }
 0x449   :  { %v8937_v12 = vrot.slane %v9614_v19, %v11154_v21  ;;  %v8944_v59 = vrot.slane %v8922_v62, %v11154_v21  ;;  %v8951_v38 = vrot.slane %v8923_v5, %v11154_v21  ;;  %v8969_v13 = vcombine.low %v8669_v23, %v8677_v61  ;;  %v8573_v62 = vld [vmem:[#allocation2 + $0x52] sm:$0x7f] }
 0x44a   :  { %9926 = vmatprep.mubr.bf16.mxu1 %v4410_v14  ;;  %v8970_v26 = vcombine.low %v8679_v16, %v8662_v18  ;;  %v8971_v36 = vcombine.low %v8676_v33, %v8678_v53  ;;  %v8972_v7 = vcombine.low %v11589_v63, %v11594_v2  ;;  %v9615_v34 = vcombine.high %v11589_v63, %v11594_v2 }
 0x44b   :  { %v8952_v45 = vcombine.low %v8930_v27, %v8937_v12  ;;  %v8953_v32 = vcombine.low %v8944_v59, %v8951_v38  ;;  %v8979_v44 = vrot.slane %v8969_v13, %v11154_v21  ;;  %v3885_v41 = vrot.slane %v11539_v22, %v11154_v21  ;;  %v10453_v27 = vld.sshfl [vmem:[#allocation2 + $0x62] sm:$0x7f pattern:$0x75316420] }
 0x44c   :  { %v8986_v55 = vrot.slane %v8970_v26, %v11154_v21  ;;  %v8993_v46 = vrot.slane %v8971_v36, %v11154_v21  ;;  %v9000_v28 = vrot.slane %v8972_v7, %v11154_v21  ;;  %v3899_v49 = vrot.slane %v3871_v42, %v11154_v21 }
 0x44d   :  { %v8960_v43 = vrot.slane %v8952_v45, %v11154_v21  ;;  %v8967_v50 = vrot.slane %v8953_v32, %v11154_v21  ;;  %v3901_v11 = vcombine.high %v3885_v41, %v3885_v41  ;;  %v3903_v17 = vcombine.high %v3748_v48, %v3748_v48 }
 0x44e   :  { %v9001_v1 = vcombine.low %v8979_v44, %v8986_v55  ;;  %v9002_v29 = vcombine.low %v8993_v46, %v9000_v28  ;;  %v3910_v52 = vrot.slane %v3748_v48, %v11154_v21  ;;  %v3958_v37 = vrot.slane %v11605_v35, %v11154_v21 }
 0x44f   :  { %v8968_v8 = vcombine.low %v8960_v43, %v8967_v50  ;;  %v3917_v51 = vrot.slane %v3903_v17, %v11154_v21  ;;  %v4194_v25 = vcombine.low %v3885_v41, %v3899_v49  ;;  %v4203_v22 = vrot.slane %v9543_v24, %v11154_v21 }
 0x450   :  { %v9009_v42 = vrot.slane %v9001_v1, %v11154_v21  ;;  %v9016_v54 = vrot.slane %v9002_v29, %v11154_v21  ;;  %v3918_v0 = vcombine.high %v3910_v52, %v3910_v52  ;;  %v3926_v3 = vrot.slane %v3910_v52, %v11154_v21 }
 0x451   :  { %v3919_v60 = vcombine.high %v3917_v51, %v3917_v51  ;;  %v3933_v10 = vrot.slane %v3917_v51, %v11154_v21  ;;  %v3966_v58 = vcombine.high %v3958_v37, %v3958_v37  ;;  %v3974_v47 = vrot.slane %v3958_v37, %v11154_v21 }
 0x452   :  { %v9017_v18 = vcombine.low %v9009_v42, %v9016_v54  ;;  %v3940_v6 = vrot.slane %v3918_v0, %v11154_v21  ;;  %v3948_v57 = vcombine.high %v3926_v3, %v3926_v3  ;;  %v4195_v20 = vcombine.low %v3901_v11, %v3926_v3 }
 0x453   :  { %v3947_v30 = vrot.slane %v3919_v60, %v11154_v21  ;;  %v3949_v31 = vcombine.high %v3933_v10, %v3933_v10  ;;  %v3988_v24 = vrot.slane %v3966_v58, %v11154_v21  ;;  %v4210_v15 = vrot.slane %v4194_v25, %v11154_v21  ;;  %v3750_v60 = vld [vmem:[#allocation2 + $0x52] sm:$0x7f] }
 0x454   :  { %v9235_v23 = vpack.c.bf16 %v9017_v18, %v8968_v8  ;;  %v3950_v33 = vcombine.high %v3940_v6, %v3940_v6  ;;  %v4196_v61 = vcombine.low %v3940_v6, %v3948_v57  ;;  %v4217_v53 = vrot.slane %v4195_v20, %v11154_v21  ;;  %v10334_v6 = vld [vmem:[%s12372_s4 + $0xc8] sm:$0xff]  }
 0x455   :  { %v4225_v56 = vcombine.low %v4203_v22, %v4210_v15  ;;  %v4243_v4 = vcombine.low %v3947_v30, %v3949_v31  ;;  %v4244_v16 = vcombine.low %v3974_v47, %v3988_v24  ;;  %v9544_v19 = vcombine.high %v3974_v47, %v3988_v24  ;;  %v3751_v24 = vld [vmem:[#allocation2 + $0x62] sm:$0x7f] }
 0x456   :  { %10070 = vmatprep.mubr.bf16.mxu0 %v9235_v23  ;;  %v4224_v5 = vrot.slane %v4196_v61, %v11154_v21  ;;  %v4242_v14 = vcombine.low %v3950_v33, %v3933_v10  ;;  %v8710_v12 = vrot.slane %v11586_v39, %v11154_v21  ;;  %v8724_v59 = vrot.slane %v8696_v9, %v11154_v21 }
 0x457   :  { %v4233_v38 = vrot.slane %v4225_v56, %v11154_v21  ;;  %v4259_v13 = vrot.slane %v4243_v4, %v11154_v21  ;;  %v4266_v26 = vrot.slane %v4244_v16, %v11154_v21  ;;  %v4273_v36 = vrot.slane %v9544_v19, %v11154_v21 }
 0x458   :  { %v4226_v7 = vcombine.low %v4217_v53, %v4224_v5  ;;  %v4252_v48 = vrot.slane %v4242_v14, %v11154_v21  ;;  %v8726_v45 = vcombine.high %v8710_v12, %v8710_v12  ;;  %v8728_v32 = vcombine.high %v8573_v62, %v8573_v62 }
 0x459   :  { %v4275_v44 = vcombine.low %v4266_v26, %v4273_v36  ;;  %v8735_v41 = vrot.slane %v8573_v62, %v11154_v21  ;;  %v9019_v55 = vcombine.low %v8710_v12, %v8724_v59  ;;  %v9028_v28 = vrot.slane %v9615_v34, %v11154_v21 }
 0x45a   :  { %v4240_v39 = vrot.slane %v4226_v7, %v11154_v21  ;;  %v4274_v9 = vcombine.low %v4252_v48, %v4259_v13  ;;  %v8742_v46 = vrot.slane %v8728_v32, %v11154_v21  ;;  %v8791_v11 = vcombine.high %v10453_v27, %v10453_v27 }
 0x45b   :  { %v4289_v49 = vrot.slane %v4275_v44, %v11154_v21  ;;  %v8743_v43 = vcombine.high %v8735_v41, %v8735_v41  ;;  %v8751_v50 = vrot.slane %v8735_v41, %v11154_v21  ;;  %v8799_v51 = vrot.slane %v10453_v27, %v11154_v21 }
 0x45c   :  { %v4241_v17 = vcombine.low %v4233_v38, %v4240_v39  ;;  %v4282_v1 = vrot.slane %v4274_v9, %v11154_v21  ;;  %v8744_v29 = vcombine.high %v8742_v46, %v8742_v46  ;;  %v8758_v52 = vrot.slane %v8742_v46, %v11154_v21  ;;  %v10339_v9 = vld [vmem:[%s12372_s4 + $0xd8] sm:$0xff]  }
 0x45d   :  { %v8765_v37 = vrot.slane %v8743_v43, %v11154_v21  ;;  %v8773_v8 = vcombine.high %v8751_v50, %v8751_v50  ;;  %v8813_v63 = vrot.slane %v8791_v11, %v11154_v21  ;;  %v9020_v22 = vcombine.low %v8726_v45, %v8751_v50 }
 0x45e   :  { %v4290_v2 = vcombine.low %v4282_v1, %v4289_v49  ;;  %v8772_v34 = vrot.slane %v8744_v29, %v11154_v21  ;;  %v8774_v25 = vcombine.high %v8758_v52, %v8758_v52  ;;  %v9035_v0 = vrot.slane %v9019_v55, %v11154_v21 }
 0x45f   :  { %v8775_v42 = vcombine.high %v8765_v37, %v8765_v37  ;;  %v9021_v54 = vcombine.low %v8765_v37, %v8773_v8  ;;  %v9069_v3 = vcombine.low %v8799_v51, %v8813_v63  ;;  %v9042_v58 = vrot.slane %v9020_v22, %v11154_v21  ;;  %v10340_v22 = vld [vmem:[%s12372_s4 + $0xe0] sm:$0xff]  }
 0x460   :  { %v4411_v10 = vpack.c.bf16 %v4290_v2, %v4241_v17  ;;  %v9068_v47 = vcombine.low %v8772_v34, %v8774_v25  ;;  %v9616_v18 = vcombine.high %v8799_v51, %v8813_v63  ;;  %v9050_v20 = vcombine.low %v9028_v28, %v9035_v0  ;;  %v4549_v51 = vld [vmem:[#allocation2 + $0x10] sm:$0x7f] }
 0x461   :  { %v9049_v57 = vrot.slane %v9021_v54, %v11154_v21  ;;  %v9067_v30 = vcombine.low %v8775_v42, %v8758_v52  ;;  %v9091_v31 = vrot.slane %v9069_v3, %v11154_v21  ;;  %v3951_v33 = vcombine.high %v11605_v35, %v11605_v35  ;;  %v10335_v35 = vld [vmem:[%s12372_s4 + $0xd0] sm:$0xff]  }
 0x462   :  { %9927 = vmatmul.mubr.bf16.vlgmr.msra.gmra.mrb[0].mxu1 %v4411_v10  ;;  %v9084_v15 = vrot.slane %v9068_v47, %v11154_v21  ;;  %v9098_v23 = vrot.slane %v9616_v18, %v11154_v21  ;;  %v3999_v61 = vcombine.high %v3750_v60, %v3750_v60  ;;  %v9058_v56 = vrot.slane %v9050_v20, %v11154_v21 }
 0x463   :  { %v9051_v53 = vcombine.low %v9042_v58, %v9049_v57  ;;  %v9077_v4 = vrot.slane %v9067_v30, %v11154_v21  ;;  %v4006_v16 = vrot.slane %v3750_v60, %v11154_v21  ;;  %9935 = vmatpush3.bf16.msra.mxu1 %v11560_v40  ;;  %v3965_v62 = vrot.slane %v3951_v33, %v11154_v21 }
 0x464   :  { %v9100_v19 = vcombine.low %v9091_v31, %v9098_v23  ;;  %v4013_v5 = vrot.slane %v3999_v61, %v11154_v21  ;;  %v4047_v14 = vcombine.high %v3751_v24, %v3751_v24  ;;  %9936 = vmatprep.subr.bf16.mxu1 %v10334_v6  ;;  %v4054_v43 = vrot.slane %v3751_v24, %v11154_v21  ;;  %v10341_v23 = vld [vmem:[%s12372_s4 + $0xe8] sm:$0xff]  }
 0x465   :  { %v9065_v27 = vrot.slane %v9051_v53, %v11154_v21  ;;  %v9099_v12 = vcombine.low %v9077_v4, %v9084_v15  ;;  %v4014_v59 = vcombine.high %v4006_v16, %v4006_v16  ;;  %v4022_v38 = vrot.slane %v4006_v16, %v11154_v21 }
 0x466   :  { %v9114_v13 = vrot.slane %v9100_v19, %v11154_v21  ;;  %v3967_v40 = vcombine.high %v3965_v62, %v3965_v62  ;;  %v3981_v26 = vrot.slane %v3965_v62, %v11154_v21  ;;  %v4015_v36 = vcombine.high %v4013_v5, %v4013_v5 }
 0x467   :  { %v9066_v7 = vcombine.low %v9058_v56, %v9065_v27  ;;  %v9107_v48 = vrot.slane %v9099_v12, %v11154_v21  ;;  %v4029_v45 = vrot.slane %v4013_v5, %v11154_v21  ;;  %v4036_v32 = vrot.slane %v4014_v59, %v11154_v21  ;;  %9937 = vmatpush3.bf16.msra.mxu1 %v10334_v6  ;;  %v4550_v56 = vld [vmem:[#allocation2 + $0x20] sm:$0x7f]  ;;  %v4551_v27 = vld [vmem:[#allocation2 + $0x30] sm:$0x7f] }
 0x468   :  { %v3995_v44 = vrot.slane %v3967_v40, %v11154_v21  ;;  %v3997_v41 = vcombine.high %v3981_v26, %v3981_v26  ;;  %v4043_v55 = vrot.slane %v4015_v36, %v11154_v21  ;;  %v4044_v39 = vcombine.high %v4022_v38, %v4022_v38  ;;  %9938 = vmatprep.subr.bf16.mxu1 %v10335_v35  ;;  %v10342_v36 = vld [vmem:[%s12372_s4 + $0xf0] sm:$0xff]  }
 0x469   :  { %v9115_v46 = vcombine.low %v9107_v48, %v9114_v13  ;;  %v4045_v28 = vcombine.high %v4029_v45, %v4029_v45  ;;  %v4046_v49 = vcombine.high %v4036_v32, %v4036_v32  ;;  %v4061_v50 = vrot.slane %v4047_v14, %v11154_v21 }
 0x46a   :  { %v4291_v11 = vcombine.low %v3981_v26, %v3995_v44  ;;  %v4292_v17 = vcombine.low %v3997_v41, %v4022_v38  ;;  %v4293_v1 = vcombine.low %v4036_v32, %v4044_v39  ;;  %v4062_v52 = vcombine.high %v4054_v43, %v4054_v43 }
 0x46b   :  { %v9236_v29 = vpack.c.bf16 %v9115_v46, %v9066_v7  ;;  %v4070_v37 = vrot.slane %v4054_v43, %v11154_v21  ;;  %v4294_v8 = vcombine.low %v4046_v49, %v4029_v45  ;;  %9939 = vmatpush3.bf16.msra.mxu1 %v10335_v35  ;;  %v4063_v63 = vcombine.high %v4061_v50, %v4061_v50 }
 0x46c   :  { %v4077_v2 = vrot.slane %v4061_v50, %v11154_v21  ;;  %v4301_v34 = vrot.slane %v4291_v11, %v11154_v21  ;;  %v4308_v25 = vrot.slane %v4292_v17, %v11154_v21  ;;  %9940 = vmatprep.subr.bf16.mxu1 %v10339_v9  ;;  %v4084_v42 = vrot.slane %v4062_v52, %v11154_v21 }
 0x46d   :  { %10071 = vmatmul.mubr.bf16.vlgmr.msra.gmra.mrb[104].mxu0 %v9236_v29  ;;  %v4315_v54 = vrot.slane %v4293_v1, %v11154_v21  ;;  %v4322_v0 = vrot.slane %v4294_v8, %v11154_v21  ;;  %v4340_v3 = vcombine.low %v4043_v55, %v4045_v28  ;;  %v4091_v60 = vrot.slane %v4063_v63, %v11154_v21 }
 0x46e   :  { %v4323_v10 = vcombine.low %v4301_v34, %v4308_v25  ;;  %v4093_v58 = vcombine.high %v4077_v2, %v4077_v2  ;;  %v4563_v47 = vcombine.high %v4549_v51, %v4549_v51  ;;  %v4341_v6 = vcombine.low %v4070_v37, %v4084_v42  ;;  %v10343_v34 = vld [vmem:[%s12372_s4 + $0xf8] sm:$0xff]  }
 0x46f   :  { %v4324_v18 = vcombine.low %v4315_v54, %v4322_v0  ;;  %v9545_v57 = vcombine.high %v4070_v37, %v4084_v42  ;;  %v4350_v20 = vrot.slane %v4340_v3, %v11154_v21  ;;  %9941 = vmatpush3.bf16.msra.mxu1 %v10339_v9  ;;  %v4343_v31 = vcombine.low %v4077_v2, %v4091_v60 }
 0x470   :  { %v4331_v30 = vrot.slane %v4323_v10, %v11154_v21  ;;  %v4395_v24 = vrot.slane %v4093_v58, %v11154_v21  ;;  %v4570_v15 = vrot.slane %v4549_v51, %v11154_v21  ;;  %9942 = vmatprep.subr.bf16.mxu1 %v10340_v22  ;;  %v4357_v61 = vrot.slane %v4341_v6, %v11154_v21  ;;  %v11750_v58 = vld [vmem:[%s12372_s4 + $0x100] sm:$0xff]  }
 0x471   :  { %v4338_v33 = vrot.slane %v4324_v18, %v11154_v21  ;;  %v4364_v53 = vrot.slane %v9545_v57, %v11154_v21  ;;  %v4577_v4 = vrot.slane %v4563_v47, %v11154_v21  ;;  %v4371_v16 = vrot.slane %v4343_v31, %v11154_v21 }
 0x472   :  { %v4402_v19 = vrot.slane %v4395_v24, %v11154_v21  ;;  %v4578_v62 = vcombine.high %v4570_v15, %v4570_v15  ;;  %v4586_v5 = vrot.slane %v4570_v15, %v11154_v21  ;;  %v4372_v35 = vcombine.low %v4350_v20, %v4357_v61  ;;  %v4552_v20 = vld [vmem:[#allocation2 + $0x40] sm:$0x7f] }
 0x473   :  { %v4339_v14 = vcombine.low %v4331_v30, %v4338_v33  ;;  %v4579_v12 = vcombine.high %v4577_v4, %v4577_v4  ;;  %v4593_v59 = vrot.slane %v4577_v4, %v11154_v21  ;;  %9943 = vmatpush3.bf16.msra.mxu1 %v10340_v22  ;;  %v4373_v38 = vcombine.low %v4364_v53, %v4371_v16  ;;  %v4553_v53 = vld [vmem:[#allocation2 + $0x50] sm:$0x7f] }
 0x474   :  { %v4413_v13 = vpack.c.bf16 %v4402_v19, %v4402_v19  ;;  %v4600_v40 = vrot.slane %v4578_v62, %v11154_v21  ;;  %v4611_v26 = vcombine.high %v4550_v56, %v4550_v56  ;;  %9944 = vmatprep.subr.bf16.mxu1 %v10341_v23  ;;  %v4380_v7 = vrot.slane %v4372_v35, %v11154_v21 }
 0x475   :  { %v4607_v48 = vrot.slane %v4579_v12, %v11154_v21  ;;  %v4609_v45 = vcombine.high %v4593_v59, %v4593_v59  ;;  %v4618_v32 = vrot.slane %v4550_v56, %v11154_v21  ;;  %v4387_v44 = vrot.slane %v4373_v38, %v11154_v21 }
 0x476   :  { %v4625_v41 = vrot.slane %v4611_v26, %v11154_v21  ;;  %v4659_v55 = vcombine.high %v4551_v27, %v4551_v27  ;;  %v4666_v39 = vrot.slane %v4551_v27, %v11154_v21  ;;  %v4899_v28 = vcombine.low %v4586_v5, %v4600_v40 }
 0x477   :  { %v4626_v9 = vcombine.high %v4618_v32, %v4618_v32  ;;  %v4634_v46 = vrot.slane %v4618_v32, %v11154_v21  ;;  %v9554_v49 = vcombine.high %v4586_v5, %v4600_v40  ;;  %9945 = vmatpush3.bf16.msra.mxu1 %v10341_v23  ;;  %v4388_v43 = vcombine.low %v4380_v7, %v4387_v44 }
 0x478   :  { %v4627_v50 = vcombine.high %v4625_v41, %v4625_v41  ;;  %v4641_v11 = vrot.slane %v4625_v41, %v11154_v21  ;;  %v4673_v17 = vrot.slane %v4659_v55, %v11154_v21  ;;  %9946 = vmatprep.subr.bf16.mxu1 %v10342_v36  ;;  %v4674_v52 = vcombine.high %v4666_v39, %v4666_v39 }
 0x479   :  { %v4648_v1 = vrot.slane %v4626_v9, %v11154_v21  ;;  %v4656_v29 = vcombine.high %v4634_v46, %v4634_v46  ;;  %v11738_v37 = vrot.slane %v4666_v39, %v11154_v21  ;;  %v4412_v8 = vpack.c.bf16 %v4388_v43, %v4339_v14 }
 0x47a   :  { %v4655_v51 = vrot.slane %v4627_v50, %v11154_v21  ;;  %v4657_v63 = vcombine.high %v4641_v11, %v4641_v11  ;;  %v4675_v2 = vcombine.high %v4673_v17, %v4673_v17  ;;  %v4696_v22 = vrot.slane %v4674_v52, %v11154_v21 }
 0x47b   :  { %v4658_v25 = vcombine.high %v4648_v1, %v4648_v1  ;;  %v4901_v42 = vcombine.low %v4593_v59, %v4607_v48  ;;  %v4902_v54 = vcombine.low %v4609_v45, %v4634_v46  ;;  %9947 = vmatpush3.bf16.msra.mxu1 %v10342_v36  ;;  %9930 = vmatprep.mubr.bf16.mxu1 %v4412_v8 }
 0x47c   :  { %v4909_v0 = vrot.slane %v4899_v28, %v11154_v21  ;;  %v4916_v3 = vrot.slane %v9554_v49, %v11154_v21  ;;  %v4948_v60 = vcombine.low %v4648_v1, %v4656_v29  ;;  %v4950_v10 = vcombine.low %v4655_v51, %v4657_v63  ;;  %9931 = vmatmul.mubr.bf16.gmra.mrb[4].mxu1 %v4413_v13 }
 0x47d   :  { %v4923_v47 = vrot.slane %v4901_v42, %v11154_v21  ;;  %v4930_v18 = vrot.slane %v4902_v54, %v11154_v21  ;;  %v4949_v6 = vcombine.low %v4658_v25, %v4641_v11  ;;  %v4951_v57 = vcombine.low %v11738_v37, %v4696_v22  ;;  %9948 = vmatprep.subr.bf16.mxu1 %v10343_v34 }
 0x47e   :  { %v4931_v30 = vcombine.low %v4909_v0, %v4916_v3  ;;  %v4958_v31 = vrot.slane %v4948_v60, %v11154_v21  ;;  %v4972_v24 = vrot.slane %v4950_v10, %v11154_v21  ;;  %v9555_v15 = vcombine.high %v11738_v37, %v4696_v22  ;;  %v4555_v0 = vld [vmem:[#allocation2 + $0x70] sm:$0x7f] }
 0x47f   :  { %v4932_v23 = vcombine.low %v4923_v47, %v4930_v18  ;;  %v4965_v33 = vrot.slane %v4949_v6, %v11154_v21  ;;  %v4979_v61 = vrot.slane %v4951_v57, %v11154_v21  ;;  %9949 = vmatpush3.bf16.msra.mxu1 %v10343_v34  ;;  %v4689_v56 = vrot.slane %v4673_v17, %v11154_v21  ;;  %v4554_v34 = vld [vmem:[#allocation2 + $0x60] sm:$0x7f] }
 0x480   :  { %v4939_v4 = vrot.slane %v4931_v30, %v11154_v21  ;;  %v4703_v16 = vrot.slane %v4675_v2, %v11154_v21  ;;  %v4707_v19 = vcombine.high %v4552_v20, %v4552_v20  ;;  %v4714_v62 = vrot.slane %v4552_v20, %v11154_v21  ;;  %9958 = vmatprep.subr.bf16.mxu1 %v11750_v58 }
 0x481   :  { %v4946_v5 = vrot.slane %v4932_v23, %v11154_v21  ;;  %v4980_v14 = vcombine.low %v4958_v31, %v4965_v33  ;;  %v4981_v35 = vcombine.low %v4972_v24, %v4979_v61  ;;  %v4705_v27 = vcombine.high %v4689_v56, %v4689_v56 }
 0x482   :  { %v4721_v12 = vrot.slane %v4707_v19, %v11154_v21  ;;  %v4722_v59 = vcombine.high %v4714_v62, %v4714_v62  ;;  %v4730_v38 = vrot.slane %v4714_v62, %v11154_v21  ;;  %v4762_v13 = vrot.slane %v4553_v53, %v11154_v21 }
 0x483   :  { %v4947_v40 = vcombine.low %v4939_v4, %v4946_v5  ;;  %v4988_v26 = vrot.slane %v4980_v14, %v11154_v21  ;;  %v4995_v36 = vrot.slane %v4981_v35, %v11154_v21  ;;  %v4998_v7 = vcombine.low %v4689_v56, %v4703_v16 }
 0x484   :  { %v4723_v48 = vcombine.high %v4721_v12, %v4721_v12  ;;  %v4737_v45 = vrot.slane %v4721_v12, %v11154_v21  ;;  %v4744_v32 = vrot.slane %v4722_v59, %v11154_v21  ;;  %v4752_v44 = vcombine.high %v4730_v38, %v4730_v38 }
 0x485   :  { %v4996_v41 = vcombine.low %v4988_v26, %v4995_v36  ;;  %v4770_v55 = vcombine.high %v4762_v13, %v4762_v13  ;;  %v4778_v39 = vrot.slane %v4762_v13, %v11154_v21  ;;  %v4999_v9 = vcombine.low %v4705_v27, %v4730_v38 }
 0x486   :  { %v4751_v46 = vrot.slane %v4723_v48, %v11154_v21  ;;  %v4753_v28 = vcombine.high %v4737_v45, %v4737_v45  ;;  %v4754_v49 = vcombine.high %v4744_v32, %v4744_v32  ;;  %v5000_v43 = vcombine.low %v4744_v32, %v4752_v44 }
 0x487   :  { %v5214_v50 = vpack.c.bf16 %v4996_v41, %v4947_v40  ;;  %v4792_v11 = vrot.slane %v4770_v55, %v11154_v21  ;;  %v5007_v17 = vrot.slane %v9555_v15, %v11154_v21  ;;  %v5014_v1 = vrot.slane %v4998_v7, %v11154_v21  ;;  %v10349_v41 = vld [vmem:[%s12372_s4 + $0x108] sm:$0xff]  }
 0x488   :  { %v5021_v29 = vrot.slane %v4999_v9, %v11154_v21  ;;  %v5028_v52 = vrot.slane %v5000_v43, %v11154_v21  ;;  %v5046_v37 = vcombine.low %v4754_v49, %v4737_v45  ;;  %v5047_v8 = vcombine.low %v4751_v46, %v4753_v28 }
 0x489   :  { %9950 = vmatprep.mubr.bf16.mxu1 %v5214_v50  ;;  %v5029_v51 = vcombine.low %v5007_v17, %v5014_v1  ;;  %v5048_v63 = vcombine.low %v4778_v39, %v4792_v11  ;;  %v9556_v2 = vcombine.high %v4778_v39, %v4792_v11  ;;  %v4755_v25 = vcombine.high %v4553_v53, %v4553_v53  ;;  %v5353_v11 = vld [vmem:[#allocation2 + $0x11] sm:$0x7f] }
 0x48a   :  { %v5030_v22 = vcombine.low %v5021_v29, %v5028_v52  ;;  %v5056_v42 = vrot.slane %v5046_v37, %v11154_v21  ;;  %v5063_v54 = vrot.slane %v5047_v8, %v11154_v21  ;;  %v4803_v3 = vcombine.high %v4554_v34, %v4554_v34 }
 0x48b   :  { %v5037_v60 = vrot.slane %v5029_v51, %v11154_v21  ;;  %v5070_v10 = vrot.slane %v5048_v63, %v11154_v21  ;;  %v5077_v47 = vrot.slane %v9556_v2, %v11154_v21  ;;  %v4769_v18 = vrot.slane %v4755_v25, %v11154_v21  ;;  %v10350_v2 = vld [vmem:[%s12372_s4 + $0x110] sm:$0xff]  }
 0x48c   :  { %v5044_v6 = vrot.slane %v5030_v22, %v11154_v21  ;;  %v5078_v57 = vcombine.low %v5056_v42, %v5063_v54  ;;  %v4810_v20 = vrot.slane %v4554_v34, %v11154_v21  ;;  %v4817_v30 = vrot.slane %v4803_v3, %v11154_v21  ;;  %v5354_v34 = vld [vmem:[#allocation2 + $0x21] sm:$0x7f] }
 0x48d   :  { %v5079_v31 = vcombine.low %v5070_v10, %v5077_v47  ;;  %v4771_v24 = vcombine.high %v4769_v18, %v4769_v18  ;;  %v4785_v15 = vrot.slane %v4769_v18, %v11154_v21  ;;  %v4851_v23 = vcombine.high %v4555_v0, %v4555_v0 }
 0x48e   :  { %v5045_v33 = vcombine.low %v5037_v60, %v5044_v6  ;;  %v5086_v61 = vrot.slane %v5078_v57, %v11154_v21  ;;  %v4818_v53 = vcombine.high %v4810_v20, %v4810_v20  ;;  %v4819_v56 = vcombine.high %v4817_v30, %v4817_v30 }
 0x48f   :  { %v5093_v4 = vrot.slane %v5079_v31, %v11154_v21  ;;  %v4799_v16 = vrot.slane %v4771_v24, %v11154_v21  ;;  %v4801_v19 = vcombine.high %v4785_v15, %v4785_v15  ;;  %v4826_v62 = vrot.slane %v4810_v20, %v11154_v21 }
 0x490   :  { %v4833_v5 = vrot.slane %v4817_v30, %v11154_v21  ;;  %v4840_v14 = vrot.slane %v4818_v53, %v11154_v21  ;;  %v4847_v35 = vrot.slane %v4819_v56, %v11154_v21  ;;  %v4858_v27 = vrot.slane %v4555_v0, %v11154_v21  ;;  %v5355_v30 = vld [vmem:[#allocation2 + $0x31] sm:$0x7f] }
 0x491   :  { %v5094_v12 = vcombine.low %v5086_v61, %v5093_v4  ;;  %v4848_v59 = vcombine.high %v4826_v62, %v4826_v62  ;;  %v4865_v38 = vrot.slane %v4851_v23, %v11154_v21  ;;  %v5095_v13 = vcombine.low %v4785_v15, %v4799_v16  ;;  %v10354_v15 = vld [vmem:[%s12372_s4 + $0x118] sm:$0xff]  }
 0x492   :  { %v4849_v40 = vcombine.high %v4833_v5, %v4833_v5  ;;  %v4850_v26 = vcombine.high %v4840_v14, %v4840_v14  ;;  %v4866_v36 = vcombine.high %v4858_v27, %v4858_v27  ;;  %v4874_v7 = vrot.slane %v4858_v27, %v11154_v21 }
 0x493   :  { %v5215_v48 = vpack.c.bf16 %v5094_v12, %v5045_v33  ;;  %v4867_v45 = vcombine.high %v4865_v38, %v4865_v38  ;;  %v4881_v32 = vrot.slane %v4865_v38, %v11154_v21  ;;  %v5096_v44 = vcombine.low %v4801_v19, %v4826_v62 }
 0x494   :  { %v4888_v55 = vrot.slane %v4866_v36, %v11154_v21  ;;  %v5097_v39 = vcombine.low %v4840_v14, %v4848_v59  ;;  %v5098_v9 = vcombine.low %v4850_v26, %v4833_v5  ;;  %v5105_v46 = vrot.slane %v5095_v13, %v11154_v21 }
 0x495   :  { %9951 = vmatmul.mubr.bf16.vlgmr.msra.gmra.mrb[0].mxu1 %v5215_v48  ;;  %v4895_v28 = vrot.slane %v4867_v45, %v11154_v21  ;;  %v5112_v49 = vrot.slane %v5096_v44, %v11154_v21  ;;  %v5144_v43 = vcombine.low %v4847_v35, %v4849_v40  ;;  %v4897_v50 = vcombine.high %v4881_v32, %v4881_v32  ;;  %v10355_v44 = vld [vmem:[%s12372_s4 + $0x120] sm:$0xff]  }
 0x496   :  { %v5119_v17 = vrot.slane %v5097_v39, %v11154_v21  ;;  %v5126_v1 = vrot.slane %v5098_v9, %v11154_v21  ;;  %v5145_v29 = vcombine.low %v4874_v7, %v4888_v55  ;;  %v9557_v52 = vcombine.high %v4874_v7, %v4888_v55  ;;  %9959 = vmatpush3.bf16.msra.mxu1 %v11750_v58 }
 0x497   :  { %v5127_v37 = vcombine.low %v5105_v46, %v5112_v49  ;;  %v5147_v8 = vcombine.low %v4881_v32, %v4895_v28  ;;  %v5154_v51 = vrot.slane %v5144_v43, %v11154_v21  ;;  %9960 = vmatprep.subr.bf16.mxu1 %v10349_v41  ;;  %v5199_v63 = vrot.slane %v4897_v50, %v11154_v21  ;;  %v10356_v50 = vld [vmem:[%s12372_s4 + $0x128] sm:$0xff]  }
 0x498   :  { %v5128_v25 = vcombine.low %v5119_v17, %v5126_v1  ;;  %v5161_v22 = vrot.slane %v5145_v29, %v11154_v21  ;;  %v5168_v42 = vrot.slane %v9557_v52, %v11154_v21  ;;  %v5367_v54 = vcombine.high %v5353_v11, %v5353_v11 }
 0x499   :  { %v5135_v58 = vrot.slane %v5127_v37, %v11154_v21  ;;  %v5175_v0 = vrot.slane %v5147_v8, %v11154_v21  ;;  %v5206_v3 = vrot.slane %v5199_v63, %v11154_v21  ;;  %v5374_v60 = vrot.slane %v5353_v11, %v11154_v21  ;;  %v5356_v63 = vld [vmem:[#allocation2 + $0x41] sm:$0x7f] }
 0x49a   :  { %v5142_v10 = vrot.slane %v5128_v25, %v11154_v21  ;;  %v5176_v47 = vcombine.low %v5154_v51, %v5161_v22  ;;  %9961 = vmatpush3.bf16.msra.mxu1 %v10349_v41  ;;  %v5381_v18 = vrot.slane %v5367_v54, %v11154_v21  ;;  %v5415_v6 = vcombine.high %v5354_v34, %v5354_v34 }
 0x49b   :  { %v5177_v57 = vcombine.low %v5168_v42, %v5175_v0  ;;  %v5217_v20 = vpack.c.bf16 %v5206_v3, %v5206_v3  ;;  %9962 = vmatprep.subr.bf16.mxu1 %v10350_v2  ;;  %v5382_v31 = vcombine.high %v5374_v60, %v5374_v60  ;;  %v5390_v24 = vrot.slane %v5374_v60, %v11154_v21  ;;  %v10357_v0 = vld [vmem:[%s12372_s4 + $0x130] sm:$0xff]  }
 0x49c   :  { %v5143_v23 = vcombine.low %v5135_v58, %v5142_v10  ;;  %v5184_v33 = vrot.slane %v5176_v47, %v11154_v21  ;;  %v5383_v61 = vcombine.high %v5381_v18, %v5381_v18  ;;  %v5397_v53 = vrot.slane %v5381_v18, %v11154_v21  ;;  %v5357_v10 = vld [vmem:[#allocation2 + $0x51] sm:$0x7f] }
 0x49d   :  { %v5191_v56 = vrot.slane %v5177_v57, %v11154_v21  ;;  %v5404_v4 = vrot.slane %v5382_v31, %v11154_v21  ;;  %v5422_v16 = vrot.slane %v5354_v34, %v11154_v21  ;;  %v5429_v19 = vrot.slane %v5415_v6, %v11154_v21 }
 0x49e   :  { %9963 = vmatpush3.bf16.msra.mxu1 %v10350_v2  ;;  %v5411_v62 = vrot.slane %v5383_v61, %v11154_v21  ;;  %v5413_v5 = vcombine.high %v5397_v53, %v5397_v53  ;;  %v5463_v14 = vcombine.high %v5355_v30, %v5355_v30  ;;  %v5470_v35 = vrot.slane %v5355_v30, %v11154_v21 }
 0x49f   :  { %v5192_v27 = vcombine.low %v5184_v33, %v5191_v56  ;;  %v5430_v12 = vcombine.high %v5422_v16, %v5422_v16  ;;  %v5431_v59 = vcombine.high %v5429_v19, %v5429_v19  ;;  %v5438_v38 = vrot.slane %v5422_v16, %v11154_v21  ;;  %9964 = vmatprep.subr.bf16.mxu1 %v10354_v15  ;;  %v10358_v56 = vld [vmem:[%s12372_s4 + $0x138] sm:$0xff]  }
 0x4a0   :  { %v5445_v13 = vrot.slane %v5429_v19, %v11154_v21  ;;  %v5477_v40 = vrot.slane %v5463_v14, %v11154_v21  ;;  %v5478_v26 = vcombine.high %v5470_v35, %v5470_v35  ;;  %v11840_v36 = vrot.slane %v5470_v35, %v11154_v21 }
 0x4a1   :  { %v5216_v7 = vpack.c.bf16 %v5192_v27, %v5143_v23  ;;  %v5452_v48 = vrot.slane %v5430_v12, %v11154_v21  ;;  %v5459_v45 = vrot.slane %v5431_v59, %v11154_v21  ;;  %v5460_v32 = vcombine.high %v5438_v38, %v5438_v38 }
 0x4a2   :  { %v5461_v41 = vcombine.high %v5445_v13, %v5445_v13  ;;  %v5479_v55 = vcombine.high %v5477_v40, %v5477_v40  ;;  %v11848_v39 = vrot.slane %v5478_v26, %v11154_v21  ;;  %v5703_v9 = vcombine.low %v5390_v24, %v5404_v4  ;;  %9965 = vmatpush3.bf16.msra.mxu1 %v10354_v15 }
 0x4a3   :  { %9954 = vmatprep.mubr.bf16.mxu1 %v5216_v7  ;;  %v5462_v46 = vcombine.high %v5452_v48, %v5452_v48  ;;  %v9566_v28 = vcombine.high %v5390_v24, %v5404_v4  ;;  %v5705_v49 = vcombine.low %v5397_v53, %v5411_v62  ;;  %v5706_v43 = vcombine.low %v5413_v5, %v5438_v38 }
 0x4a4   :  { %9955 = vmatmul.mubr.bf16.gmra.mrb[4].mxu1 %v5217_v20  ;;  %v5713_v11 = vrot.slane %v5703_v9, %v11154_v21  ;;  %v5752_v17 = vcombine.low %v5452_v48, %v5460_v32  ;;  %v5754_v1 = vcombine.low %v5459_v45, %v5461_v41  ;;  %v5755_v29 = vcombine.low %v11840_v36, %v11848_v39  ;;  %v11891_v32 = vld [vmem:[%s12372_s4 + $0x140] sm:$0xff]  }
 0x4a5   :  { %v5720_v52 = vrot.slane %v9566_v28, %v11154_v21  ;;  %v5727_v37 = vrot.slane %v5705_v49, %v11154_v21  ;;  %v5734_v8 = vrot.slane %v5706_v43, %v11154_v21  ;;  %v5753_v51 = vcombine.low %v5462_v46, %v5445_v13  ;;  %9966 = vmatprep.subr.bf16.mxu1 %v10355_v44  ;;  %v5358_v49 = vld [vmem:[#allocation2 + $0x61] sm:$0x7f] }
 0x4a6   :  { %v5762_v2 = vrot.slane %v5752_v17, %v11154_v21  ;;  %v5776_v34 = vrot.slane %v5754_v1, %v11154_v21  ;;  %v5783_v25 = vrot.slane %v5755_v29, %v11154_v21  ;;  %v9567_v22 = vcombine.high %v11840_v36, %v11848_v39  ;;  %9967 = vmatpush3.bf16.msra.mxu1 %v10355_v44  ;;  %v5359_v1 = vld [vmem:[#allocation2 + $0x71] sm:$0x7f] }
 0x4a7   :  { %v5735_v42 = vcombine.low %v5713_v11, %v5720_v52  ;;  %v5736_v54 = vcombine.low %v5727_v37, %v5734_v8  ;;  %v5769_v58 = vrot.slane %v5753_v51, %v11154_v21  ;;  %9968 = vmatprep.subr.bf16.mxu1 %v10356_v50  ;;  %v5493_v3 = vrot.slane %v5477_v40, %v11154_v21 }
 0x4a8   :  { %v5785_v60 = vcombine.low %v5776_v34, %v5783_v25  ;;  %v5507_v47 = vrot.slane %v5479_v55, %v11154_v21  ;;  %v5511_v18 = vcombine.high %v5356_v63, %v5356_v63  ;;  %v5518_v6 = vrot.slane %v5356_v63, %v11154_v21 }
 0x4a9   :  { %v5743_v57 = vrot.slane %v5735_v42, %v11154_v21  ;;  %v5750_v20 = vrot.slane %v5736_v54, %v11154_v21  ;;  %v5784_v30 = vcombine.low %v5762_v2, %v5769_v58  ;;  %v5509_v31 = vcombine.high %v5493_v3, %v5493_v3 }
 0x4aa   :  { %v5799_v24 = vrot.slane %v5785_v60, %v11154_v21  ;;  %9969 = vmatpush3.bf16.msra.mxu1 %v10356_v50  ;;  %v5525_v15 = vrot.slane %v5511_v18, %v11154_v21  ;;  %v5526_v23 = vcombine.high %v5518_v6, %v5518_v6  ;;  %v5534_v33 = vrot.slane %v5518_v6, %v11154_v21 }
 0x4ab   :  { %v5751_v61 = vcombine.low %v5743_v57, %v5750_v20  ;;  %v5792_v53 = vrot.slane %v5784_v30, %v11154_v21  ;;  %9970 = vmatprep.subr.bf16.mxu1 %v10357_v0  ;;  %v5566_v4 = vrot.slane %v5357_v10, %v11154_v21  ;;  %v5802_v16 = vcombine.low %v5493_v3, %v5507_v47 }
 0x4ac   :  { %v5527_v19 = vcombine.high %v5525_v15, %v5525_v15  ;;  %v5541_v62 = vrot.slane %v5525_v15, %v11154_v21  ;;  %v5548_v5 = vrot.slane %v5526_v23, %v11154_v21  ;;  %v5556_v14 = vcombine.high %v5534_v33, %v5534_v33 }
 0x4ad   :  { %v5800_v35 = vcombine.low %v5792_v53, %v5799_v24  ;;  %v5574_v27 = vcombine.high %v5566_v4, %v5566_v4  ;;  %v5582_v12 = vrot.slane %v5566_v4, %v11154_v21  ;;  %v5803_v59 = vcombine.low %v5509_v31, %v5534_v33 }
 0x4ae   :  { %9971 = vmatpush3.bf16.msra.mxu1 %v10357_v0  ;;  %v5555_v38 = vrot.slane %v5527_v19, %v11154_v21  ;;  %v5557_v13 = vcombine.high %v5541_v62, %v5541_v62  ;;  %v5558_v40 = vcombine.high %v5548_v5, %v5548_v5  ;;  %v5804_v26 = vcombine.low %v5548_v5, %v5556_v14 }
 0x4af   :  { %v6018_v36 = vpack.c.bf16 %v5800_v35, %v5751_v61  ;;  %9972 = vmatprep.subr.bf16.mxu1 %v10358_v56  ;;  %v5596_v7 = vrot.slane %v5574_v27, %v11154_v21  ;;  %v5811_v48 = vrot.slane %v9567_v22, %v11154_v21  ;;  %v5818_v45 = vrot.slane %v5802_v16, %v11154_v21  ;;  %v10364_v35 = vld [vmem:[%s12372_s4 + $0x148] sm:$0xff]  }
 0x4b0   :  { %v5825_v44 = vrot.slane %v5803_v59, %v11154_v21  ;;  %v5832_v41 = vrot.slane %v5804_v26, %v11154_v21  ;;  %v5850_v55 = vcombine.low %v5558_v40, %v5541_v62  ;;  %v5851_v39 = vcombine.low %v5555_v38, %v5557_v13 }
 0x4b1   :  { %9974 = vmatprep.mubr.bf16.mxu1 %v6018_v36  ;;  %v5833_v9 = vcombine.low %v5811_v48, %v5818_v45  ;;  %v5852_v46 = vcombine.low %v5582_v12, %v5596_v7  ;;  %v9568_v28 = vcombine.high %v5582_v12, %v5596_v7  ;;  %v5559_v43 = vcombine.high %v5357_v10, %v5357_v10  ;;  %v6157_v7 = vld [vmem:[#allocation2 + $0x12] sm:$0x7f] }
 0x4b2   :  { %9973 = vmatpush3.bf16.msra.mxu1 %v10358_v56  ;;  %v5834_v50 = vcombine.low %v5825_v44, %v5832_v41  ;;  %v5860_v11 = vrot.slane %v5850_v55, %v11154_v21  ;;  %v5867_v17 = vrot.slane %v5851_v39, %v11154_v21  ;;  %v5607_v29 = vcombine.high %v5358_v49, %v5358_v49 }
 0x4b3   :  { %v5841_v52 = vrot.slane %v5833_v9, %v11154_v21  ;;  %v5874_v37 = vrot.slane %v5852_v46, %v11154_v21  ;;  %v5881_v8 = vrot.slane %v9568_v28, %v11154_v21  ;;  %9982 = vmatprep.subr.bf16.mxu1 %v11891_v32  ;;  %v5573_v51 = vrot.slane %v5559_v43, %v11154_v21  ;;  %v10365_v28 = vld [vmem:[%s12372_s4 + $0x150] sm:$0xff]  }
 0x4b4   :  { %v5848_v63 = vrot.slane %v5834_v50, %v11154_v21  ;;  %v5882_v2 = vcombine.low %v5860_v11, %v5867_v17  ;;  %v5614_v34 = vrot.slane %v5358_v49, %v11154_v21  ;;  %v5621_v25 = vrot.slane %v5607_v29, %v11154_v21  ;;  %v6158_v49 = vld [vmem:[#allocation2 + $0x22] sm:$0x7f] }
 0x4b5   :  { %v5883_v22 = vcombine.low %v5874_v37, %v5881_v8  ;;  %v5575_v42 = vcombine.high %v5573_v51, %v5573_v51  ;;  %v5589_v54 = vrot.slane %v5573_v51, %v11154_v21  ;;  %v5655_v58 = vcombine.high %v5359_v1, %v5359_v1 }
 0x4b6   :  { %v5849_v0 = vcombine.low %v5841_v52, %v5848_v63  ;;  %v5890_v3 = vrot.slane %v5882_v2, %v11154_v21  ;;  %v5622_v60 = vcombine.high %v5614_v34, %v5614_v34  ;;  %v5623_v10 = vcombine.high %v5621_v25, %v5621_v25 }
 0x4b7   :  { %v5897_v47 = vrot.slane %v5883_v22, %v11154_v21  ;;  %v5603_v18 = vrot.slane %v5575_v42, %v11154_v21  ;;  %v5605_v6 = vcombine.high %v5589_v54, %v5589_v54  ;;  %v5630_v57 = vrot.slane %v5614_v34, %v11154_v21 }
 0x4b8   :  { %v5637_v20 = vrot.slane %v5621_v25, %v11154_v21  ;;  %v5644_v30 = vrot.slane %v5622_v60, %v11154_v21  ;;  %v5651_v31 = vrot.slane %v5623_v10, %v11154_v21  ;;  %v5662_v24 = vrot.slane %v5359_v1, %v11154_v21  ;;  %v6159_v25 = vld [vmem:[#allocation2 + $0x32] sm:$0x7f] }
 0x4b9   :  { %v5898_v15 = vcombine.low %v5890_v3, %v5897_v47  ;;  %v5652_v23 = vcombine.high %v5630_v57, %v5630_v57  ;;  %v5669_v33 = vrot.slane %v5655_v58, %v11154_v21  ;;  %v5899_v61 = vcombine.low %v5589_v54, %v5603_v18  ;;  %v10369_v54 = vld [vmem:[%s12372_s4 + $0x158] sm:$0xff]  }
 0x4ba   :  { %v5653_v53 = vcombine.high %v5637_v20, %v5637_v20  ;;  %v5654_v56 = vcombine.high %v5644_v30, %v5644_v30  ;;  %v5670_v4 = vcombine.high %v5662_v24, %v5662_v24  ;;  %v5678_v16 = vrot.slane %v5662_v24, %v11154_v21 }
 0x4bb   :  { %v6019_v19 = vpack.c.bf16 %v5898_v15, %v5849_v0  ;;  %v5671_v62 = vcombine.high %v5669_v33, %v5669_v33  ;;  %v5685_v5 = vrot.slane %v5669_v33, %v11154_v21  ;;  %v5900_v14 = vcombine.low %v5605_v6, %v5630_v57 }
 0x4bc   :  { %v5692_v27 = vrot.slane %v5670_v4, %v11154_v21  ;;  %v5901_v12 = vcombine.low %v5644_v30, %v5652_v23  ;;  %v5902_v59 = vcombine.low %v5654_v56, %v5637_v20  ;;  %v5909_v38 = vrot.slane %v5899_v61, %v11154_v21 }
 0x4bd   :  { %9975 = vmatmul.mubr.bf16.vlgmr.msra.gmra.mrb[0].mxu1 %v6019_v19  ;;  %v5699_v13 = vrot.slane %v5671_v62, %v11154_v21  ;;  %v5916_v40 = vrot.slane %v5900_v14, %v11154_v21  ;;  %v5948_v26 = vcombine.low %v5651_v31, %v5653_v53  ;;  %v5701_v36 = vcombine.high %v5685_v5, %v5685_v5  ;;  %v10370_v14 = vld [vmem:[%s12372_s4 + $0x160] sm:$0xff]  }
 0x4be   :  { %v5923_v48 = vrot.slane %v5901_v12, %v11154_v21  ;;  %v5930_v45 = vrot.slane %v5902_v59, %v11154_v21  ;;  %v5949_v44 = vcombine.low %v5678_v16, %v5692_v27  ;;  %v9569_v41 = vcombine.high %v5678_v16, %v5692_v27  ;;  %9983 = vmatpush3.bf16.msra.mxu1 %v11891_v32 }
 0x4bf   :  { %v5931_v55 = vcombine.low %v5909_v38, %v5916_v40  ;;  %v5951_v39 = vcombine.low %v5685_v5, %v5699_v13  ;;  %v5958_v9 = vrot.slane %v5948_v26, %v11154_v21  ;;  %9984 = vmatprep.subr.bf16.mxu1 %v10364_v35  ;;  %v6003_v46 = vrot.slane %v5701_v36, %v11154_v21  ;;  %v10371_v36 = vld [vmem:[%s12372_s4 + $0x168] sm:$0xff]  }
 0x4c0   :  { %v5932_v43 = vcombine.low %v5923_v48, %v5930_v45  ;;  %v5965_v50 = vrot.slane %v5949_v44, %v11154_v21  ;;  %v5972_v11 = vrot.slane %v9569_v41, %v11154_v21  ;;  %v6171_v17 = vcombine.high %v6157_v7, %v6157_v7 }
 0x4c1   :  { %v5939_v32 = vrot.slane %v5931_v55, %v11154_v21  ;;  %v5979_v1 = vrot.slane %v5951_v39, %v11154_v21  ;;  %v6010_v29 = vrot.slane %v6003_v46, %v11154_v21  ;;  %v6178_v52 = vrot.slane %v6157_v7, %v11154_v21  ;;  %v6160_v46 = vld [vmem:[#allocation2 + $0x42] sm:$0x7f] }
 0x4c2   :  { %v5946_v37 = vrot.slane %v5932_v43, %v11154_v21  ;;  %v5980_v8 = vcombine.low %v5958_v9, %v5965_v50  ;;  %9985 = vmatpush3.bf16.msra.mxu1 %v10364_v35  ;;  %v6185_v51 = vrot.slane %v6171_v17, %v11154_v21  ;;  %v6219_v63 = vcombine.high %v6158_v49, %v6158_v49 }
 0x4c3   :  { %v5981_v2 = vcombine.low %v5972_v11, %v5979_v1  ;;  %v6021_v34 = vpack.c.bf16 %v6010_v29, %v6010_v29  ;;  %9986 = vmatprep.subr.bf16.mxu1 %v10365_v28  ;;  %v6186_v22 = vcombine.high %v6178_v52, %v6178_v52  ;;  %v6194_v42 = vrot.slane %v6178_v52, %v11154_v21  ;;  %v10372_v1 = vld [vmem:[%s12372_s4 + $0x170] sm:$0xff]  }
 0x4c4   :  { %v5947_v58 = vcombine.low %v5939_v32, %v5946_v37  ;;  %v5988_v0 = vrot.slane %v5980_v8, %v11154_v21  ;;  %v6187_v3 = vcombine.high %v6185_v51, %v6185_v51  ;;  %v6201_v60 = vrot.slane %v6185_v51, %v11154_v21  ;;  %v6161_v37 = vld [vmem:[#allocation2 + $0x52] sm:$0x7f] }
 0x4c5   :  { %v5995_v10 = vrot.slane %v5981_v2, %v11154_v21  ;;  %v6208_v47 = vrot.slane %v6186_v22, %v11154_v21  ;;  %v6226_v18 = vrot.slane %v6158_v49, %v11154_v21  ;;  %v6233_v6 = vrot.slane %v6219_v63, %v11154_v21 }
 0x4c6   :  { %9987 = vmatpush3.bf16.msra.mxu1 %v10365_v28  ;;  %v6215_v57 = vrot.slane %v6187_v3, %v11154_v21  ;;  %v6217_v20 = vcombine.high %v6201_v60, %v6201_v60  ;;  %v6267_v30 = vcombine.high %v6159_v25, %v6159_v25  ;;  %v6274_v31 = vrot.slane %v6159_v25, %v11154_v21 }
 0x4c7   :  { %v5996_v24 = vcombine.low %v5988_v0, %v5995_v10  ;;  %v6234_v15 = vcombine.high %v6226_v18, %v6226_v18  ;;  %v6235_v23 = vcombine.high %v6233_v6, %v6233_v6  ;;  %v6242_v33 = vrot.slane %v6226_v18, %v11154_v21  ;;  %9988 = vmatprep.subr.bf16.mxu1 %v10369_v54  ;;  %v10373_v10 = vld [vmem:[%s12372_s4 + $0x178] sm:$0xff]  }
 0x4c8   :  { %v6249_v61 = vrot.slane %v6233_v6, %v11154_v21  ;;  %v6281_v53 = vrot.slane %v6267_v30, %v11154_v21  ;;  %v6282_v56 = vcombine.high %v6274_v31, %v6274_v31  ;;  %v11956_v4 = vrot.slane %v6274_v31, %v11154_v21 }
 0x4c9   :  { %v6020_v16 = vpack.c.bf16 %v5996_v24, %v5947_v58  ;;  %v6256_v19 = vrot.slane %v6234_v15, %v11154_v21  ;;  %v6263_v62 = vrot.slane %v6235_v23, %v11154_v21  ;;  %v6264_v5 = vcombine.high %v6242_v33, %v6242_v33 }
 0x4ca   :  { %v6265_v35 = vcombine.high %v6249_v61, %v6249_v61  ;;  %v6283_v27 = vcombine.high %v6281_v53, %v6281_v53  ;;  %v11964_v12 = vrot.slane %v6282_v56, %v11154_v21  ;;  %v6507_v59 = vcombine.low %v6194_v42, %v6208_v47  ;;  %9989 = vmatpush3.bf16.msra.mxu1 %v10369_v54 }
 0x4cb   :  { %9978 = vmatprep.mubr.bf16.mxu1 %v6020_v16  ;;  %v6266_v38 = vcombine.high %v6256_v19, %v6256_v19  ;;  %v9578_v13 = vcombine.high %v6194_v42, %v6208_v47  ;;  %v6509_v40 = vcombine.low %v6201_v60, %v6215_v57  ;;  %v6510_v26 = vcombine.low %v6217_v20, %v6242_v33 }
 0x4cc   :  { %9979 = vmatmul.mubr.bf16.gmra.mrb[4].mxu1 %v6021_v34  ;;  %v6517_v7 = vrot.slane %v6507_v59, %v11154_v21  ;;  %v6556_v48 = vcombine.low %v6256_v19, %v6264_v5  ;;  %v6558_v45 = vcombine.low %v6263_v62, %v6265_v35  ;;  %v6559_v44 = vcombine.low %v11956_v4, %v11964_v12  ;;  %v12007_v5 = vld [vmem:[%s12372_s4 + $0x180] sm:$0xff]  }
 0x4cd   :  { %v6524_v41 = vrot.slane %v9578_v13, %v11154_v21  ;;  %v6531_v55 = vrot.slane %v6509_v40, %v11154_v21  ;;  %v6538_v39 = vrot.slane %v6510_v26, %v11154_v21  ;;  %v6557_v9 = vcombine.low %v6266_v38, %v6249_v61  ;;  %9990 = vmatprep.subr.bf16.mxu1 %v10370_v14  ;;  %v6162_v40 = vld [vmem:[#allocation2 + $0x62] sm:$0x7f] }
 0x4ce   :  { %v6566_v28 = vrot.slane %v6556_v48, %v11154_v21  ;;  %v6580_v49 = vrot.slane %v6558_v45, %v11154_v21  ;;  %v6587_v43 = vrot.slane %v6559_v44, %v11154_v21  ;;  %v9579_v50 = vcombine.high %v11956_v4, %v11964_v12  ;;  %9991 = vmatpush3.bf16.msra.mxu1 %v10370_v14  ;;  %v6163_v45 = vld [vmem:[#allocation2 + $0x72] sm:$0x7f] }
 0x4cf   :  { %v6539_v11 = vcombine.low %v6517_v7, %v6524_v41  ;;  %v6540_v17 = vcombine.low %v6531_v55, %v6538_v39  ;;  %v6573_v32 = vrot.slane %v6557_v9, %v11154_v21  ;;  %9992 = vmatprep.subr.bf16.mxu1 %v10371_v36  ;;  %v6297_v29 = vrot.slane %v6281_v53, %v11154_v21 }
 0x4d0   :  { %v6589_v52 = vcombine.low %v6580_v49, %v6587_v43  ;;  %v6311_v8 = vrot.slane %v6283_v27, %v11154_v21  ;;  %v6315_v51 = vcombine.high %v6160_v46, %v6160_v46  ;;  %v6322_v63 = vrot.slane %v6160_v46, %v11154_v21 }
 0x4d1   :  { %v6547_v2 = vrot.slane %v6539_v11, %v11154_v21  ;;  %v6554_v34 = vrot.slane %v6540_v17, %v11154_v21  ;;  %v6588_v25 = vcombine.low %v6566_v28, %v6573_v32  ;;  %v6313_v22 = vcombine.high %v6297_v29, %v6297_v29 }
 0x4d2   :  { %v6603_v42 = vrot.slane %v6589_v52, %v11154_v21  ;;  %9993 = vmatpush3.bf16.msra.mxu1 %v10371_v36  ;;  %v6329_v54 = vrot.slane %v6315_v51, %v11154_v21  ;;  %v6330_v58 = vcombine.high %v6322_v63, %v6322_v63  ;;  %v6338_v0 = vrot.slane %v6322_v63, %v11154_v21 }
 0x4d3   :  { %v6555_v3 = vcombine.low %v6547_v2, %v6554_v34  ;;  %v6596_v60 = vrot.slane %v6588_v25, %v11154_v21  ;;  %9994 = vmatprep.subr.bf16.mxu1 %v10372_v1  ;;  %v6370_v47 = vrot.slane %v6161_v37, %v11154_v21  ;;  %v6606_v18 = vcombine.low %v6297_v29, %v6311_v8 }
 0x4d4   :  { %v6331_v6 = vcombine.high %v6329_v54, %v6329_v54  ;;  %v6345_v57 = vrot.slane %v6329_v54, %v11154_v21  ;;  %v6352_v20 = vrot.slane %v6330_v58, %v11154_v21  ;;  %v6360_v30 = vcombine.high %v6338_v0, %v6338_v0 }
 0x4d5   :  { %v6604_v31 = vcombine.low %v6596_v60, %v6603_v42  ;;  %v6378_v24 = vcombine.high %v6370_v47, %v6370_v47  ;;  %v6386_v15 = vrot.slane %v6370_v47, %v11154_v21  ;;  %v6607_v23 = vcombine.low %v6313_v22, %v6338_v0 }
 0x4d6   :  { %9995 = vmatpush3.bf16.msra.mxu1 %v10372_v1  ;;  %v6359_v33 = vrot.slane %v6331_v6, %v11154_v21  ;;  %v6361_v61 = vcombine.high %v6345_v57, %v6345_v57  ;;  %v6362_v53 = vcombine.high %v6352_v20, %v6352_v20  ;;  %v6608_v56 = vcombine.low %v6352_v20, %v6360_v30 }
 0x4d7   :  { %v6822_v4 = vpack.c.bf16 %v6604_v31, %v6555_v3  ;;  %9996 = vmatprep.subr.bf16.mxu1 %v10373_v10  ;;  %v6400_v16 = vrot.slane %v6378_v24, %v11154_v21  ;;  %v6615_v19 = vrot.slane %v9579_v50, %v11154_v21  ;;  %v6622_v62 = vrot.slane %v6606_v18, %v11154_v21  ;;  %v10379_v31 = vld [vmem:[%s12372_s4 + $0x188] sm:$0xff]  }
 0x4d8   :  { %v6629_v14 = vrot.slane %v6607_v23, %v11154_v21  ;;  %v6636_v35 = vrot.slane %v6608_v56, %v11154_v21  ;;  %v6654_v27 = vcombine.low %v6362_v53, %v6345_v57  ;;  %v6655_v12 = vcombine.low %v6359_v33, %v6361_v61 }
 0x4d9   :  { %9998 = vmatprep.mubr.bf16.mxu1 %v6822_v4  ;;  %v6637_v59 = vcombine.low %v6615_v19, %v6622_v62  ;;  %v6656_v38 = vcombine.low %v6386_v15, %v6400_v16  ;;  %v9580_v13 = vcombine.high %v6386_v15, %v6400_v16  ;;  %v6363_v26 = vcombine.high %v6161_v37, %v6161_v37  ;;  %v6962_v16 = vld [vmem:[#allocation2 + $0x20] sm:$0x7f] }
 0x4da   :  { %9997 = vmatpush3.bf16.msra.mxu1 %v10373_v10  ;;  %v6638_v36 = vcombine.low %v6629_v14, %v6636_v35  ;;  %v6664_v7 = vrot.slane %v6654_v27, %v11154_v21  ;;  %v6671_v48 = vrot.slane %v6655_v12, %v11154_v21  ;;  %v6411_v44 = vcombine.high %v6162_v40, %v6162_v40 }
 0x4db   :  { %v6645_v41 = vrot.slane %v6637_v59, %v11154_v21  ;;  %v6678_v55 = vrot.slane %v6656_v38, %v11154_v21  ;;  %v6685_v39 = vrot.slane %v9580_v13, %v11154_v21  ;;  %10006 = vmatprep.subr.bf16.mxu1 %v12007_v5  ;;  %v6377_v9 = vrot.slane %v6363_v26, %v11154_v21  ;;  %v10380_v13 = vld [vmem:[%s12372_s4 + $0x190] sm:$0xff]  }
 0x4dc   :  { %v6652_v46 = vrot.slane %v6638_v36, %v11154_v21  ;;  %v6686_v28 = vcombine.low %v6664_v7, %v6671_v48  ;;  %v6418_v49 = vrot.slane %v6162_v40, %v11154_v21  ;;  %v6425_v43 = vrot.slane %v6411_v44, %v11154_v21  ;;  %v6963_v40 = vld [vmem:[#allocation2 + $0x30] sm:$0x7f] }
 0x4dd   :  { %v6687_v50 = vcombine.low %v6678_v55, %v6685_v39  ;;  %v6379_v11 = vcombine.high %v6377_v9, %v6377_v9  ;;  %v6393_v17 = vrot.slane %v6377_v9, %v11154_v21  ;;  %v6459_v32 = vcombine.high %v6163_v45, %v6163_v45 }
 0x4de   :  { %v6653_v1 = vcombine.low %v6645_v41, %v6652_v46  ;;  %v6694_v29 = vrot.slane %v6686_v28, %v11154_v21  ;;  %v6426_v52 = vcombine.high %v6418_v49, %v6418_v49  ;;  %v6427_v37 = vcombine.high %v6425_v43, %v6425_v43 }
 0x4df   :  { %v6701_v8 = vrot.slane %v6687_v50, %v11154_v21  ;;  %v6407_v51 = vrot.slane %v6379_v11, %v11154_v21  ;;  %v6409_v63 = vcombine.high %v6393_v17, %v6393_v17  ;;  %v6434_v2 = vrot.slane %v6418_v49, %v11154_v21 }
 0x4e0   :  { %v6441_v34 = vrot.slane %v6425_v43, %v11154_v21  ;;  %v6448_v25 = vrot.slane %v6426_v52, %v11154_v21  ;;  %v6455_v22 = vrot.slane %v6427_v37, %v11154_v21  ;;  %v6466_v42 = vrot.slane %v6163_v45, %v11154_v21 }
 0x4e1   :  { %v6702_v54 = vcombine.low %v6694_v29, %v6701_v8  ;;  %v6456_v58 = vcombine.high %v6434_v2, %v6434_v2  ;;  %v6473_v0 = vrot.slane %v6459_v32, %v11154_v21  ;;  %v6703_v3 = vcombine.low %v6393_v17, %v6407_v51  ;;  %v6964_v17 = vld [vmem:[#allocation2 + $0x40] sm:$0x7f]  ;;  %v10384_v29 = vld [vmem:[%s12372_s4 + $0x198] sm:$0xff]  }
 0x4e2   :  { %v6457_v60 = vcombine.high %v6441_v34, %v6441_v34  ;;  %v6458_v10 = vcombine.high %v6448_v25, %v6448_v25  ;;  %v6474_v47 = vcombine.high %v6466_v42, %v6466_v42  ;;  %v6482_v18 = vrot.slane %v6466_v42, %v11154_v21 }
 0x4e3   :  { %v6823_v6 = vpack.c.bf16 %v6702_v54, %v6653_v1  ;;  %v6475_v57 = vcombine.high %v6473_v0, %v6473_v0  ;;  %v6489_v20 = vrot.slane %v6473_v0, %v11154_v21  ;;  %v6704_v30 = vcombine.low %v6409_v63, %v6434_v2 }
 0x4e4   :  { %v6496_v24 = vrot.slane %v6474_v47, %v11154_v21  ;;  %v6705_v15 = vcombine.low %v6448_v25, %v6456_v58  ;;  %v6706_v23 = vcombine.low %v6458_v10, %v6441_v34  ;;  %v6713_v33 = vrot.slane %v6703_v3, %v11154_v21 }
 0x4e5   :  { %9999 = vmatmul.mubr.bf16.vlgmr.msra.gmra.mrb[0].mxu1 %v6823_v6  ;;  %v6503_v61 = vrot.slane %v6475_v57, %v11154_v21  ;;  %v6720_v53 = vrot.slane %v6704_v30, %v11154_v21  ;;  %v6752_v56 = vcombine.low %v6455_v22, %v6457_v60  ;;  %v6505_v4 = vcombine.high %v6489_v20, %v6489_v20 }
 0x4e6   :  { %v6727_v19 = vrot.slane %v6705_v15, %v11154_v21  ;;  %v6734_v62 = vrot.slane %v6706_v23, %v11154_v21  ;;  %v6753_v14 = vcombine.low %v6482_v18, %v6496_v24  ;;  %v9581_v35 = vcombine.high %v6482_v18, %v6496_v24  ;;  %10007 = vmatpush3.bf16.msra.mxu1 %v12007_v5  ;;  %v10385_v23 = vld [vmem:[%s12372_s4 + $0x1a0] sm:$0xff]  }
 0x4e7   :  { %v6735_v27 = vcombine.low %v6713_v33, %v6720_v53  ;;  %v6755_v12 = vcombine.low %v6489_v20, %v6503_v61  ;;  %v6762_v59 = vrot.slane %v6752_v56, %v11154_v21  ;;  %10008 = vmatprep.subr.bf16.mxu1 %v10379_v31  ;;  %v6807_v38 = vrot.slane %v6505_v4, %v11154_v21 }
 0x4e8   :  { %v6736_v26 = vcombine.low %v6727_v19, %v6734_v62  ;;  %v6769_v36 = vrot.slane %v6753_v14, %v11154_v21  ;;  %v6776_v7 = vrot.slane %v9581_v35, %v11154_v21  ;;  %v6976_v48 = vcombine.high %v6962_v16, %v6962_v16  ;;  %v12050_v45 = vpop.f32.mrb[96].mxu0  ;;  %v10386_v14 = vld [vmem:[%s12372_s4 + $0x1a8] sm:$0xff]  }
 0x4e9   :  { %v6743_v5 = vrot.slane %v6735_v27, %v11154_v21  ;;  %v6783_v44 = vrot.slane %v6755_v12, %v11154_v21  ;;  %v6814_v41 = vrot.slane %v6807_v38, %v11154_v21  ;;  %v6983_v55 = vrot.slane %v6962_v16, %v11154_v21  ;;  %v12056_v39 = vpop.f32.mrb[97].mxu0 }
 0x4ea   :  { %v6750_v9 = vrot.slane %v6736_v26, %v11154_v21  ;;  %v6784_v46 = vcombine.low %v6762_v59, %v6769_v36  ;;  %10009 = vmatpush3.bf16.msra.mxu1 %v10379_v31  ;;  %v6990_v28 = vrot.slane %v6976_v48, %v11154_v21  ;;  %v7024_v49 = vcombine.high %v6963_v40, %v6963_v40  ;;  %v12060_v43 = vpop.f32.mrb[98].mxu0  ;;  %v6965_v36 = vld [vmem:[#allocation2 + $0x50] sm:$0x7f] }
 0x4eb   :  { %v6785_v50 = vcombine.low %v6776_v7, %v6783_v44  ;;  %v6825_v11 = vpack.c.bf16 %v6814_v41, %v6814_v41  ;;  %10010 = vmatprep.subr.bf16.mxu1 %v10380_v13  ;;  %v6991_v32 = vcombine.high %v6983_v55, %v6983_v55  ;;  %v6999_v1 = vrot.slane %v6983_v55, %v11154_v21  ;;  %v12066_v52 = vpop.f32.mrb[99].mxu0 }
 0x4ec   :  { %v6751_v37 = vcombine.low %v6743_v5, %v6750_v9  ;;  %v6792_v8 = vrot.slane %v6784_v46, %v11154_v21  ;;  %v6992_v51 = vcombine.high %v6990_v28, %v6990_v28  ;;  %v7006_v63 = vrot.slane %v6990_v28, %v11154_v21  ;;  %v10387_v46 = vld [vmem:[%s12372_s4 + $0x1b0] sm:$0xff]  }
 0x4ed   :  { %v6799_v2 = vrot.slane %v6785_v50, %v11154_v21  ;;  %v7013_v34 = vrot.slane %v6991_v32, %v11154_v21  ;;  %v7031_v25 = vrot.slane %v6963_v40, %v11154_v21  ;;  %v7038_v22 = vrot.slane %v7024_v49, %v11154_v21  ;;  %v6966_v50 = vld [vmem:[#allocation2 + $0x60] sm:$0x7f] }
 0x4ee   :  { %10011 = vmatpush3.bf16.msra.mxu1 %v10380_v13  ;;  %v7020_v42 = vrot.slane %v6992_v51, %v11154_v21  ;;  %v7022_v54 = vcombine.high %v7006_v63, %v7006_v63  ;;  %v7072_v58 = vcombine.high %v6964_v17, %v6964_v17  ;;  %v7079_v0 = vrot.slane %v6964_v17, %v11154_v21 }
 0x4ef   :  { %v6800_v3 = vcombine.low %v6792_v8, %v6799_v2  ;;  %v7039_v60 = vcombine.high %v7031_v25, %v7031_v25  ;;  %v7040_v10 = vcombine.high %v7038_v22, %v7038_v22  ;;  %v7047_v47 = vrot.slane %v7031_v25, %v11154_v21  ;;  %10012 = vmatprep.subr.bf16.mxu1 %v10384_v29 }
 0x4f0   :  { %v7054_v18 = vrot.slane %v7038_v22, %v11154_v21  ;;  %v7086_v6 = vrot.slane %v7072_v58, %v11154_v21  ;;  %v7087_v57 = vcombine.high %v7079_v0, %v7079_v0  ;;  %v12080_v20 = vrot.slane %v7079_v0, %v11154_v21 }
 0x4f1   :  { %v6824_v30 = vpack.c.bf16 %v6800_v3, %v6751_v37  ;;  %v7061_v31 = vrot.slane %v7039_v60, %v11154_v21  ;;  %v7068_v24 = vrot.slane %v7040_v10, %v11154_v21  ;;  %v7069_v15 = vcombine.high %v7047_v47, %v7047_v47 }
 0x4f2   :  { %v7070_v33 = vcombine.high %v7054_v18, %v7054_v18  ;;  %v7088_v61 = vcombine.high %v7086_v6, %v7086_v6  ;;  %v12088_v53 = vrot.slane %v7087_v57, %v11154_v21  ;;  %v7312_v56 = vcombine.low %v6999_v1, %v7013_v34  ;;  %10013 = vmatpush3.bf16.msra.mxu1 %v10384_v29 }
 0x4f3   :  { %10002 = vmatprep.mubr.bf16.mxu1 %v6824_v30  ;;  %v7071_v4 = vcombine.high %v7061_v31, %v7061_v31  ;;  %v9590_v16 = vcombine.high %v6999_v1, %v7013_v34  ;;  %v7314_v19 = vcombine.low %v7006_v63, %v7020_v42  ;;  %v7315_v62 = vcombine.low %v7022_v54, %v7047_v47  ;;  %v10388_v42 = vld [vmem:[%s12372_s4 + $0x1b8] sm:$0xff]  }
 0x4f4   :  { %10003 = vmatmul.mubr.bf16.gmra.mrb[4].mxu1 %v6825_v11  ;;  %v7322_v35 = vrot.slane %v7312_v56, %v11154_v21  ;;  %v7361_v27 = vcombine.low %v7061_v31, %v7069_v15  ;;  %v7363_v12 = vcombine.low %v7068_v24, %v7070_v33  ;;  %v7364_v59 = vcombine.low %v12080_v20, %v12088_v53  ;;  %v6967_v56 = vld [vmem:[#allocation2 + $0x70] sm:$0x7f] }
 0x4f5   :  { %v7329_v38 = vrot.slane %v9590_v16, %v11154_v21  ;;  %v7336_v13 = vrot.slane %v7314_v19, %v11154_v21  ;;  %v7343_v40 = vrot.slane %v7315_v62, %v11154_v21  ;;  %v7362_v26 = vcombine.low %v7071_v4, %v7054_v18  ;;  %10014 = vmatprep.subr.bf16.mxu1 %v10385_v23 }
 0x4f6   :  { %v7371_v7 = vrot.slane %v7361_v27, %v11154_v21  ;;  %v7385_v48 = vrot.slane %v7363_v12, %v11154_v21  ;;  %v7392_v5 = vrot.slane %v7364_v59, %v11154_v21  ;;  %v9591_v44 = vcombine.high %v12080_v20, %v12088_v53  ;;  %10015 = vmatpush3.bf16.msra.mxu1 %v10385_v23  ;;  %v12131_v53 = vld [vmem:[%s12372_s4 + $0x1c0] sm:$0xff]  }
 0x4f7   :  { %v7344_v41 = vcombine.low %v7322_v35, %v7329_v38  ;;  %v7345_v55 = vcombine.low %v7336_v13, %v7343_v40  ;;  %v7378_v9 = vrot.slane %v7362_v26, %v11154_v21  ;;  %10016 = vmatprep.subr.bf16.mxu1 %v10386_v14  ;;  %v7102_v28 = vrot.slane %v7086_v6, %v11154_v21  ;;  %v6968_v40 = vld [vmem:[#allocation2 + $0x80] sm:$0x7f] }
 0x4f8   :  { %v7394_v49 = vcombine.low %v7385_v48, %v7392_v5  ;;  %v7116_v11 = vrot.slane %v7088_v61, %v11154_v21  ;;  %v7120_v17 = vcombine.high %v6965_v36, %v6965_v36  ;;  %v7127_v32 = vrot.slane %v6965_v36, %v11154_v21 }
 0x4f9   :  { %v7352_v1 = vrot.slane %v7344_v41, %v11154_v21  ;;  %v7359_v29 = vrot.slane %v7345_v55, %v11154_v21  ;;  %v7393_v37 = vcombine.low %v7371_v7, %v7378_v9  ;;  %v7118_v8 = vcombine.high %v7102_v28, %v7102_v28 }
 0x4fa   :  { %v7408_v51 = vrot.slane %v7394_v49, %v11154_v21  ;;  %10017 = vmatpush3.bf16.msra.mxu1 %v10386_v14  ;;  %v7134_v63 = vrot.slane %v7120_v17, %v11154_v21  ;;  %v7135_v2 = vcombine.high %v7127_v32, %v7127_v32  ;;  %v7143_v34 = vrot.slane %v7127_v32, %v11154_v21 }
 0x4fb   :  { %v7360_v25 = vcombine.low %v7352_v1, %v7359_v29  ;;  %v7401_v22 = vrot.slane %v7393_v37, %v11154_v21  ;;  %10018 = vmatprep.subr.bf16.mxu1 %v10387_v46  ;;  %v7175_v54 = vrot.slane %v6966_v50, %v11154_v21  ;;  %v7411_v58 = vcombine.low %v7102_v28, %v7116_v11 }
 0x4fc   :  { %v7136_v0 = vcombine.high %v7134_v63, %v7134_v63  ;;  %v7150_v3 = vrot.slane %v7134_v63, %v11154_v21  ;;  %v7157_v60 = vrot.slane %v7135_v2, %v11154_v21  ;;  %v7165_v10 = vcombine.high %v7143_v34, %v7143_v34 }
 0x4fd   :  { %v7409_v47 = vcombine.low %v7401_v22, %v7408_v51  ;;  %v7183_v18 = vcombine.high %v7175_v54, %v7175_v54  ;;  %v7191_v6 = vrot.slane %v7175_v54, %v11154_v21  ;;  %v7412_v57 = vcombine.low %v7118_v8, %v7143_v34 }
 0x4fe   :  { %10019 = vmatpush3.bf16.msra.mxu1 %v10387_v46  ;;  %v7164_v20 = vrot.slane %v7136_v0, %v11154_v21  ;;  %v7166_v30 = vcombine.high %v7150_v3, %v7150_v3  ;;  %v7167_v31 = vcombine.high %v7157_v60, %v7157_v60  ;;  %v7413_v24 = vcombine.low %v7157_v60, %v7165_v10 }
 0x4ff   :  { %v7627_v15 = vpack.c.bf16 %v7409_v47, %v7360_v25  ;;  %10020 = vmatprep.subr.bf16.mxu1 %v10388_v42  ;;  %v7205_v23 = vrot.slane %v7183_v18, %v11154_v21  ;;  %v7420_v33 = vrot.slane %v9591_v44, %v11154_v21  ;;  %v7427_v61 = vrot.slane %v7411_v58, %v11154_v21 }
 0x500   :  { %v7434_v4 = vrot.slane %v7412_v57, %v11154_v21  ;;  %v7441_v16 = vrot.slane %v7413_v24, %v11154_v21  ;;  %v7459_v19 = vcombine.low %v7167_v31, %v7150_v3  ;;  %v7460_v62 = vcombine.low %v7164_v20, %v7166_v30  ;;  %v10394_v20 = vld [vmem:[%s12372_s4 + $0x1c8] sm:$0xff]  }
 0x501   :  { %10022 = vmatprep.mubr.bf16.mxu1 %v7627_v15  ;;  %v7442_v14 = vcombine.low %v7420_v33, %v7427_v61  ;;  %v7461_v35 = vcombine.low %v7191_v6, %v7205_v23  ;;  %v9592_v27 = vcombine.high %v7191_v6, %v7205_v23  ;;  %v7168_v12 = vcombine.high %v6966_v50, %v6966_v50 }
 0x502   :  { %10021 = vmatpush3.bf16.msra.mxu1 %v10388_v42  ;;  %v7443_v59 = vcombine.low %v7434_v4, %v7441_v16  ;;  %v7469_v38 = vrot.slane %v7459_v19, %v11154_v21  ;;  %v7476_v13 = vrot.slane %v7460_v62, %v11154_v21  ;;  %v7216_v26 = vcombine.high %v6967_v56, %v6967_v56  ;;  %v7766_v16 = vld [vmem:[#allocation2 + $0x21] sm:$0x7f] }
 0x503   :  { %v7450_v36 = vrot.slane %v7442_v14, %v11154_v21  ;;  %v7483_v7 = vrot.slane %v7461_v35, %v11154_v21  ;;  %v7490_v48 = vrot.slane %v9592_v27, %v11154_v21  ;;  %10030 = vmatprep.subr.bf16.mxu1 %v12131_v53  ;;  %v7182_v5 = vrot.slane %v7168_v12, %v11154_v21 }
 0x504   :  { %v7457_v44 = vrot.slane %v7443_v59, %v11154_v21  ;;  %v7491_v41 = vcombine.low %v7469_v38, %v7476_v13  ;;  %v7223_v55 = vrot.slane %v6967_v56, %v11154_v21  ;;  %v7230_v9 = vrot.slane %v7216_v26, %v11154_v21  ;;  %v10395_v26 = vld [vmem:[%s12372_s4 + $0x1d0] sm:$0xff]  }
 0x505   :  { %v7492_v46 = vcombine.low %v7483_v7, %v7490_v48  ;;  %v7184_v28 = vcombine.high %v7182_v5, %v7182_v5  ;;  %v7198_v49 = vrot.slane %v7182_v5, %v11154_v21  ;;  %v7264_v50 = vcombine.high %v6968_v40, %v6968_v40 }
 0x506   :  { %v7458_v11 = vcombine.low %v7450_v36, %v7457_v44  ;;  %v7499_v17 = vrot.slane %v7491_v41, %v11154_v21  ;;  %v7231_v32 = vcombine.high %v7223_v55, %v7223_v55  ;;  %v7232_v1 = vcombine.high %v7230_v9, %v7230_v9  ;;  %v7767_v36 = vld [vmem:[#allocation2 + $0x31] sm:$0x7f] }
 0x507   :  { %v7506_v29 = vrot.slane %v7492_v46, %v11154_v21  ;;  %v7212_v37 = vrot.slane %v7184_v28, %v11154_v21  ;;  %v7214_v8 = vcombine.high %v7198_v49, %v7198_v49  ;;  %v7239_v51 = vrot.slane %v7223_v55, %v11154_v21 }
 0x508   :  { %v7246_v63 = vrot.slane %v7230_v9, %v11154_v21  ;;  %v7253_v2 = vrot.slane %v7231_v32, %v11154_v21  ;;  %v7260_v34 = vrot.slane %v7232_v1, %v11154_v21  ;;  %v7271_v25 = vrot.slane %v6968_v40, %v11154_v21  ;;  %v7768_v1 = vld [vmem:[#allocation2 + $0x41] sm:$0x7f] }
 0x509   :  { %v7507_v22 = vcombine.low %v7499_v17, %v7506_v29  ;;  %v7261_v42 = vcombine.high %v7239_v51, %v7239_v51  ;;  %v7278_v54 = vrot.slane %v7264_v50, %v11154_v21  ;;  %v7508_v58 = vcombine.low %v7198_v49, %v7212_v37 }
 0x50a   :  { %v7262_v0 = vcombine.high %v7246_v63, %v7246_v63  ;;  %v7263_v3 = vcombine.high %v7253_v2, %v7253_v2  ;;  %v7279_v60 = vcombine.high %v7271_v25, %v7271_v25  ;;  %v7287_v10 = vrot.slane %v7271_v25, %v11154_v21 }
 0x50b   :  { %v7628_v47 = vpack.c.bf16 %v7507_v22, %v7458_v11  ;;  %v7280_v18 = vcombine.high %v7278_v54, %v7278_v54  ;;  %v7294_v6 = vrot.slane %v7278_v54, %v11154_v21  ;;  %v7509_v57 = vcombine.low %v7214_v8, %v7239_v51  ;;  %v10399_v8 = vld [vmem:[%s12372_s4 + $0x1d8] sm:$0xff]  }
 0x50c   :  { %v7301_v30 = vrot.slane %v7279_v60, %v11154_v21  ;;  %v7510_v31 = vcombine.low %v7253_v2, %v7261_v42  ;;  %v7511_v24 = vcombine.low %v7263_v3, %v7246_v63  ;;  %v7518_v15 = vrot.slane %v7508_v58, %v11154_v21  ;;  %v12162_v23 = vpop.f32.mrb[100].mxu0 }
 0x50d   :  { %10023 = vmatmul.mubr.bf16.vlgmr.msra.gmra.mrb[0].mxu1 %v7628_v47  ;;  %v7308_v33 = vrot.slane %v7280_v18, %v11154_v21  ;;  %v7525_v61 = vrot.slane %v7509_v57, %v11154_v21  ;;  %v7557_v56 = vcombine.low %v7260_v34, %v7262_v0  ;;  %v7310_v4 = vcombine.high %v7294_v6, %v7294_v6  ;;  %v12166_v19 = vpop.f32.mrb[101].mxu0 }
 0x50e   :  { %v7532_v62 = vrot.slane %v7510_v31, %v11154_v21  ;;  %v7539_v14 = vrot.slane %v7511_v24, %v11154_v21  ;;  %v7558_v35 = vcombine.low %v7287_v10, %v7301_v30  ;;  %v9593_v27 = vcombine.high %v7287_v10, %v7301_v30  ;;  %10031 = vmatpush3.bf16.msra.mxu1 %v12131_v53  ;;  %v9885_v12 = vpop.f32.mrb[102].mxu0 }
 0x50f   :  { %v7540_v59 = vcombine.low %v7518_v15, %v7525_v61  ;;  %v7560_v38 = vcombine.low %v7294_v6, %v7308_v33  ;;  %v7567_v13 = vrot.slane %v7557_v56, %v11154_v21  ;;  %10032 = vmatprep.subr.bf16.mxu1 %v10394_v20  ;;  %v7612_v40 = vrot.slane %v7310_v4, %v11154_v21  ;;  %v12176_v7 = vpop.f32.mrb[103].mxu0  ;;  %v10400_v56 = vld [vmem:[%s12372_s4 + $0x1e0] sm:$0xff]  }
 0x510   :  { %v7541_v48 = vcombine.low %v7532_v62, %v7539_v14  ;;  %v7574_v5 = vrot.slane %v7558_v35, %v11154_v21  ;;  %v7581_v53 = vrot.slane %v9593_v27, %v11154_v21  ;;  %v7780_v44 = vcombine.high %v7766_v16, %v7766_v16 }
 0x511   :  { %v7548_v41 = vrot.slane %v7540_v59, %v11154_v21  ;;  %v7588_v55 = vrot.slane %v7560_v38, %v11154_v21  ;;  %v7619_v9 = vrot.slane %v7612_v40, %v11154_v21  ;;  %v7787_v46 = vrot.slane %v7766_v16, %v11154_v21  ;;  %v10401_v38 = vld [vmem:[%s12372_s4 + $0x1e8] sm:$0xff]  }
 0x512   :  { %v7555_v28 = vrot.slane %v7541_v48, %v11154_v21  ;;  %v7589_v49 = vcombine.low %v7567_v13, %v7574_v5  ;;  %10033 = vmatpush3.bf16.msra.mxu1 %v10394_v20  ;;  %v7794_v50 = vrot.slane %v7780_v44, %v11154_v21  ;;  %v7828_v11 = vcombine.high %v7767_v36, %v7767_v36 }
 0x513   :  { %v7590_v17 = vcombine.low %v7581_v53, %v7588_v55  ;;  %v7630_v32 = vpack.c.bf16 %v7619_v9, %v7619_v9  ;;  %10034 = vmatprep.subr.bf16.mxu1 %v10395_v26  ;;  %v7795_v29 = vcombine.high %v7787_v46, %v7787_v46  ;;  %v7803_v37 = vrot.slane %v7787_v46, %v11154_v21 }
 0x514   :  { %v7556_v51 = vcombine.low %v7548_v41, %v7555_v28  ;;  %v7597_v63 = vrot.slane %v7589_v49, %v11154_v21  ;;  %v7796_v2 = vcombine.high %v7794_v50, %v7794_v50  ;;  %v7810_v34 = vrot.slane %v7794_v50, %v11154_v21  ;;  %v7769_v41 = vld [vmem:[#allocation2 + $0x51] sm:$0x7f] }
 0x515   :  { %v7604_v25 = vrot.slane %v7590_v17, %v11154_v21  ;;  %v7817_v22 = vrot.slane %v7795_v29, %v11154_v21  ;;  %v7835_v42 = vrot.slane %v7767_v36, %v11154_v21  ;;  %v7842_v54 = vrot.slane %v7828_v11, %v11154_v21  ;;  %v10402_v17 = vld [vmem:[%s12372_s4 + $0x1f0] sm:$0xff]   ;;  %v7770_v29 = vld [vmem:[#allocation2 + $0x61] sm:$0x7f] }
 0x516   :  { %10035 = vmatpush3.bf16.msra.mxu1 %v10395_v26  ;;  %v7824_v58 = vrot.slane %v7796_v2, %v11154_v21  ;;  %v7826_v0 = vcombine.high %v7810_v34, %v7810_v34  ;;  %v7876_v3 = vcombine.high %v7768_v1, %v7768_v1  ;;  %v7883_v60 = vrot.slane %v7768_v1, %v11154_v21 }
 0x517   :  { %v7605_v10 = vcombine.low %v7597_v63, %v7604_v25  ;;  %v7843_v47 = vcombine.high %v7835_v42, %v7835_v42  ;;  %v7844_v18 = vcombine.high %v7842_v54, %v7842_v54  ;;  %v7851_v6 = vrot.slane %v7835_v42, %v11154_v21  ;;  %10036 = vmatprep.subr.bf16.mxu1 %v10399_v8 }
 0x518   :  { %v7858_v57 = vrot.slane %v7842_v54, %v11154_v21  ;;  %v7890_v20 = vrot.slane %v7876_v3, %v11154_v21  ;;  %v7891_v30 = vcombine.high %v7883_v60, %v7883_v60  ;;  %v12202_v31 = vrot.slane %v7883_v60, %v11154_v21  ;;  %v10403_v60 = vld [vmem:[%s12372_s4 + $0x1f8] sm:$0xff]  }
 0x519   :  { %v7629_v24 = vpack.c.bf16 %v7605_v10, %v7556_v51  ;;  %v7865_v15 = vrot.slane %v7843_v47, %v11154_v21  ;;  %v7872_v33 = vrot.slane %v7844_v18, %v11154_v21  ;;  %v7873_v61 = vcombine.high %v7851_v6, %v7851_v6 }
 0x51a   :  { %v7874_v4 = vcombine.high %v7858_v57, %v7858_v57  ;;  %v7892_v16 = vcombine.high %v7890_v20, %v7890_v20  ;;  %v12210_v62 = vrot.slane %v7891_v30, %v11154_v21  ;;  %v8116_v14 = vcombine.low %v7803_v37, %v7817_v22  ;;  %10037 = vmatpush3.bf16.msra.mxu1 %v10399_v8 }
 0x51b   :  { %10026 = vmatprep.mubr.bf16.mxu1 %v7629_v24  ;;  %v7875_v35 = vcombine.high %v7865_v15, %v7865_v15  ;;  %v9602_v27 = vcombine.high %v7803_v37, %v7817_v22  ;;  %v8118_v12 = vcombine.low %v7810_v34, %v7824_v58  ;;  %v8119_v59 = vcombine.low %v7826_v0, %v7851_v6 }
 0x51c   :  { %10027 = vmatmul.mubr.bf16.gmra.mrb[4].mxu1 %v7630_v32  ;;  %v8126_v13 = vrot.slane %v8116_v14, %v11154_v21  ;;  %v8165_v40 = vcombine.low %v7865_v15, %v7873_v61  ;;  %v8167_v26 = vcombine.low %v7872_v33, %v7874_v4  ;;  %v8168_v36 = vcombine.low %v12202_v31, %v12210_v62 }
 0x51d   :  { %v8133_v48 = vrot.slane %v9602_v27, %v11154_v21  ;;  %v8140_v5 = vrot.slane %v8118_v12, %v11154_v21  ;;  %v8147_v53 = vrot.slane %v8119_v59, %v11154_v21  ;;  %v8166_v44 = vcombine.low %v7875_v35, %v7858_v57  ;;  %10038 = vmatprep.subr.bf16.mxu1 %v10400_v56  ;;  %v7771_v27 = vld [vmem:[#allocation2 + $0x71] sm:$0x7f] }
 0x51e   :  { %v8175_v55 = vrot.slane %v8165_v40, %v11154_v21  ;;  %v8189_v9 = vrot.slane %v8167_v26, %v11154_v21  ;;  %v8196_v46 = vrot.slane %v8168_v36, %v11154_v21  ;;  %v9603_v28 = vcombine.high %v12202_v31, %v12210_v62  ;;  %10039 = vmatpush3.bf16.msra.mxu1 %v10400_v56 }
 0x51f   :  { %v8148_v49 = vcombine.low %v8126_v13, %v8133_v48  ;;  %v8149_v50 = vcombine.low %v8140_v5, %v8147_v53  ;;  %v8182_v11 = vrot.slane %v8166_v44, %v11154_v21  ;;  %10040 = vmatprep.subr.bf16.mxu1 %v10401_v38  ;;  %v7906_v32 = vrot.slane %v7890_v20, %v11154_v21 }
 0x520   :  { %v8198_v1 = vcombine.low %v8189_v9, %v8196_v46  ;;  %v7920_v37 = vrot.slane %v7892_v16, %v11154_v21  ;;  %v7924_v8 = vcombine.high %v7769_v41, %v7769_v41  ;;  %v7931_v51 = vrot.slane %v7769_v41, %v11154_v21  ;;  %v7772_v41 = vld [vmem:[#allocation2 + $0x81] sm:$0x7f] }
 0x521   :  { %v8156_v63 = vrot.slane %v8148_v49, %v11154_v21  ;;  %v8163_v2 = vrot.slane %v8149_v50, %v11154_v21  ;;  %v8197_v34 = vcombine.low %v8175_v55, %v8182_v11  ;;  %v7922_v25 = vcombine.high %v7906_v32, %v7906_v32  ;;  %v10444_v49 = vld [vmem:[%s12372_s4 + $0x200] sm:$0xff]  }
 0x522   :  { %v8212_v22 = vrot.slane %v8198_v1, %v11154_v21  ;;  %10041 = vmatpush3.bf16.msra.mxu1 %v10401_v38  ;;  %v7938_v42 = vrot.slane %v7924_v8, %v11154_v21  ;;  %v7939_v54 = vcombine.high %v7931_v51, %v7931_v51  ;;  %v7947_v58 = vrot.slane %v7931_v51, %v11154_v21 }
 0x523   :  { %v8164_v0 = vcombine.low %v8156_v63, %v8163_v2  ;;  %v8205_v3 = vrot.slane %v8197_v34, %v11154_v21  ;;  %10042 = vmatprep.subr.bf16.mxu1 %v10402_v17  ;;  %v7979_v10 = vrot.slane %v7770_v29, %v11154_v21  ;;  %v8215_v47 = vcombine.low %v7906_v32, %v7920_v37 }
 0x524   :  { %v7940_v18 = vcombine.high %v7938_v42, %v7938_v42  ;;  %v7954_v6 = vrot.slane %v7938_v42, %v11154_v21  ;;  %v7961_v57 = vrot.slane %v7939_v54, %v11154_v21  ;;  %v7969_v20 = vcombine.high %v7947_v58, %v7947_v58 }
 0x525   :  { %v8213_v30 = vcombine.low %v8205_v3, %v8212_v22  ;;  %v7987_v31 = vcombine.high %v7979_v10, %v7979_v10  ;;  %v7995_v24 = vrot.slane %v7979_v10, %v11154_v21  ;;  %v8216_v15 = vcombine.low %v7922_v25, %v7947_v58 }
 0x526   :  { %10043 = vmatpush3.bf16.msra.mxu1 %v10402_v17  ;;  %v7968_v33 = vrot.slane %v7940_v18, %v11154_v21  ;;  %v7970_v61 = vcombine.high %v7954_v6, %v7954_v6  ;;  %v7971_v56 = vcombine.high %v7961_v57, %v7961_v57  ;;  %v8217_v4 = vcombine.low %v7961_v57, %v7969_v20 }
 0x527   :  { %v8431_v16 = vpack.c.bf16 %v8213_v30, %v8164_v0  ;;  %10044 = vmatprep.subr.bf16.mxu1 %v10403_v60  ;;  %v8009_v62 = vrot.slane %v7987_v31, %v11154_v21  ;;  %v8224_v14 = vrot.slane %v9603_v28, %v11154_v21  ;;  %v8231_v35 = vrot.slane %v8215_v47, %v11154_v21 }
 0x528   :  { %v8238_v12 = vrot.slane %v8216_v15, %v11154_v21  ;;  %v8245_v59 = vrot.slane %v8217_v4, %v11154_v21  ;;  %v8263_v38 = vcombine.low %v7971_v56, %v7954_v6  ;;  %v8264_v13 = vcombine.low %v7968_v33, %v7970_v61 }
 0x529   :  { %10046 = vmatprep.mubr.bf16.mxu1 %v8431_v16  ;;  %v8246_v40 = vcombine.low %v8224_v14, %v8231_v35  ;;  %v8265_v26 = vcombine.low %v7995_v24, %v8009_v62  ;;  %v9604_v36 = vcombine.high %v7995_v24, %v8009_v62  ;;  %v7972_v48 = vcombine.high %v7770_v29, %v7770_v29 }
 0x52a   :  { %10045 = vmatpush3.bf16.msra.mxu1 %v10403_v60  ;;  %v8247_v5 = vcombine.low %v8238_v12, %v8245_v59  ;;  %v8273_v53 = vrot.slane %v8263_v38, %v11154_v21  ;;  %v8280_v44 = vrot.slane %v8264_v13, %v11154_v21  ;;  %v8020_v55 = vcombine.high %v7771_v27, %v7771_v27 }
 0x52b   :  { %v8254_v9 = vrot.slane %v8246_v40, %v11154_v21  ;;  %v8287_v46 = vrot.slane %v8265_v26, %v11154_v21  ;;  %v8294_v28 = vrot.slane %v9604_v36, %v11154_v21  ;;  %10078 = vmatprep.subr.bf16.mxu1 %v10444_v49  ;;  %v7986_v50 = vrot.slane %v7972_v48, %v11154_v21  ;;  %v8575_v36 = vld [vmem:[#allocation2 + $0x72] sm:$0x7f] }
 0x52c   :  { %v8261_v11 = vrot.slane %v8247_v5, %v11154_v21  ;;  %v8295_v17 = vcombine.low %v8273_v53, %v8280_v44  ;;  %v8027_v32 = vrot.slane %v7771_v27, %v11154_v21  ;;  %v8034_v1 = vrot.slane %v8020_v55, %v11154_v21  ;;  %v10445_v44 = vld [vmem:[%s12372_s4 + $0x208] sm:$0xff]  }
 0x52d   :  { %v8296_v29 = vcombine.low %v8287_v46, %v8294_v28  ;;  %v7988_v37 = vcombine.high %v7986_v50, %v7986_v50  ;;  %v8002_v8 = vrot.slane %v7986_v50, %v11154_v21  ;;  %v8068_v51 = vcombine.high %v7772_v41, %v7772_v41  ;;  %v8576_v28 = vld [vmem:[#allocation2 + $0x82] sm:$0x7f] }
 0x52e   :  { %v8262_v63 = vcombine.low %v8254_v9, %v8261_v11  ;;  %v8303_v2 = vrot.slane %v8295_v17, %v11154_v21  ;;  %v8035_v34 = vcombine.high %v8027_v32, %v8027_v32  ;;  %v8036_v25 = vcombine.high %v8034_v1, %v8034_v1  ;;  %v10446_v50 = vld [vmem:[#allocation2 + $0x62] sm:$0x7f] }
 0x52f   :  { %v8310_v22 = vrot.slane %v8296_v29, %v11154_v21  ;;  %v8016_v42 = vrot.slane %v7988_v37, %v11154_v21  ;;  %v8018_v54 = vcombine.high %v8002_v8, %v8002_v8  ;;  %v8043_v58 = vrot.slane %v8027_v32, %v11154_v21 }
 0x530   :  { %v8050_v0 = vrot.slane %v8034_v1, %v11154_v21  ;;  %v8057_v3 = vrot.slane %v8035_v34, %v11154_v21  ;;  %v8064_v60 = vrot.slane %v8036_v25, %v11154_v21  ;;  %v8075_v10 = vrot.slane %v7772_v41, %v11154_v21  ;;  %v10447_v34 = vld [vmem:[%s12372_s4 + $0x210] sm:$0xff]  }
 0x531   :  { %v8311_v47 = vcombine.low %v8303_v2, %v8310_v22  ;;  %v8065_v18 = vcombine.high %v8043_v58, %v8043_v58  ;;  %v8082_v6 = vrot.slane %v8068_v51, %v11154_v21  ;;  %v8312_v57 = vcombine.low %v8002_v8, %v8016_v42 }
 0x532   :  { %v8066_v20 = vcombine.high %v8050_v0, %v8050_v0  ;;  %v8067_v30 = vcombine.high %v8057_v3, %v8057_v3  ;;  %v8083_v31 = vcombine.high %v8075_v10, %v8075_v10  ;;  %v8091_v24 = vrot.slane %v8075_v10, %v11154_v21 }
 0x533   :  { %v8432_v15 = vpack.c.bf16 %v8311_v47, %v8262_v63  ;;  %v8084_v33 = vcombine.high %v8082_v6, %v8082_v6  ;;  %v8098_v61 = vrot.slane %v8082_v6, %v11154_v21  ;;  %v8313_v56 = vcombine.low %v8018_v54, %v8043_v58 }
 0x534   :  { %v8105_v4 = vrot.slane %v8083_v31, %v11154_v21  ;;  %v8314_v16 = vcombine.low %v8057_v3, %v8065_v18  ;;  %v8315_v62 = vcombine.low %v8067_v30, %v8050_v0  ;;  %v8322_v14 = vrot.slane %v8312_v57, %v11154_v21 }
 0x535   :  { %10047 = vmatmul.mubr.bf16.vlgmr.msra.gmra.mrb[0].mxu1 %v8432_v15  ;;  %v8112_v35 = vrot.slane %v8084_v33, %v11154_v21  ;;  %v8329_v27 = vrot.slane %v8313_v56, %v11154_v21  ;;  %v8361_v12 = vcombine.low %v8064_v60, %v8066_v20  ;;  %v8114_v59 = vcombine.high %v8098_v61, %v8098_v61  ;;  %v10448_v33 = vld [vmem:[%s12372_s4 + $0x218] sm:$0xff]  }
 0x536   :  { %v8336_v38 = vrot.slane %v8314_v16, %v11154_v21  ;;  %v8343_v13 = vrot.slane %v8315_v62, %v11154_v21  ;;  %v8362_v40 = vcombine.low %v8091_v24, %v8105_v4  ;;  %v9605_v26 = vcombine.high %v8091_v24, %v8105_v4  ;;  %10086 = vmatpush3.bf16.msra.mxu1 %v10444_v49 }
 0x537   :  { %v8344_v48 = vcombine.low %v8322_v14, %v8329_v27  ;;  %v8364_v5 = vcombine.low %v8098_v61, %v8112_v35  ;;  %v8371_v53 = vrot.slane %v8361_v12, %v11154_v21  ;;  %10079 = vmatprep.subr.bf16.mxu1 %v10445_v44  ;;  %v8416_v41 = vrot.slane %v8114_v59, %v11154_v21 }
 0x538   :  { %v8345_v55 = vcombine.low %v8336_v38, %v8343_v13  ;;  %v8378_v9 = vrot.slane %v8362_v40, %v11154_v21  ;;  %v8385_v46 = vrot.slane %v9605_v26, %v11154_v21  ;;  %v8776_v49 = vcombine.high %v10446_v50, %v10446_v50 }
 0x539   :  { %v8352_v11 = vrot.slane %v8344_v48, %v11154_v21  ;;  %v8392_v17 = vrot.slane %v8364_v5, %v11154_v21  ;;  %v8423_v32 = vrot.slane %v8416_v41, %v11154_v21  ;;  %v8824_v1 = vcombine.high %v8575_v36, %v8575_v36 }
 0x53a   :  { %v8359_v29 = vrot.slane %v8345_v55, %v11154_v21  ;;  %v8393_v37 = vcombine.low %v8371_v53, %v8378_v9  ;;  %10087 = vmatpush3.bf16.msra.mxu1 %v10445_v44  ;;  %v8790_v8 = vrot.slane %v8776_v49, %v11154_v21  ;;  %v8831_v51 = vrot.slane %v8575_v36, %v11154_v21 }
 0x53b   :  { %v8394_v63 = vcombine.low %v8385_v46, %v8392_v17  ;;  %v8434_v2 = vpack.c.bf16 %v8423_v32, %v8423_v32  ;;  %10080 = vmatprep.subr.bf16.mxu1 %v10447_v34  ;;  %v8838_v25 = vrot.slane %v8824_v1, %v11154_v21  ;;  %v8872_v22 = vcombine.high %v8576_v28, %v8576_v28  ;;  %v10449_v17 = vld [vmem:[%s12372_s4 + $0x220] sm:$0xff]  }
 0x53c   :  { %v8360_v42 = vcombine.low %v8352_v11, %v8359_v29  ;;  %v8401_v54 = vrot.slane %v8393_v37, %v11154_v21  ;;  %v8792_v58 = vcombine.high %v8790_v8, %v8790_v8  ;;  %v8806_v0 = vrot.slane %v8790_v8, %v11154_v21 }
 0x53d   :  { %v8408_v3 = vrot.slane %v8394_v63, %v11154_v21  ;;  %v8839_v60 = vcombine.high %v8831_v51, %v8831_v51  ;;  %v8840_v10 = vcombine.high %v8838_v25, %v8838_v25  ;;  %v8847_v47 = vrot.slane %v8831_v51, %v11154_v21  ;;  %v10450_v51 = vld [vmem:[%s12372_s4 + $0x228] sm:$0xff]  }
 0x53e   :  { %10088 = vmatpush3.bf16.msra.mxu1 %v10447_v34  ;;  %v8820_v18 = vrot.slane %v8792_v58, %v11154_v21  ;;  %v8822_v6 = vcombine.high %v8806_v0, %v8806_v0  ;;  %v8854_v57 = vrot.slane %v8838_v25, %v11154_v21  ;;  %v8879_v20 = vrot.slane %v8576_v28, %v11154_v21  ;;  %v10451_v58 = vld [vmem:[%s12372_s4 + $0x230] sm:$0xff]  }
 0x53f   :  { %v8409_v30 = vcombine.low %v8401_v54, %v8408_v3  ;;  %v8861_v31 = vrot.slane %v8839_v60, %v11154_v21  ;;  %v8868_v24 = vrot.slane %v8840_v10, %v11154_v21  ;;  %v8869_v15 = vcombine.high %v8847_v47, %v8847_v47  ;;  %10081 = vmatprep.subr.bf16.mxu1 %v10448_v33 }
 0x540   :  { %v8870_v61 = vcombine.high %v8854_v57, %v8854_v57  ;;  %v8886_v56 = vrot.slane %v8872_v22, %v11154_v21  ;;  %v8887_v4 = vcombine.high %v8879_v20, %v8879_v20  ;;  %v8895_v16 = vrot.slane %v8879_v20, %v11154_v21  ;;  %v12313_v62 = vpop.f32.mrb[104].mxu0 }
 0x541   :  { %v8433_v14 = vpack.c.bf16 %v8409_v30, %v8360_v42  ;;  %v8871_v35 = vcombine.high %v8861_v31, %v8861_v31  ;;  %v9116_v27 = vcombine.low %v8806_v0, %v8820_v18  ;;  %v9117_v12 = vcombine.low %v8822_v6, %v8847_v47  ;;  %v9337_v59 = vpop.f32.mrb[105].mxu0  ;;  %v10452_v47 = vld [vmem:[%s12372_s4 + $0x238] sm:$0xff]  }
 0x542   :  { %v8888_v38 = vcombine.high %v8886_v56, %v8886_v56  ;;  %v8902_v13 = vrot.slane %v8886_v56, %v11154_v21  ;;  %v8909_v40 = vrot.slane %v8887_v4, %v11154_v21  ;;  %v9118_v26 = vcombine.low %v8861_v31, %v8869_v15  ;;  %10089 = vmatpush3.bf16.msra.mxu1 %v10448_v33  ;;  %v10073_v36 = vpop.f32.mrb[106].mxu0 }
 0x543   :  { %10050 = vmatprep.mubr.bf16.mxu1 %v8433_v14  ;;  %v9119_v48 = vcombine.low %v8871_v35, %v8854_v57  ;;  %v9126_v5 = vrot.slane %v9116_v27, %v11154_v21  ;;  %v9133_v53 = vrot.slane %v9117_v12, %v11154_v21  ;;  %v9165_v44 = vcombine.low %v8868_v24, %v8870_v61  ;;  %v9340_v41 = vpop.f32.mrb[107].mxu0 }
 0x544   :  { %10051 = vmatmul.mubr.bf16.gmra.mrb[4].mxu1 %v8434_v2  ;;  %v8916_v55 = vrot.slane %v8888_v38, %v11154_v21  ;;  %v9140_v9 = vrot.slane %v9118_v26, %v11154_v21  ;;  %v9166_v46 = vcombine.low %v8895_v16, %v8909_v40  ;;  %v9617_v28 = vcombine.high %v8895_v16, %v8909_v40 }
 0x545   :  { %v9147_v50 = vrot.slane %v9119_v48, %v11154_v21  ;;  %v9148_v49 = vcombine.low %v9126_v5, %v9133_v53  ;;  %v9175_v11 = vrot.slane %v9165_v44, %v11154_v21  ;;  %10082 = vmatprep.subr.bf16.mxu1 %v10449_v17  ;;  %v8918_v32 = vcombine.high %v8902_v13, %v8902_v13 }
 0x546   :  { %v9168_v1 = vcombine.low %v8902_v13, %v8916_v55  ;;  %v9182_v29 = vrot.slane %v9166_v46, %v11154_v21  ;;  %v9189_v37 = vrot.slane %v9617_v28, %v11154_v21  ;;  %10090 = vmatpush3.bf16.msra.mxu1 %v10449_v17 }
 0x547   :  { %v9149_v8 = vcombine.low %v9140_v9, %v9147_v50  ;;  %10083 = vmatprep.subr.bf16.mxu1 %v10450_v51  ;;  %v9156_v63 = vrot.slane %v9148_v49, %v11154_v21  ;;  %v9220_v22 = vrot.slane %v8918_v32, %v11154_v21 }
 0x548   :  { %v9196_v2 = vrot.slane %v9168_v1, %v11154_v21  ;;  %v9197_v34 = vcombine.low %v9175_v11, %v9182_v29 }
 0x549   :  { %v9163_v25 = vrot.slane %v9149_v8, %v11154_v21  ;;  %v9227_v60 = vrot.slane %v9220_v22, %v11154_v21 }
 0x54a   :  { %v9198_v42 = vcombine.low %v9189_v37, %v9196_v2  ;;  %v9205_v54 = vrot.slane %v9197_v34, %v11154_v21  ;;  %10091 = vmatpush3.bf16.msra.mxu1 %v10450_v51 }
 0x54b   :  { %10084 = vmatprep.subr.bf16.mxu1 %v10451_v58  ;;  %v9164_v0 = vcombine.low %v9156_v63, %v9163_v25  ;;  %v9238_v6 = vpack.c.bf16 %v9227_v60, %v9227_v60 }
 0x54c   :  { %v9212_v3 = vrot.slane %v9198_v42, %v11154_v21 }
 0x54e   :  { %v9213_v10 = vcombine.low %v9205_v54, %v9212_v3  ;;  %10092 = vmatpush3.bf16.msra.mxu1 %v10451_v58 }
 0x54f   :  { %10085 = vmatprep.subr.bf16.mxu1 %v10452_v47 }
 0x550   :  { %v9237_v18 = vpack.c.bf16 %v9213_v10, %v9164_v0 }
 0x552   :  { %10074 = vmatprep.mubr.bf16.mxu1 %v9237_v18  ;;  %10093 = vmatpush3.bf16.msra.mxu1 %v10452_v47 }
 0x555   :  { %10075 = vmatmul.mubr.bf16.vlgmr.msra.gmra.mrb[4].mxu1 %v9238_v6 }
 0x608   :  { %v10048_v57 = vpop.f32.mrb[0].mxu1 }
 0x609   :  { %v10094_v20 = vadd.f32 %v10048_v57, %v12050_v45  ;;  %v8533_v30 = vpop.f32.mrb[1].mxu1 }
 0x60a   :  { %v10096_v31 = vadd.f32 %v8533_v30, %v12056_v39  ;;  %v10049_v24 = vpop.f32.mrb[2].mxu1 }
 0x60b   :  { %v10095_v21 = vadd.f32 %v10094_v20, %v12313_v62  ;;  %v10098_v15 = vadd.f32 %v10049_v24, %v12060_v43  ;;  %v8536_v33 = vpop.f32.mrb[3].mxu1 }
 0x60c   :  { %v10097_v61 = vadd.f32 %v10096_v31, %v9337_v59  ;;  %v10100_v56 = vadd.f32 %v8536_v33, %v12066_v52 }
 0x60d   :  { %v10099_v4 = vadd.f32 %v10098_v15, %v10073_v36 }
 0x60e   :  { %v10101_v16 = vadd.f32 %v10100_v56, %v9340_v41  ;;  %9374 = vxpose.xlu0.b32.start [1/7] (short) (narrow) %v10097_v61, 32 }
 0x612   :  { %9375 = vxpose.xlu0.b32.cont [2/7] (short) (narrow) %v10101_v16, 32 }
 0x616   :  { %9376 = vxpose.xlu0.b32.cont [3/7] (short) (narrow) %v10095_v21, 32 }
 0x61a   :  { %9377 = vxpose.xlu0.b32.cont [4/7] (short) (narrow) %v10099_v4, 32 }
 0x628   :  { %v10076_v14 = vpop.f32.mrb[4].mxu1 }
 0x629   :  { %v10102_v45 = vadd.f32 %v10076_v14, %v12162_v23  ;;  %v9353_v35 = vpop.f32.mrb[5].mxu1 }
 0x62a   :  { %v10103_v39 = vadd.f32 %v9353_v35, %v12166_v19  ;;  %v10077_v27 = vpop.f32.mrb[6].mxu1 }
 0x62b   :  { %v9356_v62 = vpop.f32.mrb[7].mxu1 }
 0x62c   :  { %v10104_v43 = vadd.f32 %v9356_v62, %v12176_v7  ;;  %9378 = vxpose.xlu0.b32.cont [5/7] (short) (narrow) %v10103_v39, 32 }
 0x630   :  { %9379 = vxpose.xlu0.b32.cont [6/7] (short) (narrow) %v10104_v43, 32 }
 0x634   :  { %9380 = vxpose.xlu0.b32.end [7/7] (short) (narrow) %v10102_v45, 32 }
 0x69c   :  { %v9390_v52 = vpop.trf.xlu0 }
 0x69d   :  { %9406 = vst.msk [vmem:[%s12373_s5] sm:$0xff] %vm953_vm1, %v9390_v52 }
 0x6a0   :  { %v9391_v12 = vpop.trf.xlu0 }
 0x6a1   :  { %9407 = vst.msk [vmem:[%s12373_s5 + $0x8] sm:$0xff] %vm953_vm1, %v9391_v12 }
 0x6a4   :  { %v9392_v23 = vpop.trf.xlu0 }
 0x6a5   :  { %9408 = vst.msk [vmem:[%s12373_s5 + $0x10] sm:$0xff] %vm953_vm1, %v9392_v23 }
 0x6a8   :  { %v9393_v19 = vpop.trf.xlu0 }
 0x6a9   :  { %9409 = vst.msk [vmem:[%s12373_s5 + $0x18] sm:$0xff] %vm953_vm1, %v9393_v19 }

</bundles_post_ra>
